<compile_context>
chip_gen: v6e
topology: v6e:2x2x1
jax: 0.10.0
libtpu: 0.0.40
codegen_flags: <defaults>
</compile_context>

<pallas_src>
import functools

import jax
import jax.numpy as jnp
from jax.experimental import pallas as pl
from jax.experimental.pallas import tpu as pltpu


# ----------------------------------------------------------------------------
# Kernel
# ----------------------------------------------------------------------------
def spp_kernel(x_ref, w1_ref, b1_ref, w2_ref, b2_ref, o_ref, *, width, c_):
    """One batch image. Tokens are (H*W, C) with channels on lanes."""
    n = x_ref.shape[1]                              # number of tokens (H*W), static

    # ---- cv1: 1x1 conv (BN scale pre-folded into w1) + bias + SiLU --------
    y = jnp.dot(x_ref[0], w1_ref[...], preferred_element_type=jnp.float32)
    y = y + b1_ref[...]
    x1 = y * jax.nn.sigmoid(y)                      # (N, c_) f32

    # ---- hoisted boundary-validity masks (shared by all 3 pool stages) ----
    tok = jax.lax.broadcasted_iota(jnp.int32, (n, 1), 0)
    col = tok % width                               # spatial column of each token
    w_valid = {1: col < (width - 1), 2: col < (width - 2),
               -1: col >= 1, -2: col >= 2}
    h_valid = {1: tok < (n - width), 2: tok < (n - 2 * width),
               -1: tok >= width, -2: tok >= 2 * width}

    def shifted_max(acc, a, d_tokens, valid):
        # acc = max(acc, a shifted by d_tokens tokens), only where the window stays
        # in-bounds (MaxPool2d -inf padding). pltpu.roll is circular (np.roll
        # semantics: out[i] = a[(i + d) % n] for shift = -d); the wrapped rows are
        # always inside the masked-out region, so the single select handles wrap too.
        r = pltpu.roll(a, shift=(-d_tokens) % n, axis=0)
        return jnp.where(valid, jnp.maximum(acc, r), acc)

    def pool5(a):
        # Separable 5x5 stride-1 max pool with -inf padding (== MaxPool2d(5, 1, 2)).
        row = a
        for d in (-2, -1, 1, 2):                    # 1-D window along W
            row = shifted_max(row, a, d, w_valid[d])
        out = row
        for d in (-2, -1, 1, 2):                    # 1-D window along H
            out = shifted_max(out, row, d * width, h_valid[d])
        return out

    # ---- cv2: accumulate the 4 channel groups as each pool is produced ----
    def cv2_part(a, k):
        return jnp.dot(a.astype(w2_ref.dtype), w2_ref[k * c_:(k + 1) * c_, :],
                       preferred_element_type=jnp.float32)

    z = cv2_part(x1, 0)
    p = pool5(x1)                                   # MaxPool2d(5, 1, 2)
    z += cv2_part(p, 1)
    p = pool5(p)                                    # == MaxPool2d(9, 1, 4)  (SPPF chain)
    z += cv2_part(p, 2)
    p = pool5(p)                                    # == MaxPool2d(13, 1, 6)
    z += cv2_part(p, 3)

    z = z + b2_ref[...]
    o_ref[0] = (z * jax.nn.sigmoid(z)).astype(o_ref.dtype)   # SiLU


# ----------------------------------------------------------------------------
# Wrapper
# ----------------------------------------------------------------------------
def spp_forward(x_nchw, params):
    B, C1, H, W = x_nchw.shape
    c_ = params["w1f"].shape[1]
    c2 = params["w2f"].shape[1]
    N = H * W

    # NCHW -> lane-dense tokens (B, H*W, C1); bf16 HBM storage / MXU operands.
    # TODO(synk): if the surrounding model can run NHWC, drop these transposes — they
    # roughly double the end-to-end HBM traffic of this memory-bound op.
    tokens = jnp.transpose(x_nchw, (0, 2, 3, 1)).reshape(B, N, C1).astype(jnp.bfloat16)
    w1 = params["w1f"].astype(jnp.bfloat16)
    w2 = params["w2f"].astype(jnp.bfloat16)

    const = lambda shape: pl.BlockSpec(shape, lambda b: (0, 0))   # grid-invariant weights

    out = pl.pallas_call(
        functools.partial(spp_kernel, width=W, c_=c_),
        out_shape=jax.ShapeDtypeStruct((B, N, c2), jnp.float32),
        grid=(B,),
        in_specs=[
            pl.BlockSpec((1, N, C1), lambda b: (b, 0, 0)),
            const((C1, c_)),
            const((1, c_)),
            const((4 * c_, c2)),
            const((1, c2)),
        ],
        out_specs=pl.BlockSpec((1, N, c2), lambda b: (b, 0, 0)),
        compiler_params=pltpu.CompilerParams(
            dimension_semantics=("parallel",),
            vmem_limit_bytes=64 * 1024 * 1024,
        ),
    )(tokens, w1, params["b1"], w2, params["b2"])
    # TODO(synk): for very large images (token count beyond the VMEM budget, esp.
    # v7x's 64 MiB), add an H-row grid axis with a 6-row halo via manual DMA instead
    # of one-block-per-image.

    # tokens -> NCHW, matching the PyTorch output layout.
    return jnp.transpose(out.reshape(B, H, W, c2), (0, 3, 1, 2))


# ----------------------------------------------------------------------------
# Deterministic parameter init (shapes from SPP.__init__, BN in eval mode,
# BN scale folded into the conv weights — mathematically exact).
# ----------------------------------------------------------------------------
def init_params(key, c1, c2, eps=1e-5):
    c_ = c1 // 2
    keys = iter(jax.random.split(key, 12))

    def rnd(shape, scale=0.1):
        return (scale * jax.random.normal(next(keys), shape)).astype(jnp.float32)

    def bn_fold(c):
        gamma = 1.0 + rnd((c,))
        beta = rnd((c,))
        r_mean = rnd((c,))
        r_var = 1.0 + jnp.abs(rnd((c,)))
        scale = gamma / jnp.sqrt(r_var + eps)
        bias = beta - r_mean * scale
        return scale, bias

    w1 = rnd((c_, c1))                  # Conv2d(c1, c_, 1).weight  (c_, c1, 1, 1)
    s1, b1 = bn_fold(c_)
    w2 = rnd((c2, 4 * c_))              # Conv2d(4*c_, c2, 1).weight
    s2, b2 = bn_fold(c2)
    return {
        "w1f": jnp.asarray(w1.T) * s1[None, :],   # (c1, c_), BN scale folded in
        "b1": b1.reshape(1, c_),
        "w2f": jnp.asarray(w2.T) * s2[None, :],   # (4*c_, c2), BN scale folded in
        "b2": b2.reshape(1, c2),
    }


# ----------------------------------------------------------------------------
# Pure-JAX reference (f32 throughout) for a correctness self-check
# ----------------------------------------------------------------------------
def reference_forward(x_nchw, params):
    def conv_bias_silu(x, w, b):
        B, C, H, W = x.shape
        t = jnp.transpose(x, (0, 2, 3, 1)).reshape(-1, C)
        y = jnp.dot(t, w, precision=jax.lax.Precision.HIGHEST) + b
        y = y * jax.nn.sigmoid(y)
        co = w.shape[1]
        return jnp.transpose(y.reshape(B, H, W, co), (0, 3, 1, 2))

    x1 = conv_bias_silu(x_nchw, params["w1f"], params["b1"])
    pools = [x1]
    for k in (5, 9, 13):
        pools.append(jax.lax.reduce_window(
            x1, -jnp.inf, jax.lax.max, (1, 1, k, k), (1, 1, 1, 1),
            [(0, 0), (0, 0), (k // 2, k // 2), (k // 2, k // 2)]))
    cat = jnp.concatenate(pools, axis=1)
    return conv_bias_silu(cat, params["w2f"], params["b2"])


# ----------------------------------------------------------------------------
if __name__ == "__main__":
    B, C1, C2 = 2, 16, 32
    H = W = 16

    key = jax.random.PRNGKey(0)
    kx, kp = jax.random.split(key)
    x = jax.random.normal(kx, (B, C1, H, W), dtype=jnp.float32)
    params = init_params(kp, C1, C2)

    fwd = jax.jit(spp_forward)
    out = jax.block_until_ready(fwd(x, params))

    assert out.shape == (B, C2, H, W) and out.dtype == jnp.float32
    assert bool(jnp.all(jnp.isfinite(out)))

    ref = jax.block_until_ready(reference_forward(x, params))
    max_diff = float(jnp.max(jnp.abs(out - ref)))
    # bf16 MXU operands with f32 accumulation -> ~1e-2-level agreement with the f32
    # reference; pooling, boundary handling and the SPPF chaining are exact.
    assert bool(jnp.allclose(out, ref, atol=2e-2, rtol=2e-2)), max_diff

    print("KERNEL_OK")
</pallas_src>

<mosaic_0001>
module attributes {stable_mosaic.version = 11 : i64} {
  func.func @spp_kernel(%arg0: i32, %arg1: memref<1x256x16xbf16, #tpu.memory_space<vmem>>, %arg2: memref<16x8xbf16, #tpu.memory_space<vmem>>, %arg3: memref<1x8xf32, #tpu.memory_space<vmem>>, %arg4: memref<32x32xbf16, #tpu.memory_space<vmem>>, %arg5: memref<1x32xf32, #tpu.memory_space<vmem>>, %arg6: memref<1x256x32xf32, #tpu.memory_space<vmem>>) attributes {dimension_semantics = [#tpu.dimension_semantics<parallel>], iteration_bounds = array<i64: 2>, scalar_prefetch = 0 : i64, scratch_operands = 0 : i64, tpu.core_type = #tpu.core_type<tc>, window_params = [{transform_indices = @transform_0, window_bounds = array<i64: 1, 256, 16>}, {pipeline_mode = #tpu.pipeline_mode<synchronous>, transform_indices = @transform_1, window_bounds = array<i64: 16, 8>}, {pipeline_mode = #tpu.pipeline_mode<synchronous>, transform_indices = @transform_2, window_bounds = array<i64: 1, 8>}, {pipeline_mode = #tpu.pipeline_mode<synchronous>, transform_indices = @transform_3, window_bounds = array<i64: 32, 32>}, {pipeline_mode = #tpu.pipeline_mode<synchronous>, transform_indices = @transform_4, window_bounds = array<i64: 1, 32>}, {transform_indices = @transform_5, window_bounds = array<i64: 1, 256, 32>}]} {
    %c0 = arith.constant 0 : index
    %c0_0 = arith.constant 0 : index
    %c0_1 = arith.constant 0 : index
    %0 = vector.load %arg1[%c0, %c0_0, %c0_1] : memref<1x256x16xbf16, #tpu.memory_space<vmem>>, vector<1x256x16xbf16>
    %1 = vector.shape_cast %0 : vector<1x256x16xbf16> to vector<256x16xbf16>
    %c0_2 = arith.constant 0 : index
    %c0_3 = arith.constant 0 : index
    %2 = vector.load %arg2[%c0_2, %c0_3] : memref<16x8xbf16, #tpu.memory_space<vmem>>, vector<16x8xbf16>
    %cst = arith.constant dense<0.000000e+00> : vector<256x8xf32>
    %3 = tpu.matmul %1, %2, %cst {dimension_numbers = #tpu.dot_dimension_numbers<[1], [0], [0], [1], [0, 0, 1, 1], [], []>} : vector<256x16xbf16>, vector<16x8xbf16>, vector<256x8xf32> -> vector<256x8xf32>
    %c0_4 = arith.constant 0 : index
    %c0_5 = arith.constant 0 : index
    %4 = vector.load %arg3[%c0_4, %c0_5] : memref<1x8xf32, #tpu.memory_space<vmem>>, vector<1x8xf32>
    %5 = vector.broadcast %4 : vector<1x8xf32> to vector<256x8xf32>
    %6 = arith.addf %3, %5 : vector<256x8xf32>
    %7 = arith.negf %6 : vector<256x8xf32>
    %8 = math.exp %7 : vector<256x8xf32>
    %cst_6 = arith.constant 1.000000e+00 : f32
    %9 = vector.broadcast %cst_6 : f32 to vector<256x8xf32>
    %10 = arith.addf %9, %8 : vector<256x8xf32>
    %11 = arith.divf %9, %10 : vector<256x8xf32>
    %12 = arith.mulf %6, %11 : vector<256x8xf32>
    %13 = tpu.iota {dimensions = array<i32: 0>} : vector<256x1xi32>
    %c16_i32 = arith.constant 16 : i32
    %c0_i32 = arith.constant 0 : i32
    %14 = arith.cmpi eq, %c16_i32, %c0_i32 : i32
    %c1_i32 = arith.constant 1 : i32
    %15 = arith.select %14, %c1_i32, %c16_i32 : i32
    %16 = vector.broadcast %15 : i32 to vector<256x1xi32>
    %17 = arith.remsi %13, %16 : vector<256x1xi32>
    %c0_i32_7 = arith.constant 0 : i32
    %18 = vector.broadcast %c0_i32_7 : i32 to vector<256x1xi32>
    %19 = arith.cmpi ne, %17, %18 : vector<256x1xi32>
    %c0_i32_8 = arith.constant 0 : i32
    %20 = vector.broadcast %c0_i32_8 : i32 to vector<256x1xi32>
    %21 = arith.cmpi slt, %17, %20 : vector<256x1xi32>
    %c0_i32_9 = arith.constant 0 : i32
    %22 = arith.cmpi slt, %15, %c0_i32_9 : i32
    %23 = vector.broadcast %22 : i1 to vector<256x1xi1>
    %24 = vector.broadcast %23 : vector<256x1xi1> to vector<256x1xi1>
    %25 = arith.xori %21, %24 : vector<256x1xi1>
    %26 = arith.andi %25, %19 : vector<256x1xi1>
    %27 = vector.broadcast %15 : i32 to vector<256x1xi32>
    %28 = arith.addi %17, %27 : vector<256x1xi32>
    %29 = arith.select %26, %28, %17 : vector<256x1xi1>, vector<256x1xi32>
    %c15_i32 = arith.constant 15 : i32
    %30 = vector.broadcast %c15_i32 : i32 to vector<256x1xi32>
    %31 = arith.cmpi slt, %29, %30 : vector<256x1xi32>
    %c14_i32 = arith.constant 14 : i32
    %32 = vector.broadcast %c14_i32 : i32 to vector<256x1xi32>
    %33 = arith.cmpi slt, %29, %32 : vector<256x1xi32>
    %c1_i32_10 = arith.constant 1 : i32
    %34 = vector.broadcast %c1_i32_10 : i32 to vector<256x1xi32>
    %35 = arith.cmpi sge, %29, %34 : vector<256x1xi32>
    %c2_i32 = arith.constant 2 : i32
    %36 = vector.broadcast %c2_i32 : i32 to vector<256x1xi32>
    %37 = arith.cmpi sge, %29, %36 : vector<256x1xi32>
    %c240_i32 = arith.constant 240 : i32
    %38 = vector.broadcast %c240_i32 : i32 to vector<256x1xi32>
    %39 = arith.cmpi slt, %13, %38 : vector<256x1xi32>
    %c224_i32 = arith.constant 224 : i32
    %40 = vector.broadcast %c224_i32 : i32 to vector<256x1xi32>
    %41 = arith.cmpi slt, %13, %40 : vector<256x1xi32>
    %c16_i32_11 = arith.constant 16 : i32
    %42 = vector.broadcast %c16_i32_11 : i32 to vector<256x1xi32>
    %43 = arith.cmpi sge, %13, %42 : vector<256x1xi32>
    %c32_i32 = arith.constant 32 : i32
    %44 = vector.broadcast %c32_i32 : i32 to vector<256x1xi32>
    %45 = arith.cmpi sge, %13, %44 : vector<256x1xi32>
    %46 = arith.truncf %12 : vector<256x8xf32> to vector<256x8xbf16>
    %c0_12 = arith.constant 0 : index
    %c0_13 = arith.constant 0 : index
    %47 = vector.load %arg4[%c0_12, %c0_13] : memref<32x32xbf16, #tpu.memory_space<vmem>>, vector<8x32xbf16>
    %cst_14 = arith.constant dense<0.000000e+00> : vector<256x32xf32>
    %48 = tpu.matmul %46, %47, %cst_14 {dimension_numbers = #tpu.dot_dimension_numbers<[1], [0], [0], [1], [0, 0, 1, 1], [], []>} : vector<256x8xbf16>, vector<8x32xbf16>, vector<256x32xf32> -> vector<256x32xf32>
    %c2_i32_15 = arith.constant 2 : i32
    %49 = tpu.dynamic_rotate %12 by %c2_i32_15 dim 0 : vector<256x8xf32>, i32 -> vector<256x8xf32>
    %50 = arith.maximumf %12, %49 : vector<256x8xf32>
    %51 = vector.shape_cast %37 : vector<256x1xi1> to vector<256x1xi1>
    %52 = vector.broadcast %51 : vector<256x1xi1> to vector<256x8xi1>
    %53 = arith.select %52, %50, %12 : vector<256x8xi1>, vector<256x8xf32>
    %c1_i32_16 = arith.constant 1 : i32
    %54 = tpu.dynamic_rotate %12 by %c1_i32_16 dim 0 : vector<256x8xf32>, i32 -> vector<256x8xf32>
    %55 = arith.maximumf %53, %54 : vector<256x8xf32>
    %56 = vector.shape_cast %35 : vector<256x1xi1> to vector<256x1xi1>
    %57 = vector.broadcast %56 : vector<256x1xi1> to vector<256x8xi1>
    %58 = arith.select %57, %55, %53 : vector<256x8xi1>, vector<256x8xf32>
    %c255_i32 = arith.constant 255 : i32
    %59 = tpu.dynamic_rotate %12 by %c255_i32 dim 0 : vector<256x8xf32>, i32 -> vector<256x8xf32>
    %60 = arith.maximumf %58, %59 : vector<256x8xf32>
    %61 = vector.shape_cast %31 : vector<256x1xi1> to vector<256x1xi1>
    %62 = vector.broadcast %61 : vector<256x1xi1> to vector<256x8xi1>
    %63 = arith.select %62, %60, %58 : vector<256x8xi1>, vector<256x8xf32>
    %c254_i32 = arith.constant 254 : i32
    %64 = tpu.dynamic_rotate %12 by %c254_i32 dim 0 : vector<256x8xf32>, i32 -> vector<256x8xf32>
    %65 = arith.maximumf %63, %64 : vector<256x8xf32>
    %66 = vector.shape_cast %33 : vector<256x1xi1> to vector<256x1xi1>
    %67 = vector.broadcast %66 : vector<256x1xi1> to vector<256x8xi1>
    %68 = arith.select %67, %65, %63 : vector<256x8xi1>, vector<256x8xf32>
    %c32_i32_17 = arith.constant 32 : i32
    %69 = tpu.dynamic_rotate %68 by %c32_i32_17 dim 0 : vector<256x8xf32>, i32 -> vector<256x8xf32>
    %70 = arith.maximumf %68, %69 : vector<256x8xf32>
    %71 = vector.shape_cast %45 : vector<256x1xi1> to vector<256x1xi1>
    %72 = vector.broadcast %71 : vector<256x1xi1> to vector<256x8xi1>
    %73 = arith.select %72, %70, %68 : vector<256x8xi1>, vector<256x8xf32>
    %c16_i32_18 = arith.constant 16 : i32
    %74 = tpu.dynamic_rotate %68 by %c16_i32_18 dim 0 : vector<256x8xf32>, i32 -> vector<256x8xf32>
    %75 = arith.maximumf %73, %74 : vector<256x8xf32>
    %76 = vector.shape_cast %43 : vector<256x1xi1> to vector<256x1xi1>
    %77 = vector.broadcast %76 : vector<256x1xi1> to vector<256x8xi1>
    %78 = arith.select %77, %75, %73 : vector<256x8xi1>, vector<256x8xf32>
    %c240_i32_19 = arith.constant 240 : i32
    %79 = tpu.dynamic_rotate %68 by %c240_i32_19 dim 0 : vector<256x8xf32>, i32 -> vector<256x8xf32>
    %80 = arith.maximumf %78, %79 : vector<256x8xf32>
    %81 = vector.shape_cast %39 : vector<256x1xi1> to vector<256x1xi1>
    %82 = vector.broadcast %81 : vector<256x1xi1> to vector<256x8xi1>
    %83 = arith.select %82, %80, %78 : vector<256x8xi1>, vector<256x8xf32>
    %c224_i32_20 = arith.constant 224 : i32
    %84 = tpu.dynamic_rotate %68 by %c224_i32_20 dim 0 : vector<256x8xf32>, i32 -> vector<256x8xf32>
    %85 = arith.maximumf %83, %84 : vector<256x8xf32>
    %86 = vector.shape_cast %41 : vector<256x1xi1> to vector<256x1xi1>
    %87 = vector.broadcast %86 : vector<256x1xi1> to vector<256x8xi1>
    %88 = arith.select %87, %85, %83 : vector<256x8xi1>, vector<256x8xf32>
    %89 = arith.truncf %88 : vector<256x8xf32> to vector<256x8xbf16>
    %c8 = arith.constant 8 : index
    %c0_21 = arith.constant 0 : index
    %90 = vector.load %arg4[%c8, %c0_21] : memref<32x32xbf16, #tpu.memory_space<vmem>>, vector<8x32xbf16>
    %cst_22 = arith.constant dense<0.000000e+00> : vector<256x32xf32>
    %91 = tpu.matmul %89, %90, %cst_22 {dimension_numbers = #tpu.dot_dimension_numbers<[1], [0], [0], [1], [0, 0, 1, 1], [], []>} : vector<256x8xbf16>, vector<8x32xbf16>, vector<256x32xf32> -> vector<256x32xf32>
    %92 = arith.addf %48, %91 : vector<256x32xf32>
    %c2_i32_23 = arith.constant 2 : i32
    %93 = tpu.dynamic_rotate %88 by %c2_i32_23 dim 0 : vector<256x8xf32>, i32 -> vector<256x8xf32>
    %94 = arith.maximumf %88, %93 : vector<256x8xf32>
    %95 = vector.shape_cast %37 : vector<256x1xi1> to vector<256x1xi1>
    %96 = vector.broadcast %95 : vector<256x1xi1> to vector<256x8xi1>
    %97 = arith.select %96, %94, %88 : vector<256x8xi1>, vector<256x8xf32>
    %c1_i32_24 = arith.constant 1 : i32
    %98 = tpu.dynamic_rotate %88 by %c1_i32_24 dim 0 : vector<256x8xf32>, i32 -> vector<256x8xf32>
    %99 = arith.maximumf %97, %98 : vector<256x8xf32>
    %100 = vector.shape_cast %35 : vector<256x1xi1> to vector<256x1xi1>
    %101 = vector.broadcast %100 : vector<256x1xi1> to vector<256x8xi1>
    %102 = arith.select %101, %99, %97 : vector<256x8xi1>, vector<256x8xf32>
    %c255_i32_25 = arith.constant 255 : i32
    %103 = tpu.dynamic_rotate %88 by %c255_i32_25 dim 0 : vector<256x8xf32>, i32 -> vector<256x8xf32>
    %104 = arith.maximumf %102, %103 : vector<256x8xf32>
    %105 = vector.shape_cast %31 : vector<256x1xi1> to vector<256x1xi1>
    %106 = vector.broadcast %105 : vector<256x1xi1> to vector<256x8xi1>
    %107 = arith.select %106, %104, %102 : vector<256x8xi1>, vector<256x8xf32>
    %c254_i32_26 = arith.constant 254 : i32
    %108 = tpu.dynamic_rotate %88 by %c254_i32_26 dim 0 : vector<256x8xf32>, i32 -> vector<256x8xf32>
    %109 = arith.maximumf %107, %108 : vector<256x8xf32>
    %110 = vector.shape_cast %33 : vector<256x1xi1> to vector<256x1xi1>
    %111 = vector.broadcast %110 : vector<256x1xi1> to vector<256x8xi1>
    %112 = arith.select %111, %109, %107 : vector<256x8xi1>, vector<256x8xf32>
    %c32_i32_27 = arith.constant 32 : i32
    %113 = tpu.dynamic_rotate %112 by %c32_i32_27 dim 0 : vector<256x8xf32>, i32 -> vector<256x8xf32>
    %114 = arith.maximumf %112, %113 : vector<256x8xf32>
    %115 = vector.shape_cast %45 : vector<256x1xi1> to vector<256x1xi1>
    %116 = vector.broadcast %115 : vector<256x1xi1> to vector<256x8xi1>
    %117 = arith.select %116, %114, %112 : vector<256x8xi1>, vector<256x8xf32>
    %c16_i32_28 = arith.constant 16 : i32
    %118 = tpu.dynamic_rotate %112 by %c16_i32_28 dim 0 : vector<256x8xf32>, i32 -> vector<256x8xf32>
    %119 = arith.maximumf %117, %118 : vector<256x8xf32>
    %120 = vector.shape_cast %43 : vector<256x1xi1> to vector<256x1xi1>
    %121 = vector.broadcast %120 : vector<256x1xi1> to vector<256x8xi1>
    %122 = arith.select %121, %119, %117 : vector<256x8xi1>, vector<256x8xf32>
    %c240_i32_29 = arith.constant 240 : i32
    %123 = tpu.dynamic_rotate %112 by %c240_i32_29 dim 0 : vector<256x8xf32>, i32 -> vector<256x8xf32>
    %124 = arith.maximumf %122, %123 : vector<256x8xf32>
    %125 = vector.shape_cast %39 : vector<256x1xi1> to vector<256x1xi1>
    %126 = vector.broadcast %125 : vector<256x1xi1> to vector<256x8xi1>
    %127 = arith.select %126, %124, %122 : vector<256x8xi1>, vector<256x8xf32>
    %c224_i32_30 = arith.constant 224 : i32
    %128 = tpu.dynamic_rotate %112 by %c224_i32_30 dim 0 : vector<256x8xf32>, i32 -> vector<256x8xf32>
    %129 = arith.maximumf %127, %128 : vector<256x8xf32>
    %130 = vector.shape_cast %41 : vector<256x1xi1> to vector<256x1xi1>
    %131 = vector.broadcast %130 : vector<256x1xi1> to vector<256x8xi1>
    %132 = arith.select %131, %129, %127 : vector<256x8xi1>, vector<256x8xf32>
    %133 = arith.truncf %132 : vector<256x8xf32> to vector<256x8xbf16>
    %c16 = arith.constant 16 : index
    %c0_31 = arith.constant 0 : index
    %134 = vector.load %arg4[%c16, %c0_31] : memref<32x32xbf16, #tpu.memory_space<vmem>>, vector<8x32xbf16>
    %cst_32 = arith.constant dense<0.000000e+00> : vector<256x32xf32>
    %135 = tpu.matmul %133, %134, %cst_32 {dimension_numbers = #tpu.dot_dimension_numbers<[1], [0], [0], [1], [0, 0, 1, 1], [], []>} : vector<256x8xbf16>, vector<8x32xbf16>, vector<256x32xf32> -> vector<256x32xf32>
    %136 = arith.addf %92, %135 : vector<256x32xf32>
    %c2_i32_33 = arith.constant 2 : i32
    %137 = tpu.dynamic_rotate %132 by %c2_i32_33 dim 0 : vector<256x8xf32>, i32 -> vector<256x8xf32>
    %138 = arith.maximumf %132, %137 : vector<256x8xf32>
    %139 = vector.shape_cast %37 : vector<256x1xi1> to vector<256x1xi1>
    %140 = vector.broadcast %139 : vector<256x1xi1> to vector<256x8xi1>
    %141 = arith.select %140, %138, %132 : vector<256x8xi1>, vector<256x8xf32>
    %c1_i32_34 = arith.constant 1 : i32
    %142 = tpu.dynamic_rotate %132 by %c1_i32_34 dim 0 : vector<256x8xf32>, i32 -> vector<256x8xf32>
    %143 = arith.maximumf %141, %142 : vector<256x8xf32>
    %144 = vector.shape_cast %35 : vector<256x1xi1> to vector<256x1xi1>
    %145 = vector.broadcast %144 : vector<256x1xi1> to vector<256x8xi1>
    %146 = arith.select %145, %143, %141 : vector<256x8xi1>, vector<256x8xf32>
    %c255_i32_35 = arith.constant 255 : i32
    %147 = tpu.dynamic_rotate %132 by %c255_i32_35 dim 0 : vector<256x8xf32>, i32 -> vector<256x8xf32>
    %148 = arith.maximumf %146, %147 : vector<256x8xf32>
    %149 = vector.shape_cast %31 : vector<256x1xi1> to vector<256x1xi1>
    %150 = vector.broadcast %149 : vector<256x1xi1> to vector<256x8xi1>
    %151 = arith.select %150, %148, %146 : vector<256x8xi1>, vector<256x8xf32>
    %c254_i32_36 = arith.constant 254 : i32
    %152 = tpu.dynamic_rotate %132 by %c254_i32_36 dim 0 : vector<256x8xf32>, i32 -> vector<256x8xf32>
    %153 = arith.maximumf %151, %152 : vector<256x8xf32>
    %154 = vector.shape_cast %33 : vector<256x1xi1> to vector<256x1xi1>
    %155 = vector.broadcast %154 : vector<256x1xi1> to vector<256x8xi1>
    %156 = arith.select %155, %153, %151 : vector<256x8xi1>, vector<256x8xf32>
    %c32_i32_37 = arith.constant 32 : i32
    %157 = tpu.dynamic_rotate %156 by %c32_i32_37 dim 0 : vector<256x8xf32>, i32 -> vector<256x8xf32>
    %158 = arith.maximumf %156, %157 : vector<256x8xf32>
    %159 = vector.shape_cast %45 : vector<256x1xi1> to vector<256x1xi1>
    %160 = vector.broadcast %159 : vector<256x1xi1> to vector<256x8xi1>
    %161 = arith.select %160, %158, %156 : vector<256x8xi1>, vector<256x8xf32>
    %c16_i32_38 = arith.constant 16 : i32
    %162 = tpu.dynamic_rotate %156 by %c16_i32_38 dim 0 : vector<256x8xf32>, i32 -> vector<256x8xf32>
    %163 = arith.maximumf %161, %162 : vector<256x8xf32>
    %164 = vector.shape_cast %43 : vector<256x1xi1> to vector<256x1xi1>
    %165 = vector.broadcast %164 : vector<256x1xi1> to vector<256x8xi1>
    %166 = arith.select %165, %163, %161 : vector<256x8xi1>, vector<256x8xf32>
    %c240_i32_39 = arith.constant 240 : i32
    %167 = tpu.dynamic_rotate %156 by %c240_i32_39 dim 0 : vector<256x8xf32>, i32 -> vector<256x8xf32>
    %168 = arith.maximumf %166, %167 : vector<256x8xf32>
    %169 = vector.shape_cast %39 : vector<256x1xi1> to vector<256x1xi1>
    %170 = vector.broadcast %169 : vector<256x1xi1> to vector<256x8xi1>
    %171 = arith.select %170, %168, %166 : vector<256x8xi1>, vector<256x8xf32>
    %c224_i32_40 = arith.constant 224 : i32
    %172 = tpu.dynamic_rotate %156 by %c224_i32_40 dim 0 : vector<256x8xf32>, i32 -> vector<256x8xf32>
    %173 = arith.maximumf %171, %172 : vector<256x8xf32>
    %174 = vector.shape_cast %41 : vector<256x1xi1> to vector<256x1xi1>
    %175 = vector.broadcast %174 : vector<256x1xi1> to vector<256x8xi1>
    %176 = arith.select %175, %173, %171 : vector<256x8xi1>, vector<256x8xf32>
    %177 = arith.truncf %176 : vector<256x8xf32> to vector<256x8xbf16>
    %c24 = arith.constant 24 : index
    %c0_41 = arith.constant 0 : index
    %178 = vector.load %arg4[%c24, %c0_41] : memref<32x32xbf16, #tpu.memory_space<vmem>>, vector<8x32xbf16>
    %cst_42 = arith.constant dense<0.000000e+00> : vector<256x32xf32>
    %179 = tpu.matmul %177, %178, %cst_42 {dimension_numbers = #tpu.dot_dimension_numbers<[1], [0], [0], [1], [0, 0, 1, 1], [], []>} : vector<256x8xbf16>, vector<8x32xbf16>, vector<256x32xf32> -> vector<256x32xf32>
    %180 = arith.addf %136, %179 : vector<256x32xf32>
    %c0_43 = arith.constant 0 : index
    %c0_44 = arith.constant 0 : index
    %181 = vector.load %arg5[%c0_43, %c0_44] : memref<1x32xf32, #tpu.memory_space<vmem>>, vector<1x32xf32>
    %182 = vector.broadcast %181 : vector<1x32xf32> to vector<256x32xf32>
    %183 = arith.addf %180, %182 : vector<256x32xf32>
    %184 = arith.negf %183 : vector<256x32xf32>
    %185 = math.exp %184 : vector<256x32xf32>
    %cst_45 = arith.constant 1.000000e+00 : f32
    %186 = vector.broadcast %cst_45 : f32 to vector<256x32xf32>
    %187 = arith.addf %186, %185 : vector<256x32xf32>
    %188 = arith.divf %186, %187 : vector<256x32xf32>
    %189 = arith.mulf %183, %188 : vector<256x32xf32>
    %c0_46 = arith.constant 0 : index
    %c0_47 = arith.constant 0 : index
    %c0_48 = arith.constant 0 : index
    %190 = vector.load %arg6[%c0_46, %c0_47, %c0_48] : memref<1x256x32xf32, #tpu.memory_space<vmem>>, vector<1x256x32xf32>
    %191 = vector.shape_cast %190 : vector<1x256x32xf32> to vector<256x32xf32>
    %192 = vector.shape_cast %189 : vector<256x32xf32> to vector<1x256x32xf32>
    tpu.vector_store %arg6[%c0_46, %c0_47, %c0_48], %192 {strides = array<i32>} : memref<1x256x32xf32, #tpu.memory_space<vmem>>, vector<1x256x32xf32>,
    return
  }
  func.func @transform_0(%arg0: i32) -> (i32, i32, i32) {
    %c0_i32 = arith.constant 0 : i32
    %c0_i32_0 = arith.constant 0 : i32
    %c0_i32_1 = arith.constant 0 : i32
    return %arg0, %c0_i32, %c0_i32_0 : i32, i32, i32
  }
  func.func @transform_1(%arg0: i32) -> (i32, i32) {
    %c0_i32 = arith.constant 0 : i32
    %c0_i32_0 = arith.constant 0 : i32
    %c0_i32_1 = arith.constant 0 : i32
    return %c0_i32, %c0_i32_0 : i32, i32
  }
  func.func @transform_2(%arg0: i32) -> (i32, i32) {
    %c0_i32 = arith.constant 0 : i32
    %c0_i32_0 = arith.constant 0 : i32
    %c0_i32_1 = arith.constant 0 : i32
    return %c0_i32, %c0_i32_0 : i32, i32
  }
  func.func @transform_3(%arg0: i32) -> (i32, i32) {
    %c0_i32 = arith.constant 0 : i32
    %c0_i32_0 = arith.constant 0 : i32
    %c0_i32_1 = arith.constant 0 : i32
    return %c0_i32, %c0_i32_0 : i32, i32
  }
  func.func @transform_4(%arg0: i32) -> (i32, i32) {
    %c0_i32 = arith.constant 0 : i32
    %c0_i32_0 = arith.constant 0 : i32
    %c0_i32_1 = arith.constant 0 : i32
    return %c0_i32, %c0_i32_0 : i32, i32
  }
  func.func @transform_5(%arg0: i32) -> (i32, i32, i32) {
    %c0_i32 = arith.constant 0 : i32
    %c0_i32_0 = arith.constant 0 : i32
    %c0_i32_1 = arith.constant 0 : i32
    return %arg0, %c0_i32, %c0_i32_0 : i32, i32, i32
  }
}

</mosaic_0001>

<bundles_post_ra>
// kernel: spp_forward.1
= control target key start
LH: loop header
LB: loop body
LE: loop exit
PB: predicated region body
PF: predicated region fallthrough
CT: control target
= control target key end

     0   :  { %10 = vsyncpa [#allocation3], 0  ;;  %s11356_s0 = inlined_call_operand.vmem [shape: bf16[2,256,16], index: 0, kind: input, shape index: {}]   ;;  %s11357_s1 = inlined_call_operand.vmem [shape: bf16[16,8], index: 1, kind: input, shape index: {}]   ;;  %s11358_s2 = inlined_call_operand.vmem [shape: f32[1,8], index: 2, kind: input, shape index: {}]   ;;  %s11359_s3 = inlined_call_operand.vmem [shape: bf16[32,32], index: 3, kind: input, shape index: {}]   ;;  %s11360_s4 = inlined_call_operand.vmem [shape: f32[1,32], index: 4, kind: input, shape index: {}]   ;;  %s11361_s5 = inlined_call_operand.hbm [shape: f32[2,256,32], index: 5, kind: output, shape index: {}]  }
   0x1   :  { %12 = vsyncpa [#allocation3 + $0x1], 0  ;;  %s6479_s18 = smov 0   ;;  %s6481_s19 = smov 0  }
   0x2   :  { %s6483_s20 = smov 0   ;;  %s6485_s21 = smov 0  }
   0x3 LB: > { %s6500_s22 = sadd.s32 4294967295, %s6444_s21   ;;  %s5632_s23 = sadd.s32 4294967294, %s6444_s21   ;;  %s6444_s21 = sphi %s6485_s21, %s13167_s21   ;;  %s6440_s20 = sphi %s6483_s20, %s13166_s20   ;;  %s6436_s19 = sphi %s6481_s19, %s13165_s19   ;;  %s6432_s18 = sphi %s6479_s18, %s13164_s18  }
   0x4   : > { %s6504_s24 = sadd.s32 1, %s6444_s21   ;;  %s135_s25 = sadd.s32 1, %s6440_s20 }
   0x5   : > { %s132_s26 = ssub.s32 %s6444_s21, %s6504_s24  ;;  %p145_p0 = scmp.ne.s32.totalorder %s6440_s20, %s6436_s19 }
   0x6   : > { %p133_p1 = scmp.eq.s32.totalorder %s132_s26, 0  ;;  %p146_p2 = scmp.eq.s32.totalorder %s6500_s22, 1 }
   0x7   : > { %p151_p3 = scmp.ne.s32.totalorder %s6436_s19, %s6432_s18  ;;  %p152_p4 = scmp.eq.s32.totalorder %s5632_s23, 1 }
   0x8   : > { %s6515_s27 = scalar_select %p133_p1, %s6440_s20, %s135_s25  }
   0x9   : > { %p6517_p5 = por %p146_p2, %p145_p0  ;;  %p6521_p6 = por %p152_p4, %p151_p3 }
   0xa   : > { %p5635_p7 = scmp.ge.s32.totalorder %s6444_s21, 1  ;;  %p190_p8 = scmp.lt.s32.totalorder %s6444_s21, 3 }
   0xc   : > { %p191_p9 = pnand %p5635_p7, %p190_p8 }
   0xe   : > { %194 = sbr.rel (%p191_p9) target bundleno = 1162 (0x48a), region = 40 }
  0x13   : > { %v6111_v0 = vld [vmem:[%s11357_s1] sm:$0xff]   ;;  %p218_p10 = scmp.lt.s32.totalorder %s6500_s22, 1  ;;  %vm351_vm0 = vcmask 130048   ;;  %v785_v18 = vlaneseq  ;;  %s6446_s17 = smov [#allocation2]  }
  0x14   : > { %5894 = vmatprep.subr.bf16.mxu0 %v6111_v0  ;;  %6064 = vmatprep.subr.bf16.mxu1 %v6111_v0  ;;  %v6572_v17 = vld [vmem:[%s11358_s2] ss:$0 sm:$0xff]  ;;  %s6388_s23 = sshll.u32 %s6446_s17, 4  ;;  %s6389_s23 = int_to_ptr.vmem [resolvable:$false] %s6388_s23 }
  0x15   : > { %s219_s7 = scalar_select %p218_p10, %s6500_s22, 1  ;;  %5895 = vmatpush3.bf16.msra.mxu0 %v6111_v0  ;;  %6065 = vmatpush3.bf16.msra.mxu1 %v6111_v0  ;;  %11794 = vst [vmem:[#allocation5_spill] sm:$0xff] %v6572_v17  ;;  %v6580_v24 = vshrl.u32 %v785_v18, 7 }
  0x16   : > { %s6390_s25 = scalar_lea.vmem %s6389_s23, 8192 }
  0x17   : > { %s5807_s8 = sshll.u32 %s219_s7, 7  ;;  %v6599_v37 = vadd.s32 16, %v6580_v24  ;;  %v6607_v42 = vadd.s32 8, %v6580_v24  ;;  %v6622_v52 = vadd.s32 144, %v6580_v24  ;;  %v6630_v57 = vadd.s32 136, %v6580_v24 }
  0x18   : > { %s6535_s11 = scalar_lea.vmem %s11356_s0, %s5807_s8  ;;  %v6638_v62 = vadd.s32 24, %v6580_v24  ;;  %vm11422_vm1 = vcmp.lt.s32.totalorder %v6580_v24, 2  ;;  %vm11419_vm3 = vcmp.lt.s32.totalorder %v6580_v24, 1  ;;  %vm11421_vm4 = vcmp.lt.s32.totalorder %v6580_v24, 7  ;;  %s215_s8 = sand.u32 1, %s6436_s19  }
  0x19   : > { %v6112_v1 = vld [vmem:[%s6535_s11] sm:$0xff]   ;;  %v6114_v3 = vld [vmem:[%s6535_s11 + $0x8] sm:$0xff]   ;;  %v6116_v5 = vld [vmem:[%s6535_s11 + $0x10] sm:$0xff]   ;;  %vm11416_vm5 = vcmp.lt.s32.totalorder %v6580_v24, 6  ;;  %s5636_s9 = sshll.u32 %s215_s8, 8 }
  0x1a   : > { %v6113_v2 = vld [vmem:[%s6535_s11 + $0x40] sm:$0xff]   ;;  %5896 = vmatprep.mubr.msk.bf16.mxu0 %vm351_vm0, %v6112_v1  ;;  %v6115_v4 = vld [vmem:[%s6535_s11 + $0x48] sm:$0xff]   ;;  %v6117_v6 = vld [vmem:[%s6535_s11 + $0x50] sm:$0xff]   ;;  %s11026_s10 = scalar_lea.vmem [#allocation2], %s5636_s9 }
  0x1b   : > { %5912 = vmatprep.mubr.msk.bf16.mxu1 %vm351_vm0, %v6113_v2  ;;  %5897 = vmatmul.mubr.msk.bf16.vlgmr.msra.gmra.mxu0 %vm351_vm0, %v6114_v3  ;;  %v6118_v7 = vld [vmem:[%s6535_s11 + $0x18] sm:$0xff]   ;;  %v6120_v9 = vld [vmem:[%s6535_s11 + $0x20] sm:$0xff]   ;;  %v6122_v11 = vld [vmem:[%s6535_s11 + $0x28] sm:$0xff]   ;;  %v6645_v2 = vadd.s32 152, %v6580_v24  ;;  %s5570_s12 = sshll.u32 %s11026_s10, 4  ;;  %s11307_s12 = int_to_ptr.vmem [resolvable:$true] %s5570_s12 }
  0x1c   : > { %5913 = vmatmul.mubr.msk.bf16.vlgmr.msra.gmra.mxu1 %vm351_vm0, %v6115_v4  ;;  %5900 = vmatprep.mubr.msk.bf16.mxu0 %vm351_vm0, %v6116_v5  ;;  %v6119_v8 = vld [vmem:[%s6535_s11 + $0x58] sm:$0xff]   ;;  %v6121_v10 = vld [vmem:[%s6535_s11 + $0x60] sm:$0xff]   ;;  %v6123_v12 = vld [vmem:[%s6535_s11 + $0x68] sm:$0xff]   ;;  %s6384_s16 = scalar_lea.vmem %s11307_s12, 4096  ;;  %p6391_p0 = scmp.lt.s32.totalorder %s11307_s12, %s6389_s23 }
  0x1d   : > { %5916 = vmatprep.mubr.msk.bf16.mxu1 %vm351_vm0, %v6117_v6  ;;  %v6124_v13 = vld [vmem:[%s6535_s11 + $0x30] sm:$0xff]   ;;  %v6126_v15 = vld [vmem:[%s6535_s11 + $0x38] sm:$0xff]   ;;  %11795 = vst [vmem:[#allocation6_spill] sm:$0xff] %v6645_v2  ;;  %p6385_p11 = scmp.ne.s32.totalorder %s11307_s12, %s6384_s16  ;;  %p6392_p1 = scmp.lt.s32.totalorder %s6390_s25, %s6384_s16 }
  0x1e   : > { %v6125_v14 = vld [vmem:[%s6535_s11 + $0x70] sm:$0xff]   ;;  %v6127_v16 = vld [vmem:[%s6535_s11 + $0x78] sm:$0xff]   ;;  %s5808_s11 = sshll.u32 %s6500_s22, 12  ;;  %s11316_s22 = scalar_lea.sflag [#allocation3], %s215_s8 }
  0x1f   : > { %s11305_s15 = scalar_lea.hbm %s11361_s5, %s5808_s11  ;;  %p6386_p12 = pnand %p6385_p11, %p6517_p5 }
  0x20   : > { %p6393_p2 = por %p6392_p1, %p6391_p0 }
  0x21   : > { %p6387_p13 = pneg %p6386_p12 }
  0x23   : > { %5901 = vmatmul.mubr.msk.bf16.gmra.mxu0 %vm351_vm0, %v6118_v7  ;;  %p6394_p3 = pnand %p6393_p2, %p6387_p13 }
  0x24   : > { %5917 = vmatmul.mubr.msk.bf16.gmra.mxu1 %vm351_vm0, %v6119_v8  ;;  %5904 = vmatprep.mubr.msk.bf16.mxu0 %vm351_vm0, %v6120_v9 }
  0x25   : > { %5920 = vmatprep.mubr.msk.bf16.mxu1 %vm351_vm0, %v6121_v10 }
  0x2b   : > { %5905 = vmatmul.mubr.msk.bf16.gmra.mxu0 %vm351_vm0, %v6122_v11 }
  0x2c   : > { %5921 = vmatmul.mubr.msk.bf16.gmra.mxu1 %vm351_vm0, %v6123_v12  ;;  %5908 = vmatprep.mubr.msk.bf16.mxu0 %vm351_vm0, %v6124_v13 }
  0x2d   : > { %5924 = vmatprep.mubr.msk.bf16.mxu1 %vm351_vm0, %v6125_v14  ;;  %v6662_v14 = vadd.s32 32, %v6580_v24 }
  0x33   : > { %5909 = vmatmul.mubr.msk.bf16.gmra.mxu0 %vm351_vm0, %v6126_v15  ;;  %v6665_v15 = vadd.s32 160, %v6580_v24 }
  0x34   : > { %5925 = vmatmul.mubr.msk.bf16.gmra.mxu1 %vm351_vm0, %v6127_v16 }
  0xdb   : > { %v5898_v19 = vpop.f32.mrf.mxu0 }
  0xdc   : > { %v6575_v20 = vadd.f32 %v5898_v19, %v6572_v17  ;;  %v5914_v21 = vpop.f32.mrf.mxu1 }
  0xdd   : > { %v6578_v22 = vadd.f32 %v5914_v21, %v6572_v17  ;;  %v434_v23 = vpop.f32.mrf.mxu0 }
  0xde   : > { %v5675_v25 = vmul.f32 -1.442695, %v6575_v20  ;;  %v6584_v26 = vadd.f32 %v6572_v17, %v434_v23  ;;  %v498_v27 = vpop.f32.mrf.mxu1 }
  0xdf   : > { %v5691_v28 = vmul.f32 -1.442695, %v6578_v22  ;;  %v6588_v29 = vadd.f32 %v6572_v17, %v498_v27  ;;  %v5899_v30 = vpop.f32.mrf.mxu0 }
  0xe0   : > { %6128 = vpow2.f32 %v5675_v25  ;;  %v5673_v31 = vmul.f32 -1.442695, %v6584_v26  ;;  %v6592_v32 = vadd.f32 %v5899_v30, %v6572_v17  ;;  %v5915_v33 = vpop.f32.mrf.mxu1  ;;  %v6671_v30 = vadd.s32 40, %v6580_v24 }
  0xe1   : > { %6130 = vpow2.f32 %v5691_v28  ;;  %v5689_v34 = vmul.f32 -1.442695, %v6588_v29  ;;  %v6596_v35 = vadd.f32 %v5915_v33, %v6572_v17  ;;  %v437_v36 = vpop.f32.mrf.mxu0 }
  0xe2   : > { %6132 = vpow2.f32 %v5673_v31  ;;  %v5676_v38 = vmul.f32 -1.442695, %v6592_v32  ;;  %v6603_v39 = vadd.f32 %v6572_v17, %v437_v36  ;;  %v501_v40 = vpop.f32.mrf.mxu1  ;;  %v6674_v31 = vadd.s32 48, %v6580_v24 }
  0xe3   : > { %6134 = vpow2.f32 %v5689_v34  ;;  %v5692_v41 = vmul.f32 -1.442695, %v6596_v35  ;;  %v6610_v43 = vadd.f32 %v6572_v17, %v501_v40  ;;  %v5902_v44 = vpop.f32.mrf.mxu0  ;;  %v6680_v40 = vadd.s32 176, %v6580_v24 }
  0xe4   : > { %6136 = vpow2.f32 %v5676_v38  ;;  %v5674_v45 = vmul.f32 -1.442695, %v6603_v39  ;;  %v6614_v46 = vadd.f32 %v5902_v44, %v6572_v17  ;;  %v5918_v47 = vpop.f32.mrf.mxu1  ;;  %v6677_v38 = vadd.s32 168, %v6580_v24 }
  0xe5   : > { %6138 = vpow2.f32 %v5692_v41  ;;  %v5690_v49 = vmul.f32 -1.442695, %v6610_v43  ;;  %v6619_v50 = vadd.f32 %v5918_v47, %v6572_v17  ;;  %v450_v51 = vpop.f32.mrf.mxu0 }
  0xe6   : > { %6140 = vpow2.f32 %v5674_v45  ;;  %v5679_v53 = vmul.f32 -1.442695, %v6614_v46  ;;  %v6626_v54 = vadd.f32 %v6572_v17, %v450_v51  ;;  %v514_v55 = vpop.f32.mrf.mxu1 }
  0xe7   : > { %v5695_v58 = vmul.f32 -1.442695, %v6619_v50  ;;  %v6634_v59 = vadd.f32 %v6572_v17, %v514_v55  ;;  %v5903_v60 = vpop.f32.mrf.mxu0  ;;  %6142 = vpow2.f32 %v5690_v49  ;;  %v6685_v55 = vadd.s32 56, %v6580_v24 }
  0xe8   : > { %v5677_v61 = vmul.f32 -1.442695, %v6626_v54  ;;  %v6641_v63 = vadd.f32 %v5903_v60, %v6572_v17  ;;  %v5919_v0 = vpop.f32.mrf.mxu1  ;;  %6144 = vpow2.f32 %v5679_v53 }
  0xe9   : > { %v5693_v1 = vmul.f32 -1.442695, %v6634_v59  ;;  %v6648_v3 = vadd.f32 %v5919_v0, %v6572_v17  ;;  %v453_v4 = vpop.f32.mrf.mxu0  ;;  %6146 = vpow2.f32 %v5695_v58  ;;  %11796 = vst [vmem:[#allocation7_spill] sm:$0xff] %v6685_v55  ;;  %v6688_v58 = vadd.s32 184, %v6580_v24 }
  0xea   : > { %v5680_v6 = vmul.f32 -1.442695, %v6641_v63  ;;  %v6653_v7 = vadd.f32 %v6572_v17, %v453_v4  ;;  %v517_v8 = vpop.f32.mrf.mxu1  ;;  %6148 = vpow2.f32 %v5677_v61 }
  0xeb   : > { %v5696_v10 = vmul.f32 -1.442695, %v6648_v3  ;;  %v6658_v11 = vadd.f32 %v6572_v17, %v517_v8  ;;  %v5906_v12 = vpop.f32.mrf.mxu0  ;;  %6150 = vpow2.f32 %v5693_v1  ;;  %11797 = vst [vmem:[#allocation8_spill] sm:$0xff] %v6688_v58 }
  0xec   : > { %v5678_v13 = vmul.f32 -1.442695, %v6653_v7  ;;  %v5922_v16 = vpop.f32.mrf.mxu1  ;;  %6152 = vpow2.f32 %v5680_v6  ;;  %v6706_v21 = vadd.f32 %v5906_v12, %v6572_v17 }
  0xed   : > { %v6129_v18 = vpop.eup %6128  ;;  %v5694_v23 = vmul.f32 -1.442695, %v6658_v11  ;;  %v466_v25 = vpop.f32.mrf.mxu0  ;;  %6154 = vpow2.f32 %v5696_v10 }
  0xee   : > { %v6131_v27 = vpop.eup %6130  ;;  %v659_v28 = vadd.f32 1.0, %v6129_v18  ;;  %v530_v33 = vpop.f32.mrf.mxu1  ;;  %6156 = vpow2.f32 %v5678_v13  ;;  %v6695_v18 = vadd.s32 64, %v6580_v24  ;;  %11801 = vst [vmem:[#allocation12_spill] sm:$0xff] %v6706_v21  ;;  %v6739_v56 = vmul.f32 -1.442695, %v6706_v21 }
  0xef   : > { %v6133_v34 = vpop.eup %6132  ;;  %v675_v36 = vadd.f32 1.0, %v6131_v27  ;;  %v5907_v41 = vpop.f32.mrf.mxu0  ;;  %6158 = vpow2.f32 %v5694_v23  ;;  %v6698_v27 = vadd.s32 72, %v6580_v24 }
  0xf0   : > { %v6135_v44 = vpop.eup %6134  ;;  %v657_v45 = vadd.f32 1.0, %v6133_v34  ;;  %6160 = vrcp.f32 %v659_v28  ;;  %v5923_v60 = vpop.f32.mrf.mxu1  ;;  %11798 = vst [vmem:[#allocation9_spill] sm:$0xff] %v6695_v18  ;;  %v6701_v28 = vadd.s32 80, %v6580_v24  ;;  %v6728_v49 = vadd.f32 %v5907_v41, %v6572_v17 }
  0xf1   : > { %v6137_v51 = vpop.eup %6136  ;;  %v673_v53 = vadd.f32 1.0, %v6135_v44  ;;  %6162 = vrcp.f32 %v675_v36  ;;  %v469_v6 = vpop.f32.mrf.mxu0  ;;  %11799 = vst [vmem:[#allocation10_spill] sm:$0xff] %v6698_v27  ;;  %v6725_v44 = vadd.f32 %v6572_v17, %v530_v33  ;;  %v6733_v47 = vadd.f32 %v5923_v60, %v6572_v17 }
  0xf2   : > { %v6139_v61 = vpop.eup %6138  ;;  %v660_v0 = vadd.f32 1.0, %v6137_v51  ;;  %6164 = vrcp.f32 %v657_v45  ;;  %11800 = vst [vmem:[#allocation11_spill] sm:$0xff] %v6701_v28  ;;  %v533_v51 = vpop.f32.mrf.mxu1  ;;  %11808 = vst [vmem:[#allocation19_spill] sm:$0xff] %v6728_v49  ;;  %v6736_v45 = vadd.f32 %v6572_v17, %v469_v6  ;;  %v6754_v41 = vmul.f32 -1.442695, %v6728_v49 }
  0xf3   : > { %v6141_v8 = vpop.eup %6140  ;;  %v676_v36 = vadd.f32 1.0, %v6139_v61  ;;  %v5910_v19 = vpop.f32.mrf.mxu0  ;;  %v6718_v61 = vadd.f32 %v6572_v17, %v466_v25  ;;  %11807 = vst [vmem:[#allocation18_spill] sm:$0xff] %v6725_v44  ;;  %11809 = vst [vmem:[#allocation20_spill] sm:$0xff] %v6733_v47  ;;  %v6751_v28 = vmul.f32 -1.442695, %v6725_v44  ;;  %v6757_v1 = vadd.f32 %v6572_v17, %v533_v51 }
  0xf4   : > { %6166 = vrcp.f32 %v660_v0  ;;  %v658_v23 = vadd.f32 1.0, %v6141_v8  ;;  %v6143_v34 = vpop.eup %6142  ;;  %v6709_v0 = vadd.s32 192, %v6580_v24  ;;  %v6712_v8 = vadd.s32 200, %v6580_v24  ;;  %11810 = vst [vmem:[#allocation21_spill] sm:$0xff] %v6736_v45  ;;  %v5926_v9 = vpop.f32.mrf.mxu1  ;;  %11813 = vst [vmem:[#allocation24_spill] sm:$0xff] %v6754_v41 }
  0xf5   : > { %6168 = vrcp.f32 %v673_v53  ;;  %v6145_v10 = vpop.eup %6144  ;;  %v6715_v53 = vadd.f32 %v5922_v16, %v6572_v17  ;;  %11805 = vst [vmem:[#allocation16_spill] sm:$0xff] %v6718_v61  ;;  %v674_v25 = vadd.f32 1.0, %v6143_v34  ;;  %v482_v16 = vpop.f32.mrf.mxu0  ;;  %v6747_v60 = vmul.f32 -1.442695, %v6718_v61  ;;  %11812 = vst [vmem:[#allocation23_spill] sm:$0xff] %v6751_v28 }
  0xf6   : > { %6170 = vrcp.f32 %v658_v23  ;;  %11802 = vst [vmem:[#allocation13_spill] sm:$0xff] %v6709_v0  ;;  %11803 = vst [vmem:[#allocation14_spill] sm:$0xff] %v6712_v8  ;;  %v6147_v13 = vpop.eup %6146  ;;  %v6722_v23 = vadd.s32 208, %v6580_v24  ;;  %v663_v33 = vadd.f32 1.0, %v6145_v10  ;;  %v6760_v0 = vmul.f32 -1.442695, %v6733_v47  ;;  %v546_v6 = vpop.f32.mrf.mxu1 }
  0xf7   : > { %11804 = vst [vmem:[#allocation15_spill] sm:$0xff] %v6715_v53  ;;  %v6149_v12 = vpop.eup %6148  ;;  %6172 = vrcp.f32 %v676_v36  ;;  %v679_v36 = vadd.f32 1.0, %v6147_v13  ;;  %v6744_v34 = vmul.f32 -1.442695, %v6715_v53  ;;  %11811 = vst [vmem:[#allocation22_spill] sm:$0xff] %v6747_v60  ;;  %v6766_v44 = vadd.f32 %v5910_v19, %v6572_v17  ;;  %v5911_v51 = vpop.f32.mrf.mxu0 }
  0xf8   : > { %11806 = vst [vmem:[#allocation17_spill] sm:$0xff] %v6722_v23  ;;  %v6151_v4 = vpop.eup %6150  ;;  %v661_v10 = vadd.f32 1.0, %v6149_v12  ;;  %11814 = vst [vmem:[#allocation25_spill] sm:$0xff] %v6757_v1  ;;  %6174 = vrcp.f32 %v674_v25  ;;  %v6763_v18 = vmul.f32 -1.442695, %v6736_v45  ;;  %v6769_v49 = vadd.f32 %v5926_v9, %v6572_v17 }
  0xf9   : > { %v6153_v5 = vpop.eup %6152  ;;  %v677_v8 = vadd.f32 1.0, %v6151_v4  ;;  %11815 = vst [vmem:[#allocation26_spill] sm:$0xff] %v6760_v0  ;;  %6176 = vrcp.f32 %v663_v33  ;;  %11817 = vst [vmem:[#allocation28_spill] sm:$0xff] %v6766_v44  ;;  %v6772_v25 = vadd.f32 %v6572_v17, %v482_v16  ;;  %v6775_v45 = vadd.s32 88, %v6580_v24 }
  0xfa   : > { %v6155_v48 = vpop.eup %6154  ;;  %11816 = vst [vmem:[#allocation27_spill] sm:$0xff] %v6763_v18  ;;  %v664_v23 = vadd.f32 1.0, %v6153_v5  ;;  %11818 = vst [vmem:[#allocation29_spill] sm:$0xff] %v6769_v49  ;;  %6178 = vrcp.f32 %v679_v36  ;;  %v6778_v5 = vmul.f32 -1.442695, %v6757_v1  ;;  %v6781_v19 = vadd.f32 %v6572_v17, %v546_v6 }
  0xfb   : > { %v6157_v27 = vpop.eup %6156  ;;  %v680_v4 = vadd.f32 1.0, %v6155_v48  ;;  %11819 = vst [vmem:[#allocation30_spill] sm:$0xff] %v6772_v25  ;;  %11820 = vst [vmem:[#allocation31_spill] sm:$0xff] %v6775_v45  ;;  %6180 = vrcp.f32 %v661_v10  ;;  %v6785_v16 = vadd.s32 216, %v6580_v24  ;;  %v6788_v36 = vadd.f32 %v5911_v51, %v6572_v17 }
  0xfc   : > { %v6159_v13 = vpop.eup %6158  ;;  %v662_v33 = vadd.f32 1.0, %v6157_v27  ;;  %11821 = vst [vmem:[#allocation32_spill] sm:$0xff] %v6778_v5  ;;  %11822 = vst [vmem:[#allocation33_spill] sm:$0xff] %v6781_v19  ;;  %6182 = vrcp.f32 %v677_v8  ;;  %v11825_v10 = vand.u32 15, %v6599_v37  ;;  %v11826_v6 = vmov 0 }
  0xfd   : > { %v6161_v12 = vpop.eup %6160  ;;  %v678_v48 = vadd.f32 1.0, %v6159_v13  ;;  %11823 = vst [vmem:[#allocation34_spill] sm:$0xff] %v6785_v16  ;;  %11824 = vst [vmem:[#allocation35_spill] sm:$0xff] %v6788_v36  ;;  %6184 = vrcp.f32 %v664_v23  ;;  %v6800_v8 = vmul.f32 -1.442695, %v6766_v44  ;;  %v11865_v18 = vmov 0 }
  0xfe   : > { %v6163_v61 = vpop.eup %6162  ;;  %v6791_v27 = vmul.f32 %v6161_v12, %v6575_v20  ;;  %vm6795_vm2 = vcmp.ge.s32.totalorder %v11825_v10, 2  ;;  %v6803_v13 = vmul.f32 -1.442695, %v6769_v49  ;;  %6186 = vrcp.f32 %v680_v4 }
  0xff   : > { %v6165_v47 = vpop.eup %6164  ;;  %v11827_v6 = vsel %vm6795_vm2, 4294967295, %v11826_v6  ;;  %11829 = vst [vmem:[#allocation37_spill] sm:$0xff] %v6800_v8  ;;  %v6806_v51 = vmul.f32 %v6163_v61, %v6578_v22  ;;  %v6810_v20 = vmul.f32 -1.442695, %v6772_v25  ;;  %6188 = vrcp.f32 %v662_v33 }
 0x100   : > { %11828 = vst [vmem:[#allocation36_spill] sm:$0xff] %v11827_v6  ;;  %11830 = vst [vmem:[#allocation38_spill] sm:$0xff] %v6803_v13  ;;  %v6814_v23 = vmul.f32 %v6165_v47, %v6584_v26  ;;  %v6820_v49 = vmul.f32 -1.442695, %v6781_v19  ;;  %6190 = vrcp.f32 %v678_v48  ;;  %v6827_v4 = vmul.f32 -1.442695, %v6788_v36 }
 0x101   : > { %v6167_v9 = vpop.eup %6166  ;;  %11831 = vst [vmem:[#allocation39_spill] sm:$0xff] %v6806_v51  ;;  %11832 = vst [vmem:[#allocation40_spill] sm:$0xff] %v6810_v20  ;;  %v6836_v33 = vadd.s32 120, %v6580_v24  ;;  %v1477_v48 = vrot.slane %v6791_v27, 6  ;;  %v11847_v19 = vand.u32 15, %v6622_v52  ;;  %v11848_v25 = vmov 0 }
 0x102   : > { %v6169_v53 = vpop.eup %6168  ;;  %v6817_v10 = vmul.f32 %v6167_v9, %v6592_v32  ;;  %11833 = vst [vmem:[#allocation41_spill] sm:$0xff] %v6820_v49  ;;  %11835 = vst [vmem:[#allocation43_spill] sm:$0xff] %v6827_v4  ;;  %v11846_v26 = vrot.slane %v6814_v23, 6  ;;  %v11863_v8 = vrot.slane %v6791_v27, 7  ;;  %v11869_v0 = vrot.slane %v6791_v27, 1 }
 0x103   : > { %v6171_v1 = vpop.eup %6170  ;;  %v6832_v32 = vmul.f32 %v6169_v53, %v6588_v29  ;;  %11836 = vst [vmem:[#allocation44_spill] sm:$0xff] %v6836_v33  ;;  %v11837_v29 = vand.u32 15, %v6599_v37  ;;  %v11838_v53 = vmov 0  ;;  %v11842_v37 = vand.u32 15, %v6607_v42 }
 0x104   : > { %v6823_v22 = vmul.f32 %v6171_v1, %v6603_v39  ;;  %v6173_v12 = vpop.eup %6172  ;;  %vm6879_vm8 = vcmp.ge.s32.totalorder %v11847_v19, 2  ;;  %v11868_v17 = vrot.slane %v6817_v10, 1  ;;  %v11877_v60 = vrot.slane %v6806_v51, 7 }
 0x105   : > { %vm6846_vm6 = vcmp.ge.s32.totalorder %v11837_v29, 1  ;;  %v6857_v36 = vmul.f32 %v6173_v12, %v6596_v35  ;;  %vm6861_vm7 = vcmp.lt.s32.totalorder %v11842_v37, 15  ;;  %v11843_v29 = vmov 0  ;;  %v6175_v47 = vpop.eup %6174 }
 0x106   : > { %11834 = vst [vmem:[#allocation42_spill] sm:$0xff] %v6823_v22  ;;  %v11839_v53 = vsel %vm6846_vm6, 4294967295, %v11838_v53  ;;  %v1476_v39 = vrot.slane %v6823_v22, 6  ;;  %v1669_v1 = vrot.slane %v6823_v22, 7  ;;  %v11844_v29 = vsel %vm6861_vm7, 4294967295, %v11843_v29  ;;  %v6177_v12 = vpop.eup %6176 }
 0x107   : > { %11840 = vst [vmem:[#allocation45_spill] sm:$0xff] %v11839_v53  ;;  %11841 = vst [vmem:[#allocation46_spill] sm:$0xff] %v6857_v36  ;;  %v1862_v45 = vrot.slane %v6823_v22, 1  ;;  %v11849_v25 = vsel %vm6879_vm8, 4294967295, %v11848_v25  ;;  %v6883_v44 = vpop.eup %6178  ;;  %v6900_v4 = vmul.f32 %v6175_v47, %v6610_v43  ;;  %v1922_v41 = vsel %vm11421_vm4, %v11869_v0, %v11868_v17 }
 0x108   : > { %11845 = vst [vmem:[#allocation47_spill] sm:$0xff] %v11844_v29  ;;  %v1537_v9 = vsel %vm11422_vm1, %v1476_v39, %v1477_v48  ;;  %v1538_v35 = vsel %vm11422_vm1, %v11846_v26, %v1476_v39  ;;  %11850 = vst [vmem:[#allocation48_spill] sm:$0xff] %v11849_v25  ;;  %v11851_v26 = vrot.slane %v6817_v10, 6  ;;  %v6181_v19 = vpop.eup %6180  ;;  %v11876_v0 = vrot.slane %v6857_v36, 7 }
 0x109   : > { %v1541_v37 = vmax.f32 %v6823_v22, %v1538_v35  ;;  %v1542_v16 = vmax.f32 %v6791_v27, %v1537_v9  ;;  %v11852_v9 = vrot.slane %v6814_v23, 7  ;;  %11853 = vst [vmem:[#allocation49_spill] sm:$0xff] %v6900_v4  ;;  %v6183_v33 = vpop.eup %6182  ;;  %v1493_v35 = vrot.slane %v6806_v51, 6 }
 0x10a   : > { %v1536_v39 = vsel %vm11422_vm1, %v1477_v48, %v11851_v26  ;;  %v6185_v49 = vpop.eup %6184  ;;  %v1492_v47 = vrot.slane %v6900_v4, 6  ;;  %v11861_v48 = vrot.slane %v6832_v32, 6  ;;  %v11929_v53 = vand.u32 15, %v6671_v30 }
 0x10b   : > { %v1731_v61 = vsel %vm11419_vm3, %v11852_v9, %v1669_v1  ;;  %v1638_v55 = vsel %vm6795_vm2, %v1542_v16, %v6791_v27  ;;  %v11854_v9 = vrot.slane %v6791_v27, 7  ;;  %v11855_v16 = vrot.slane %v6791_v27, 1 }
 0x10c   : > { %v1734_v58 = vmax.f32 %v1541_v37, %v1731_v61  ;;  %v6915_v37 = vpop.eup %6186  ;;  %v1543_v26 = vmax.f32 %v6817_v10, %v1536_v39  ;;  %v11860_v61 = vrot.slane %v6857_v36, 6  ;;  %v1521_v39 = vsel %vm11422_vm1, %v1492_v47, %v1493_v35 }
 0x10d   : > { %v1730_v21 = vsel %vm11419_vm3, %v1669_v1, %v11854_v9  ;;  %v1923_v43 = vsel %vm11421_vm4, %v1862_v45, %v11855_v16  ;;  %v11856_v1 = vand.u32 15, %v6607_v42  ;;  %v6926_v16 = vpop.eup %6188  ;;  %v1522_v42 = vsel %vm11422_vm1, %v11861_v48, %v1492_v47 }
 0x10e   : > { %v1735_v20 = vmax.f32 %v1638_v55, %v1730_v21  ;;  %v11857_v21 = vmov 0  ;;  %v1927_v9 = vmax.f32 %v1734_v58, %v1923_v43  ;;  %v1520_v13 = vsel %vm11422_vm1, %v1493_v35, %v11860_v61  ;;  %v6939_v6 = vpop.eup %6190 }
 0x10f   : > { %vm6922_vm9 = vcmp.lt.s32.totalorder %v11856_v1, 14  ;;  %v1685_v1 = vrot.slane %v6900_v4, 7  ;;  %v11862_v43 = vrot.slane %v6817_v10, 7  ;;  %v2055_v61 = vrot.slane %v6823_v22, 2 }
 0x110   : > { %v11858_v21 = vsel %vm6922_vm9, 4294967295, %v11857_v21  ;;  %v11864_v35 = vand.u32 15, %v6622_v52  ;;  %v1557_v48 = vmax.f32 %v6900_v4, %v1522_v42  ;;  %v1558_v47 = vmax.f32 %v6806_v51, %v1521_v39 }
 0x111   : > { %11859 = vst [vmem:[#allocation50_spill] sm:$0xff] %v11858_v21  ;;  %v1729_v5 = vsel %vm11419_vm3, %v11863_v8, %v11862_v43  ;;  %v11870_v8 = vrot.slane %v6817_v10, 2  ;;  %v11871_v43 = vrot.slane %v6791_v27, 2  ;;  %v1831_v42 = vsel %vm6846_vm6, %v1735_v20, %v1638_v55 }
 0x112   : > { %vm6950_vm10 = vcmp.ge.s32.totalorder %v11864_v35, 1  ;;  %v11403_v35 = vrot.slane %v6857_v36, 2  ;;  %v11872_v39 = vand.u32 15, %v6630_v57  ;;  %v11873_v22 = vmov 0 }
 0x113   : > { %v11866_v18 = vsel %vm6950_vm10, 4294967295, %v11865_v18  ;;  %v2115_v52 = vsel %vm11416_vm5, %v11871_v43, %v11870_v8  ;;  %v6977_v28 = vmax.f32 %v1543_v26, %v1729_v5  ;;  %v1559_v17 = vmax.f32 %v6857_v36, %v1520_v13 }
 0x114   : > { %11867 = vst [vmem:[#allocation51_spill] sm:$0xff] %v11866_v18  ;;  %vm6973_vm11 = vcmp.lt.s32.totalorder %v11872_v39, 15  ;;  %v1713_v8 = vsel %vm11419_vm3, %v11877_v60, %v11876_v0  ;;  %v2023_v55 = vsel %vm6861_vm7, %v1927_v9, %v1734_v58  ;;  %v11878_v20 = vrot.slane %v6857_v36, 1 }
 0x115   : > { %v11874_v22 = vsel %vm6973_vm11, 4294967295, %v11873_v22  ;;  %v11879_v43 = vrot.slane %v6806_v51, 1  ;;  %v11880_v13 = vrot.slane %v6832_v32, 7  ;;  %v1878_v39 = vrot.slane %v6900_v4, 1 }
 0x116   : > { %11875 = vst [vmem:[#allocation52_spill] sm:$0xff] %v11874_v22  ;;  %v7002_v60 = vmul.f32 %v6177_v12, %v6614_v46  ;;  %v1928_v0 = vmax.f32 %v1831_v42, %v1922_v41  ;;  %v11881_v58 = vrot.slane %v6791_v27, 2  ;;  %v2071_v41 = vrot.slane %v6900_v4, 2 }
 0x117   : > { %v6994_v5 = vsel %vm11421_vm4, %v11879_v43, %v11878_v20  ;;  %v1715_v26 = vsel %vm11419_vm3, %v11880_v13, %v1685_v1  ;;  %v1654_v20 = vsel %vm6879_vm8, %v1558_v47, %v6806_v51  ;;  %v11882_v13 = vrot.slane %v6806_v51, 2 }
 0x118   : > { %v2116_v9 = vsel %vm11416_vm5, %v2055_v61, %v11881_v58  ;;  %v1750_v43 = vmax.f32 %v1557_v48, %v1715_v26  ;;  %v7021_v12 = vmul.f32 %v6181_v19, %v6626_v54  ;;  %v7023_v42 = vmax.f32 %v1559_v17, %v1713_v8 }
 0x119   : > { %v7017_v29 = vsel %vm11416_vm5, %v11882_v13, %v11403_v35  ;;  %v2120_v46 = vmax.f32 %v2023_v55, %v2116_v9  ;;  %v11883_v58 = vrot.slane %v6814_v23, 1  ;;  %v11885_v47 = vrot.slane %v6806_v51, 7 }
 0x11a   : > { %v7036_v9 = vmul.f32 %v6185_v49, %v6641_v63  ;;  %v11886_v13 = vrot.slane %v6814_v23, 2  ;;  %v11888_v17 = vrot.slane %v6806_v51, 1  ;;  %v11406_v8 = vrot.slane %v7002_v60, 7 }
 0x11b   : > { %v7029_v48 = vsel %vm11421_vm4, %v11883_v58, %v1862_v45  ;;  %v1714_v26 = vsel %vm11419_vm3, %v1685_v1, %v11885_v47  ;;  %v7049_v58 = vmax.f32 %v1928_v0, %v2115_v52  ;;  %v7053_v49 = vmul.f32 %v6183_v33, %v6634_v59 }
 0x11c   : > { %11884 = vst [vmem:[#allocation53_spill] sm:$0xff] %v7029_v48  ;;  %v7042_v54 = vsel %vm11416_vm5, %v11886_v13, %v2055_v61  ;;  %v1751_v19 = vmax.f32 %v1654_v20, %v1714_v26  ;;  %v1907_v45 = vsel %vm11421_vm4, %v1878_v39, %v11888_v17  ;;  %v7057_v61 = vsel %vm6922_vm9, %v2120_v46, %v2023_v55 }
 0x11d   : > { %11887 = vst [vmem:[#allocation54_spill] sm:$0xff] %v7042_v54  ;;  %11889 = vst [vmem:[#allocation55_spill] sm:$0xff] %v7049_v58  ;;  %v1943_v1 = vmax.f32 %v1750_v43, %v1907_v45  ;;  %v11892_v47 = vrot.slane %v6832_v32, 1  ;;  %v11894_v13 = vrot.slane %v6806_v51, 2  ;;  %v1865_v0 = vrot.slane %v7021_v12, 1 }
 0x11e   : > { %11890 = vst [vmem:[#allocation56_spill] sm:$0xff] %v7053_v49  ;;  %11891 = vst [vmem:[#allocation57_spill] sm:$0xff] %v7057_v61  ;;  %v11895_v59 = vand.u32 15, %v6662_v14  ;;  %v11896_v33 = vmov 0  ;;  %v7080_v55 = vmul.f32 %v6883_v44, %v6619_v50  ;;  %v11404_v46 = vrot.slane %v7036_v9, 6 }
 0x11f   : > { %v7063_v26 = vsel %vm11421_vm4, %v11892_v47, %v1878_v39  ;;  %v7069_v52 = vsel %vm11416_vm5, %v2071_v41, %v11894_v13  ;;  %v1481_v39 = vrot.slane %v7002_v60, 6  ;;  %v11405_v17 = vrot.slane %v7036_v9, 7 }
 0x120   : > { %11893 = vst [vmem:[#allocation58_spill] sm:$0xff] %v7063_v26  ;;  %vm7074_vm12 = vcmp.ge.s32.totalorder %v11895_v59, 2  ;;  %11899 = vst [vmem:[#allocation60_spill] sm:$0xff] %v7080_v55  ;;  %v7087_v45 = vsel %vm6950_vm10, %v1751_v19, %v1654_v20  ;;  %v2060_v47 = vrot.slane %v7002_v60, 2  ;;  %v11409_v13 = vrot.slane %v7036_v9, 1 }
 0x121   : > { %v11897_v33 = vsel %vm7074_vm12, 4294967295, %v11896_v33  ;;  %v11900_v35 = vand.u32 15, %v6674_v31  ;;  %v11901_v50 = vmov 0  ;;  %v7100_v44 = vsel %vm6973_vm11, %v1943_v1, %v1750_v43 }
 0x122   : > { %11898 = vst [vmem:[#allocation59_spill] sm:$0xff] %v11897_v33  ;;  %v1532_v20 = vsel %vm11422_vm1, %v1481_v39, %v11404_v46  ;;  %v11904_v19 = vmov %v11895_v59  ;;  %v11905_v59 = vmov 0  ;;  %v11908_v43 = vrot.slane %v6817_v10, 1 }
 0x123   : > { %vm7094_vm13 = vcmp.ge.s32.totalorder %v11900_v35, 2  ;;  %v1725_v35 = vsel %vm11419_vm3, %v11406_v8, %v11405_v17  ;;  %vm7115_vm14 = vcmp.ge.s32.totalorder %v11904_v19, 1  ;;  %v1547_v46 = vmax.f32 %v7036_v9, %v1532_v20 }
 0x124   : > { %v11902_v50 = vsel %vm7094_vm13, 4294967295, %v11901_v50  ;;  %v11906_v59 = vsel %vm7115_vm14, 4294967295, %v11905_v59  ;;  %v7123_v1 = vsel %vm11421_vm4, %v11908_v43, %v1865_v0  ;;  %v11909_v63 = vrot.slane %v7002_v60, 1 }
 0x125   : > { %11903 = vst [vmem:[#allocation61_spill] sm:$0xff] %v11902_v50  ;;  %11907 = vst [vmem:[#allocation62_spill] sm:$0xff] %v11906_v59  ;;  %v11910_v14 = vrot.slane %v7036_v9, 2  ;;  %v11911_v8 = vrot.slane %v6832_v32, 2  ;;  %v11914_v21 = vmov 0  ;;  %v7157_v18 = vmax.f32 %v1547_v46, %v1725_v35  ;;  %v12097_v50 = vld [vmem:[#allocation11_spill] sm:$0xff] }
 0x126   : > { %v7132_v17 = vsel %vm11421_vm4, %v11909_v63, %v11409_v13  ;;  %v11913_v13 = vand.u32 15, %v6674_v31  ;;  %v7161_v43 = vmul.f32 %v6926_v16, %v6653_v7  ;;  %v1479_v31 = vrot.slane %v7021_v12, 6 }
 0x127   : > { %v7138_v19 = vsel %vm11416_vm5, %v2060_v47, %v11910_v14  ;;  %v7146_v20 = vsel %vm11416_vm5, %v11911_v8, %v2071_v41  ;;  %v1672_v14 = vrot.slane %v7021_v12, 7  ;;  %11917 = vst [vmem:[#allocation65_spill] sm:$0xff] %v7157_v18  ;;  %v11918_v41 = vand.u32 15, %v6671_v30 }
 0x128   : > { %11912 = vst [vmem:[#allocation63_spill] sm:$0xff] %v7146_v20  ;;  %vm7152_vm15 = vcmp.ge.s32.totalorder %v11913_v13, 1  ;;  %v11919_v8 = vmov 0  ;;  %v11922_v7 = vrot.slane %v7053_v49, 1  ;;  %v11923_v16 = vrot.slane %v6857_v36, 1 }
 0x129   : > { %v11915_v21 = vsel %vm7152_vm15, 4294967295, %v11914_v21  ;;  %vm7165_vm0 = vcmp.lt.s32.totalorder %v11918_v41, 15  ;;  %v1480_v25 = vrot.slane %v7161_v43, 6  ;;  %v11924_v13 = vrot.slane %v6817_v10, 6 }
 0x12a   : > { %11916 = vst [vmem:[#allocation64_spill] sm:$0xff] %v11915_v21  ;;  %v11920_v8 = vsel %vm7165_vm0, 4294967295, %v11919_v8  ;;  %v7182_v41 = vsel %vm11421_vm4, %v11923_v16, %v11922_v7  ;;  %v11925_v46 = vand.u32 15, %v6665_v15  ;;  %v11926_v35 = vmov 0 }
 0x12b   : > { %11921 = vst [vmem:[#allocation66_spill] sm:$0xff] %v11920_v8  ;;  %v1535_v63 = vsel %vm11422_vm1, %v11924_v13, %v1479_v31  ;;  %vm7198_vm3 = vcmp.lt.s32.totalorder %v11929_v53, 14  ;;  %v11930_v7 = vmov 0  ;;  %v1673_v22 = vrot.slane %v7161_v43, 7 }
 0x12c   : > { %vm7192_vm5 = vcmp.ge.s32.totalorder %v11925_v46, 2  ;;  %v11931_v7 = vsel %vm7198_vm3, 4294967295, %v11930_v7  ;;  %v1544_v16 = vmax.f32 %v7021_v12, %v1535_v63  ;;  %v1866_v58 = vrot.slane %v7161_v43, 1 }
 0x12d   : > { %v11927_v35 = vsel %vm7192_vm5, 4294967295, %v11926_v35  ;;  %11932 = vst [vmem:[#allocation68_spill] sm:$0xff] %v11931_v7  ;;  %v2059_v13 = vrot.slane %v7161_v43, 2  ;;  %v11933_v54 = vand.u32 15, %v6680_v40  ;;  %v11934_v46 = vmov 0 }
 0x12e   : > { %11928 = vst [vmem:[#allocation67_spill] sm:$0xff] %v11927_v35  ;;  %v11937_v30 = vand.u32 15, %v6638_v62  ;;  %v11938_v53 = vmov 0  ;;  %v11941_v63 = vand.u32 15, %v6645_v2  ;;  %v11942_v48 = vmov 0  ;;  %v12077_v35 = vld [vmem:[#allocation20_spill] sm:$0xff] }
 0x12f   : > { %vm7208_vm4 = vcmp.ge.s32.totalorder %v11933_v54, 2  ;;  %vm11945_vm9 = vcmp.lt.s32.totalorder %v6580_v24, 2  ;;  %v11947_v26 = vrot.slane %v6817_v10, 7  ;;  %vm11948_vm10 = vcmp.lt.s32.totalorder %v6580_v24, 1 }
 0x130   : > { %v11935_v46 = vsel %vm7208_vm4, 4294967295, %v11934_v46  ;;  %vm7214_vm1 = vcmp.lt.s32.totalorder %v11937_v30, 15  ;;  %vm7220_vm11 = vcmp.lt.s32.totalorder %v11941_v63, 15  ;;  %v1533_v20 = vsel %vm11945_vm9, %v1480_v25, %v1481_v39  ;;  %vm11946_vm7 = vmmov %vm11945_vm9 }
 0x131   : > { %11936 = vst [vmem:[#allocation69_spill] sm:$0xff] %v11935_v46  ;;  %v11939_v53 = vsel %vm7214_vm1, 4294967295, %v11938_v53  ;;  %v11943_v48 = vsel %vm7220_vm11, 4294967295, %v11942_v48  ;;  %v1534_v54 = vsel %vm11946_vm7, %v1479_v31, %v1480_v25  ;;  %v1728_v30 = vsel %vm11948_vm10, %v11947_v26, %v1672_v14  ;;  %vm11951_vm7 = vmmov %vm11948_vm10 }
 0x132   : > { %11940 = vst [vmem:[#allocation70_spill] sm:$0xff] %v11939_v53  ;;  %11944 = vst [vmem:[#allocation71_spill] sm:$0xff] %v11943_v48  ;;  %v7234_v18 = vmul.f32 %v6939_v6, %v6658_v11  ;;  %v1545_v63 = vmax.f32 %v7161_v43, %v1534_v54  ;;  %v1546_v2 = vmax.f32 %v7002_v60, %v1533_v20  ;;  %v11950_v61 = vrot.slane %v7002_v60, 7 }
 0x133   : > { %v1640_v39 = vsel %vm7074_vm12, %v1544_v16, %v7021_v12  ;;  %v11952_v31 = vand.u32 15, %v6630_v57  ;;  %v11953_v26 = vmov 0  ;;  %vm11956_vm10 = vmmov %vm11951_vm7  ;;  %v11957_v20 = vrot.slane %v7002_v60, 1 }
 0x134   : > { %11949 = vst [vmem:[#allocation72_spill] sm:$0xff] %v7234_v18  ;;  %v1726_v25 = vsel %vm11951_vm7, %v1673_v22, %v11950_v61  ;;  %v1727_v11 = vsel %vm11956_vm10, %v1672_v14, %v1673_v22  ;;  %v1737_v6 = vmax.f32 %v1640_v39, %v1728_v30  ;;  %vm11958_vm8 = vcmp.lt.s32.totalorder %v6580_v24, 7 }
 0x135   : > { %vm7247_vm9 = vcmp.lt.s32.totalorder %v11952_v31, 14  ;;  %v1919_v16 = vsel %vm11958_vm8, %v1866_v58, %v11957_v20  ;;  %vm11959_vm12 = vmmov %vm11958_vm8  ;;  %v1642_v57 = vsel %vm7094_vm13, %v1546_v2, %v7002_v60  ;;  %v1738_v61 = vmax.f32 %v1545_v63, %v1727_v11 }
 0x136   : > { %v11954_v26 = vsel %vm7247_vm9, 4294967295, %v11953_v26  ;;  %v1920_v54 = vsel %vm11959_vm12, %v1865_v0, %v1866_v58  ;;  %vm11960_vm7 = vcmp.lt.s32.totalorder %v6580_v24, 6  ;;  %v11961_v33 = vrot.slane %v7021_v12, 2 }
 0x137   : > { %11955 = vst [vmem:[#allocation73_spill] sm:$0xff] %v11954_v26  ;;  %v2112_v31 = vsel %vm11960_vm7, %v2059_v13, %v2060_v47  ;;  %vm11962_vm10 = vmmov %vm11960_vm7  ;;  %v1739_v14 = vmax.f32 %v1642_v57, %v1726_v25  ;;  %v1833_v30 = vsel %vm7115_vm14, %v1737_v6, %v1640_v39  ;;  %v1495_v20 = vrot.slane %v7053_v49, 6 }
 0x138   : > { %v2113_v22 = vsel %vm11962_vm10, %v11961_v33, %v2059_v13  ;;  %v1496_v58 = vrot.slane %v7234_v18, 6  ;;  %v1945_v2 = vmax.f32 %v7023_v42, %v7182_v41  ;;  %v1930_v0 = vmax.f32 %v1833_v30, %v1920_v54 }
 0x139   : > { %v1931_v63 = vmax.f32 %v1738_v61, %v1919_v16  ;;  %v11963_v47 = vand.u32 15, %v6665_v15  ;;  %v11964_v11 = vmov 0  ;;  %v1689_v33 = vrot.slane %v7234_v18, 7 }
 0x13a   : > { %v1835_v13 = vsel %vm7152_vm15, %v1739_v14, %v1642_v57  ;;  %v11967_v39 = vand.u32 15, %v6680_v40  ;;  %v11968_v25 = vmov 0  ;;  %v11971_v41 = vrot.slane %v7080_v55, 6 }
 0x13b   : > { %vm7276_vm8 = vcmp.ge.s32.totalorder %v11963_v47, 1  ;;  %vm11972_vm7 = vcmp.lt.s32.totalorder %v6580_v24, 2  ;;  %v11974_v16 = vrot.slane %v6857_v36, 6  ;;  %v1932_v57 = vmax.f32 %v1835_v13, %v7132_v17 }
 0x13c   : > { %v11965_v11 = vsel %vm7276_vm8, 4294967295, %v11964_v11  ;;  %vm7285_vm12 = vcmp.ge.s32.totalorder %v11967_v39, 1  ;;  %v1517_v15 = vsel %vm11972_vm7, %v1496_v58, %v11971_v41  ;;  %vm11973_vm10 = vmmov %vm11972_vm7  ;;  %v2027_v40 = vsel %vm7165_vm0, %v1931_v63, %v1738_v61 }
 0x13d   : > { %11966 = vst [vmem:[#allocation74_spill] sm:$0xff] %v11965_v11  ;;  %v11969_v25 = vsel %vm7285_vm12, 4294967295, %v11968_v25  ;;  %v1518_v6 = vsel %vm11973_vm10, %v1495_v20, %v1496_v58  ;;  %vm11975_vm13 = vmmov %vm11972_vm7  ;;  %v7302_v14 = vmax.f32 %v1930_v0, %v2113_v22  ;;  %v11977_v30 = vand.u32 15, %v6677_v38 }
 0x13e   : > { %11970 = vst [vmem:[#allocation75_spill] sm:$0xff] %v11969_v25  ;;  %v1519_v54 = vsel %vm11975_vm13, %v11974_v16, %v1495_v20  ;;  %v11978_v47 = vmov 0  ;;  %v7313_v39 = vmul.f32 %v6915_v37, %v6648_v3  ;;  %v2124_v20 = vmax.f32 %v2027_v40, %v2112_v31 }
 0x13f   : > { %11976 = vst [vmem:[#allocation76_spill] sm:$0xff] %v7302_v14  ;;  %vm7306_vm15 = vcmp.lt.s32.totalorder %v11977_v30, 15  ;;  %v1560_v58 = vmax.f32 %v7053_v49, %v1519_v54  ;;  %v1561_v17 = vmax.f32 %v7234_v18, %v1518_v6  ;;  %v1562_v13 = vmax.f32 %v7080_v55, %v1517_v15 }
 0x140   : > { %v11979_v47 = vsel %vm7306_vm15, 4294967295, %v11978_v47  ;;  %v7318_v61 = vmax.f32 %v1932_v57, %v7138_v19  ;;  %v11982_v0 = vrot.slane %v7053_v49, 7  ;;  %vm11983_vm13 = vcmp.lt.s32.totalorder %v6580_v24, 1 }
 0x141   : > { %11980 = vst [vmem:[#allocation77_spill] sm:$0xff] %v11979_v47  ;;  %v1656_v22 = vsel %vm7192_vm5, %v1560_v58, %v7053_v49  ;;  %v1882_v3 = vrot.slane %v7234_v18, 1  ;;  %v2074_v37 = vrot.slane %v7053_v49, 2  ;;  %v7331_v31 = vsel %vm7198_vm3, %v2124_v20, %v2027_v40  ;;  %vm11989_vm7 = vmmov %vm11983_vm13  ;;  %v12032_v47 = vld [vmem:[#allocation41_spill] sm:$0xff] }
 0x142   : > { %11981 = vst [vmem:[#allocation78_spill] sm:$0xff] %v7318_v61  ;;  %v1711_v63 = vsel %vm11983_vm13, %v11982_v0, %v1689_v33  ;;  %11984 = vst [vmem:[#allocation79_spill] sm:$0xff] %v7331_v31  ;;  %v1658_v19 = vsel %vm7208_vm4, %v1562_v13, %v7080_v55  ;;  %v2076_v15 = vrot.slane %v7080_v55, 2  ;;  %v11985_v6 = vmax.f32 %v6977_v28, %v7123_v1 }
 0x143   : > { %v1754_v41 = vmax.f32 %v1561_v17, %v1711_v63  ;;  %v7348_v54 = vsel %vm7220_vm11, %v1945_v2, %v7023_v42  ;;  %v11987_v57 = vmov %v11982_v0  ;;  %v11988_v40 = vrot.slane %v6857_v36, 7  ;;  %vm11991_vm10 = vmmov %vm11989_vm7 }
 0x144   : > { %v7343_v16 = vsel %vm7214_vm1, %v11985_v6, %v6977_v28  ;;  %11986 = vst [vmem:[#allocation80_spill] sm:$0xff] %v7348_v54  ;;  %v11446_v58 = vrot.slane %v7313_v39, 6  ;;  %v11990_v1 = vrot.slane %v7080_v55, 7  ;;  %6192 = vpow2.f32 %v6739_v56 }
 0x145   : > { %v1712_v30 = vsel %vm11989_vm7, %v11988_v40, %v11987_v57  ;;  %v11992_v42 = vmax.f32 %v7087_v45, %v6994_v5  ;;  %v11994_v17 = vmax.f32 %v7100_v44, %v7069_v52  ;;  %vm11997_vm13 = vcmp.lt.s32.totalorder %v6580_v24, 7 }
 0x146   : > { %v1710_v28 = vsel %vm11991_vm10, %v1689_v33, %v11990_v1  ;;  %v1753_v20 = vmax.f32 %v1656_v22, %v1712_v30  ;;  %v11996_v33 = vrot.slane %v7080_v55, 1  ;;  %v11998_v63 = vrot.slane %v7021_v12, 2 }
 0x147   : > { %v7366_v2 = vmax.f32 %v11992_v42, %v7017_v29  ;;  %v7374_v13 = vsel %vm7247_vm9, %v11994_v17, %v7100_v44  ;;  %v1755_v0 = vmax.f32 %v1658_v19, %v1710_v28  ;;  %v11999_v5 = vrot.slane %v6817_v10, 2  ;;  %v12008_v28 = vld [vmem:[#allocation22_spill] sm:$0xff]  ;;  %v5927_v42 = vpop.f32.mrf.mxu1 }
 0x148   : > { %11995 = vst [vmem:[#allocation82_spill] sm:$0xff] %v7374_v13  ;;  %v1903_v56 = vsel %vm11997_vm13, %v1882_v3, %v11996_v33  ;;  %vm12000_vm7 = vcmp.lt.s32.totalorder %v6580_v24, 6  ;;  %v12001_v52 = vrot.slane %v6857_v36, 2  ;;  %v12004_v44 = vand.u32 15, %v6677_v38  ;;  %v12145_v36 = vld [vmem:[#allocation13_spill] sm:$0xff] }
 0x149   : > { %11993 = vst [vmem:[#allocation81_spill] sm:$0xff] %v7366_v2  ;;  %v7386_v29 = vsel %vm12000_vm7, %v11999_v5, %v11998_v63  ;;  %vm12002_vm10 = vmmov %vm12000_vm7  ;;  %v12005_v6 = vmov 0  ;;  %v1947_v57 = vmax.f32 %v1754_v41, %v1903_v56  ;;  %6194 = vpow2.f32 %v6744_v34  ;;  %v12011_v56 = vld [vmem:[#allocation23_spill] sm:$0xff] }
 0x14a   : > { %v7392_v45 = vsel %vm12002_vm10, %v12001_v52, %v2074_v37  ;;  %vm7396_vm11 = vcmp.lt.s32.totalorder %v12004_v44, 14  ;;  %v11448_v1 = vrot.slane %v7313_v39, 1  ;;  %6196 = vpow2.f32 %v12008_v28  ;;  %v12012_v44 = vld [vmem:[#allocation24_spill] sm:$0xff]  ;;  %v485_v28 = vpop.f32.mrf.mxu0  ;;  %v12019_v5 = vld [vmem:[#allocation27_spill] sm:$0xff] }
 0x14b   : > { %12003 = vst [vmem:[#allocation83_spill] sm:$0xff] %v7392_v45  ;;  %v12006_v6 = vsel %vm7396_vm11, 4294967295, %v12005_v6  ;;  %v12009_v38 = vrot.slane %v7080_v55, 6  ;;  %vm12010_vm13 = vcmp.lt.s32.totalorder %v6580_v24, 2  ;;  %v1849_v34 = vsel %vm7276_vm8, %v1753_v20, %v1656_v22  ;;  %v12015_v20 = vld [vmem:[#allocation26_spill] sm:$0xff] }
 0x14c   : > { %12007 = vst [vmem:[#allocation84_spill] sm:$0xff] %v12006_v6  ;;  %v2075_v33 = vrot.slane %v7234_v18, 2  ;;  %6198 = vpow2.f32 %v12011_v56  ;;  %v11447_v63 = vrot.slane %v7313_v39, 7  ;;  %v1851_v52 = vsel %vm7285_vm12, %v1755_v0, %v1658_v19  ;;  %v12016_v56 = vld [vmem:[#allocation5_spill] sm:$0xff] }
 0x14d   : > { %v1516_v17 = vsel %vm12010_vm13, %v12009_v38, %v11446_v58  ;;  %6200 = vpow2.f32 %v12012_v44  ;;  %v12013_v30 = vrot.slane %v7053_v49, 1  ;;  %vm12014_vm7 = vcmp.lt.s32.totalorder %v6580_v24, 7 }
 0x14e   : > { %v2043_v22 = vsel %vm7306_vm15, %v1947_v57, %v1754_v41  ;;  %6202 = vpow2.f32 %v12015_v20  ;;  %v7430_v58 = vadd.f32 %v5927_v42, %v12016_v56  ;;  %v1563_v40 = vmax.f32 %v7313_v39, %v1516_v17  ;;  %vm12018_vm10 = vmmov %vm12014_vm7  ;;  %v12021_v57 = vld [vmem:[#allocation32_spill] sm:$0xff] }
 0x14f   : > { %v1904_v38 = vsel %vm12014_vm7, %v12013_v30, %v1882_v3  ;;  %v12017_v19 = vrot.slane %v7080_v55, 1  ;;  %6204 = vpow2.f32 %v12019_v5  ;;  %vm12020_vm13 = vcmp.lt.s32.totalorder %v6580_v24, 6 }
 0x150   : > { %v1946_v44 = vmax.f32 %v1849_v34, %v1904_v38  ;;  %v2096_v41 = vsel %vm12020_vm13, %v2075_v33, %v2076_v15  ;;  %6206 = vpow2.f32 %v12021_v57  ;;  %v7444_v30 = vadd.f32 %v12016_v56, %v485_v28  ;;  %v12024_v34 = vld [vmem:[#allocation37_spill] sm:$0xff] }
 0x151   : > { %v1902_v0 = vsel %vm12018_vm10, %v12017_v19, %v11448_v1  ;;  %v12022_v42 = vrot.slane %v7080_v55, 7  ;;  %vm12023_vm7 = vcmp.lt.s32.totalorder %v6580_v24, 1  ;;  %v2140_v20 = vmax.f32 %v2043_v22, %v2096_v41  ;;  %vm12026_vm10 = vmmov %vm12020_vm13 }
 0x152   : > { %v1948_v3 = vmax.f32 %v1851_v52, %v1902_v0  ;;  %6208 = vpow2.f32 %v12024_v34  ;;  %v7454_v5 = vadd.s32 128, %v6580_v24  ;;  %v549_v52 = vpop.f32.mrf.mxu1  ;;  %v12025_v38 = vrot.slane %v7313_v39, 2  ;;  %vm12027_vm13 = vmmov %vm12026_vm10  ;;  %v12028_v0 = vld [vmem:[#allocation38_spill] sm:$0xff]  ;;  %v12030_v34 = vld [vmem:[#allocation40_spill] sm:$0xff] }
 0x153   : > { %v1709_v17 = vsel %vm12023_vm7, %v12022_v42, %v11447_v63  ;;  %v2097_v19 = vsel %vm12027_vm13, %v2074_v37, %v2075_v33  ;;  %6210 = vpow2.f32 %v12028_v0  ;;  %v5704_v57 = vmul.f32 -1.442695, %v7430_v58  ;;  %v6193_v33 = vpop.eup %6192 }
 0x154   : > { %v2095_v28 = vsel %vm12026_vm10, %v2076_v15, %v12025_v38  ;;  %v7464_v42 = vmax.f32 %v1563_v40, %v1709_v17  ;;  %v7466_v41 = vmax.f32 %v1946_v44, %v2097_v19  ;;  %6212 = vpow2.f32 %v12030_v34  ;;  %v12033_v15 = vld [vmem:[#allocation44_spill] sm:$0xff]  ;;  %v12036_v44 = vld [vmem:[#allocation43_spill] sm:$0xff] }
 0x155   : > { %v5686_v63 = vmul.f32 -1.442695, %v7444_v30  ;;  %v7470_v1 = vmax.f32 %v1948_v3, %v2095_v28  ;;  %6214 = vpow2.f32 %v12032_v47  ;;  %v7475_v37 = vadd.f32 %v12016_v56, %v549_v52  ;;  %v1474_v56 = vld [vmem:[%s11359_s3] sm:$0xf] }
 0x156   : > { %12029 = vst [vmem:[#allocation22_spill] sm:$0xff] %v7466_v41  ;;  %v7479_v40 = vsel %vm7396_vm11, %v2140_v20, %v2043_v22  ;;  %6216 = vpow2.f32 %v12036_v44  ;;  %v7484_v19 = vadd.s32 248, %v6580_v24  ;;  %v667_v3 = vadd.f32 1.0, %v6193_v33  ;;  %v6195_v22 = vpop.eup %6194 }
 0x157   : > { %12031 = vst [vmem:[#allocation23_spill] sm:$0xff] %v7470_v1  ;;  %12034 = vst [vmem:[#allocation24_spill] sm:$0xff] %v7475_v37  ;;  %6218 = vpow2.f32 %v5704_v57  ;;  %v7488_v28 = vadd.s32 96, %v6580_v24  ;;  %v7494_v20 = vadd.s32 104, %v6580_v24  ;;  %v7497_v52 = vadd.s32 112, %v6580_v24  ;;  %v6197_v34 = vpop.eup %6196 }
 0x158   : > { %12035 = vst [vmem:[#allocation26_spill] sm:$0xff] %v7479_v40  ;;  %6220 = vpow2.f32 %v5686_v63  ;;  %v5702_v0 = vmul.f32 -1.442695, %v7475_v37  ;;  %v2775_v57 = vld [vmem:[%s11359_s3 + $0x4] sm:$0xf]  ;;  %v683_v33 = vadd.f32 1.0, %v6195_v22  ;;  %v1459_v53 = vpack.c.bf16 %v6817_v10, %v6791_v27 }
 0x159   : > { %6222 = vrcp.f32 %v667_v3  ;;  %v7504_v44 = vadd.s32 224, %v6580_v24  ;;  %v7507_v63 = vadd.s32 232, %v6580_v24  ;;  %v6199_v47 = vpop.eup %6198  ;;  %v665_v38 = vadd.f32 1.0, %v6197_v34  ;;  %v7523_v3 = vld [vmem:[%s11359_s3 + $0xc] sm:$0xf] }
 0x15a   : > { %6224 = vpow2.f32 %v5702_v0  ;;  %v7510_v17 = vadd.s32 240, %v6580_v24  ;;  %vm2825_vm7 = vcmask 1043456   ;;  %v6201_v6 = vpop.eup %6200  ;;  %v681_v48 = vadd.f32 1.0, %v6199_v47 }
 0x15b   : > { %12037 = vst [vmem:[#allocation5_spill] sm:$0xff] %v7507_v63  ;;  %6226 = vrcp.f32 %v683_v33  ;;  %6067 = vmatprep.subr.msk.bf16.mxu0 %vm2825_vm7, %v1474_v56  ;;  %6066 = vmatprep.subr.msk.bf16.mxu1 %vm2825_vm7, %v2775_v57  ;;  %v6203_v22 = vpop.eup %6202  ;;  %v668_v25 = vadd.f32 1.0, %v6201_v6  ;;  %v3039_v0 = vsel %vm2825_vm7, %v1474_v56, 0  ;;  %vm11467_vm10 = vcmask 64512   ;;  %v12063_v6 = vld [vmem:[#allocation15_spill] sm:$0xff] }
 0x15c   : > { %12038 = vst [vmem:[#allocation27_spill] sm:$0xff] %v7510_v17  ;;  %6228 = vrcp.f32 %v665_v38  ;;  %v6205_v46 = vpop.eup %6204  ;;  %v684_v7 = vadd.f32 1.0, %v6203_v22  ;;  %5963 = vmatpush3.bf16.msra.mxu0 %v3039_v0  ;;  %v12039_v22 = vld [vmem:[#allocation42_spill] sm:$0xff]  ;;  %v2827_v56 = vsel %vm2825_vm7, %v2775_v57, 0  ;;  %v1461_v27 = vpack.c.bf16 %v7036_v9, %v7002_v60  ;;  %v12055_v60 = vld [vmem:[#allocation8_spill] sm:$0xff] }
 0x15d   : > { %6230 = vrcp.f32 %v681_v48  ;;  %v6207_v26 = vpop.eup %6206  ;;  %v666_v38 = vadd.f32 1.0, %v6205_v46  ;;  %v1458_v47 = vpack.c.bf16 %v12039_v22, %v6814_v23  ;;  %v1460_v46 = vpack.c.bf16 %v7161_v43, %v7021_v12  ;;  %6069 = vmatprep.subr.msk.bf16.mxu0 %vm2825_vm7, %v7523_v3  ;;  %5929 = vmatpush3.bf16.msra.mxu1 %v2827_v56 }
 0x15e   : > { %6232 = vrcp.f32 %v668_v25  ;;  %v682_v48 = vadd.f32 1.0, %v6207_v26  ;;  %v3986_v25 = vld [vmem:[%s11359_s3 + $0x8] sm:$0xf]  ;;  %v12041_v57 = vmov 0  ;;  %v12056_v0 = vand.u32 15, %v12055_v60 }
 0x15f   : > { %v6209_v34 = vpop.eup %6208  ;;  %6234 = vrcp.f32 %v684_v7  ;;  %5964 = vmatprep.mubr.msk.bf16.mxu0 %vm11467_vm10, %v1458_v47  ;;  %6068 = vmatprep.subr.msk.bf16.mxu1 %vm2825_vm7, %v3986_v25  ;;  %v12057_v43 = vmov 0  ;;  %vm12074_vm9 = vcmask 64512   ;;  %vm12081_vm12 = vcmp.lt.s32.totalorder %v6580_v24, 6 }
 0x160   : > { %v6211_v33 = vpop.eup %6210  ;;  %6236 = vrcp.f32 %v666_v38  ;;  %v671_v8 = vadd.f32 1.0, %v6209_v34  ;;  %5965 = vmatmul.mubr.msk.bf16.vlgmr.msra.gmra.mxu0 %vm11467_vm10, %v1459_v53  ;;  %v12044_v38 = vmax.f32 %v7343_v16, %v7386_v29  ;;  %v12049_v29 = vmov 0 }
 0x161   : > { %v6213_v7 = vpop.eup %6212  ;;  %6238 = vrcp.f32 %v682_v48  ;;  %v687_v26 = vadd.f32 1.0, %v6211_v33  ;;  %5968 = vmatprep.mubr.msk.bf16.mxu0 %vm11467_vm10, %v1460_v46  ;;  %vm7587_vm11 = vcmp.lt.s32.totalorder %v12056_v0, 15  ;;  %v12084_v2 = vrot.slane %v7313_v39, 1 }
 0x162   : > { %v6215_v10 = vpop.eup %6214  ;;  %6240 = vrcp.f32 %v671_v8  ;;  %v669_v12 = vadd.f32 1.0, %v6213_v7  ;;  %v12040_v8 = vand.u32 15, %v6638_v62  ;;  %v12046_v7 = vld [vmem:[#allocation57_spill] sm:$0xff]  ;;  %v12058_v43 = vsel %vm7587_vm11, 4294967295, %v12057_v43 }
 0x163   : > { %v6217_v34 = vpop.eup %6216  ;;  %6242 = vrcp.f32 %v687_v26  ;;  %v685_v47 = vadd.f32 1.0, %v6215_v10  ;;  %12059 = vst [vmem:[#allocation44_spill] sm:$0xff] %v12058_v43  ;;  %v12086_v13 = vrot.slane %v7313_v39, 2  ;;  %vm12088_vm4 = vcmp.lt.s32.totalorder %v6580_v24, 2  ;;  %v12122_v43 = vld [vmem:[#allocation10_spill] sm:$0xff] }
 0x164   : > { %vm7552_vm13 = vcmp.lt.s32.totalorder %v12040_v8, 14  ;;  %v6219_v53 = vpop.eup %6218  ;;  %6244 = vrcp.f32 %v669_v12  ;;  %v672_v33 = vadd.f32 1.0, %v6217_v34  ;;  %v12047_v12 = vld [vmem:[#allocation7_spill] sm:$0xff]  ;;  %v7578_v8 = vsel %vm2825_vm7, %v3986_v25, 0 }
 0x165   : > { %v12042_v57 = vsel %vm7552_vm13, 4294967295, %v12041_v57  ;;  %v7563_v48 = vsel %vm7552_vm13, %v12044_v38, %v7343_v16  ;;  %v6221_v22 = vpop.eup %6220  ;;  %6246 = vrcp.f32 %v685_v47  ;;  %v688_v46 = vadd.f32 1.0, %v6219_v53  ;;  %12052 = vst [vmem:[#allocation40_spill] sm:$0xff] %v7578_v8  ;;  %v12053_v38 = vld [vmem:[#allocation12_spill] sm:$0xff] }
 0x166   : > { %12043 = vst [vmem:[#allocation32_spill] sm:$0xff] %v12042_v57  ;;  %12045 = vst [vmem:[#allocation37_spill] sm:$0xff] %v7563_v48  ;;  %v2378_v26 = vmax.f32 %v7563_v48, %v12046_v7  ;;  %v2504_v56 = vmax.f32 %v12046_v7, %v7563_v48  ;;  %v6223_v10 = vpop.eup %6222  ;;  %v12048_v34 = vand.u32 15, %v12047_v12  ;;  %6248 = vrcp.f32 %v672_v33 }
 0x167   : > { %v670_v16 = vadd.f32 1.0, %v6221_v22  ;;  %v2252_v47 = vmax.f32 %v7331_v31, %v12046_v7  ;;  %v6225_v53 = vpop.eup %6224  ;;  %v7583_v62 = vmul.f32 %v6223_v10, %v12053_v38  ;;  %6250 = vrcp.f32 %v688_v46 }
 0x168   : > { %vm7573_vm10 = vcmp.lt.s32.totalorder %v12048_v34, 15  ;;  %v7592_v33 = vmax.f32 %v2504_v56, %v7331_v31  ;;  %v7595_v25 = vmax.f32 %v2378_v26, %v7331_v31  ;;  %v6227_v22 = vpop.eup %6226  ;;  %v686_v7 = vadd.f32 1.0, %v6225_v53  ;;  %v12068_v53 = vld [vmem:[#allocation16_spill] sm:$0xff]  ;;  %5969 = vmatmul.mubr.msk.bf16.gmra.mxu0 %vm12074_vm9, %v1461_v27  ;;  %v12076_v27 = vld [vmem:[#allocation19_spill] sm:$0xff] }
 0x169   : > { %v12050_v29 = vsel %vm7573_vm10, 4294967295, %v12049_v29  ;;  %12054 = vst [vmem:[#allocation41_spill] sm:$0xff] %v7583_v62  ;;  %6252 = vrcp.f32 %v670_v16  ;;  %v7598_v34 = vmax.f32 %v2252_v47, %v7563_v48  ;;  %v5065_v10 = vsel %vm2825_vm7, %v7523_v3, 0  ;;  %v6229_v0 = vpop.eup %6228 }
 0x16a   : > { %12051 = vst [vmem:[#allocation38_spill] sm:$0xff] %v12050_v29  ;;  %12060 = vst [vmem:[#allocation43_spill] sm:$0xff] %v7592_v33  ;;  %v7606_v57 = vmul.f32 %v6227_v22, %v12063_v6  ;;  %v12064_v26 = vand.u32 15, %v12047_v12  ;;  %v12065_v16 = vmov 0  ;;  %6031 = vmatpush3.bf16.msra.mxu0 %v5065_v10  ;;  %v6231_v47 = vpop.eup %6230  ;;  %v7615_v3 = vmul.f32 %v6229_v0, %v12068_v53  ;;  %v12075_v53 = vld [vmem:[#allocation18_spill] sm:$0xff] }
 0x16b   : > { %12061 = vst [vmem:[#allocation42_spill] sm:$0xff] %v7595_v25  ;;  %12062 = vst [vmem:[#allocation57_spill] sm:$0xff] %v7598_v34  ;;  %v12070_v38 = vand.u32 15, %v12055_v60  ;;  %v12071_v46 = vmov 0  ;;  %6254 = vrcp.f32 %v686_v7  ;;  %v6233_v22 = vpop.eup %6232  ;;  %v7630_v60 = vmul.f32 %v6231_v47, %v12075_v53 }
 0x16c   : > { %vm7610_vm15 = vcmp.lt.s32.totalorder %v12064_v26, 14  ;;  %12069 = vst [vmem:[#allocation12_spill] sm:$0xff] %v7615_v3  ;;  %v11485_v6 = vrot.slane %v7615_v3, 1  ;;  %v11487_v7 = vrot.slane %v7615_v3, 2  ;;  %v7636_v11 = vmul.f32 %v6233_v22, %v12076_v27  ;;  %v12082_v26 = vld [vmem:[#allocation65_spill] sm:$0xff] }
 0x16d   : > { %v12066_v16 = vsel %vm7610_vm15, 4294967295, %v12065_v16  ;;  %vm7619_vm7 = vcmp.lt.s32.totalorder %v12070_v38, 14  ;;  %v6235_v38 = vpop.eup %6234  ;;  %v12078_v56 = vrot.slane %v7036_v9, 1  ;;  %vm12079_vm9 = vcmp.lt.s32.totalorder %v6580_v24, 7 }
 0x16e   : > { %12067 = vst [vmem:[#allocation7_spill] sm:$0xff] %v12066_v16  ;;  %v12072_v46 = vsel %vm7619_vm7, 4294967295, %v12071_v46  ;;  %v6237_v12 = vpop.eup %6236  ;;  %v7642_v47 = vmul.f32 %v6235_v38, %v12077_v35  ;;  %v12080_v27 = vrot.slane %v7036_v9, 2  ;;  %v11503_v0 = vrot.slane %v7636_v11, 6 }
 0x16f   : > { %12073 = vst [vmem:[#allocation8_spill] sm:$0xff] %v12072_v46  ;;  %v7644_v53 = vpop.eup %6238  ;;  %v1917_v22 = vsel %vm12079_vm9, %v12078_v56, %v11485_v6  ;;  %v12083_v41 = vrot.slane %v7630_v60, 1  ;;  %v12085_v6 = vrot.slane %v7630_v60, 2  ;;  %v12087_v45 = vrot.slane %v7583_v62, 6 }
 0x170   : > { %v2110_v10 = vsel %vm12081_vm12, %v12080_v27, %v11487_v7  ;;  %v7660_v38 = vpop.eup %6240  ;;  %v1933_v40 = vmax.f32 %v12082_v26, %v1917_v22  ;;  %v12090_v54 = vrot.slane %v7583_v62, 7  ;;  %v12092_v7 = vld [vmem:[#allocation9_spill] sm:$0xff]  ;;  %v12098_v59 = vand.u32 15, %v12097_v50 }
 0x171   : > { %v1901_v56 = vsel %vm12079_vm9, %v12084_v2, %v12083_v41  ;;  %v2094_v27 = vsel %vm12081_vm12, %v12086_v13, %v12085_v6  ;;  %v7676_v35 = vpop.eup %6242  ;;  %v1528_v2 = vsel %vm12088_vm4, %v12087_v45, %v11503_v0  ;;  %v12089_v41 = vrot.slane %v7636_v11, 7 }
 0x172   : > { %v1949_v22 = vmax.f32 %v7464_v42, %v1901_v56  ;;  %vm12091_vm9 = vcmp.lt.s32.totalorder %v6580_v24, 1  ;;  %v12093_v21 = vand.u32 15, %v12092_v7  ;;  %v12094_v56 = vmov 0  ;;  %v7704_v45 = vpop.eup %6244 }
 0x173   : > { %v1721_v13 = vsel %vm12091_vm9, %v12090_v54, %v12089_v41  ;;  %vm7700_vm3 = vcmp.ge.s32.totalorder %v12098_v59, 2  ;;  %v12099_v31 = vmov 0  ;;  %v2029_v54 = vsel %vm7573_vm10, %v1933_v40, %v12082_v26  ;;  %v7719_v48 = vpop.eup %6246 }
 0x174   : > { %vm7694_vm12 = vcmp.ge.s32.totalorder %v12093_v21, 2  ;;  %v12100_v31 = vsel %vm7700_vm3, 4294967295, %v12099_v31  ;;  %v1551_v41 = vmax.f32 %v7636_v11, %v1528_v2  ;;  %v12102_v0 = vrot.slane %v7636_v11, 1 }
 0x175   : > { %v12095_v56 = vsel %vm7694_vm12, 4294967295, %v12094_v56  ;;  %12101 = vst [vmem:[#allocation16_spill] sm:$0xff] %v12100_v31  ;;  %v12103_v21 = vrot.slane %v7583_v62, 1  ;;  %vm12104_vm4 = vcmp.lt.s32.totalorder %v6580_v24, 7  ;;  %v2126_v8 = vmax.f32 %v2029_v54, %v2110_v10 }
 0x176   : > { %12096 = vst [vmem:[#allocation15_spill] sm:$0xff] %v12095_v56  ;;  %v2045_v29 = vsel %vm7587_vm11, %v1949_v22, %v7464_v42  ;;  %v12105_v40 = vrot.slane %v7636_v11, 2  ;;  %v12106_v26 = vrot.slane %v7583_v62, 2  ;;  %vm12107_vm9 = vcmp.lt.s32.totalorder %v6580_v24, 6 }
 0x177   : > { %v7716_v6 = vsel %vm12104_vm4, %v12103_v21, %v12102_v0  ;;  %v7733_v21 = vpop.eup %6248  ;;  %v2142_v59 = vmax.f32 %v2045_v29, %v2094_v27  ;;  %v7735_v34 = vmax.f32 %v1551_v41, %v1721_v13  ;;  %v12108_v42 = vand.u32 15, %v12092_v7 }
 0x178   : > { %v7730_v2 = vsel %vm12107_vm9, %v12106_v26, %v12105_v40  ;;  %v12109_v22 = vmov 0  ;;  %v12112_v40 = vand.u32 15, %v12097_v50  ;;  %v12113_v26 = vmov 0  ;;  %v7751_v0 = vpop.eup %6250  ;;  %v12120_v50 = vld [vmem:[#allocation21_spill] sm:$0xff] }
 0x179   : > { %vm7741_vm4 = vcmp.ge.s32.totalorder %v12108_v42, 1  ;;  %v7755_v27 = vsel %vm7610_vm15, %v2126_v8, %v2029_v54  ;;  %v12117_v13 = vrot.slane %v7642_v47, 6  ;;  %v12118_v7 = vrot.slane %v7606_v57, 6  ;;  %v7773_v8 = vpop.eup %6252 }
 0x17a   : > { %v12110_v22 = vsel %vm7741_vm4, 4294967295, %v12109_v22  ;;  %vm7747_vm9 = vcmp.ge.s32.totalorder %v12112_v40, 1  ;;  %12116 = vst [vmem:[#allocation20_spill] sm:$0xff] %v7755_v27  ;;  %vm12119_vm11 = vcmp.lt.s32.totalorder %v6580_v24, 2  ;;  %v7765_v40 = vmul.f32 %v6237_v12, %v12120_v50  ;;  %v7805_v27 = vpop.eup %6254 }
 0x17b   : > { %12111 = vst [vmem:[#allocation18_spill] sm:$0xff] %v12110_v22  ;;  %v12114_v26 = vsel %vm7747_vm9, 4294967295, %v12113_v26  ;;  %v1512_v41 = vsel %vm12119_vm11, %v12118_v7, %v12117_v13  ;;  %v12123_v10 = vand.u32 15, %v12122_v43  ;;  %v12124_v25 = vmov 0  ;;  %12137 = vst [vmem:[#allocation21_spill] sm:$0xff] %v7805_v27 }
 0x17c   : > { %12115 = vst [vmem:[#allocation19_spill] sm:$0xff] %v12114_v26  ;;  %12121 = vst [vmem:[#allocation65_spill] sm:$0xff] %v7765_v40  ;;  %v7777_v54 = vsel %vm7619_vm7, %v2142_v59, %v2045_v29  ;;  %v1567_v16 = vmax.f32 %v7642_v47, %v1512_v41  ;;  %v12128_v13 = vrot.slane %v7642_v47, 7  ;;  %v12129_v7 = vrot.slane %v7606_v57, 7 }
 0x17d   : > { %vm7769_vm13 = vcmp.lt.s32.totalorder %v12123_v10, 15  ;;  %12127 = vst [vmem:[#allocation11_spill] sm:$0xff] %v7777_v54  ;;  %vm12130_vm11 = vcmp.lt.s32.totalorder %v6580_v24, 1  ;;  %v12131_v10 = vrot.slane %v7642_v47, 1  ;;  %v12132_v50 = vrot.slane %v7606_v57, 1 }
 0x17e   : > { %v12125_v25 = vsel %vm7769_vm13, 4294967295, %v12124_v25  ;;  %v1705_v12 = vsel %vm12130_vm11, %v12129_v7, %v12128_v13  ;;  %vm12133_vm15 = vcmp.lt.s32.totalorder %v6580_v24, 7  ;;  %v12134_v29 = vrot.slane %v7642_v47, 2 }
 0x17f   : > { %12126 = vst [vmem:[#allocation9_spill] sm:$0xff] %v12125_v25  ;;  %v7792_v42 = vsel %vm12133_vm15, %v12132_v50, %v12131_v10  ;;  %v12135_v59 = vrot.slane %v7606_v57, 2  ;;  %vm12136_vm7 = vcmp.lt.s32.totalorder %v6580_v24, 6  ;;  %v1483_v46 = vrot.slane %v7615_v3, 6 }
 0x180   : > { %v1484_v13 = vrot.slane %v7765_v40, 6  ;;  %v1677_v7 = vrot.slane %v7765_v40, 7  ;;  %v7807_v55 = vmax.f32 %v1567_v16, %v1705_v12  ;;  %v12138_v10 = vand.u32 15, %v12122_v43  ;;  %v12150_v43 = vld [vmem:[#allocation17_spill] sm:$0xff] }
 0x181   : > { %v7800_v41 = vsel %vm12136_vm7, %v12135_v59, %v12134_v29  ;;  %v12139_v50 = vmov 0  ;;  %v12142_v49 = vrot.slane %v7615_v3, 7  ;;  %v12143_v29 = vrot.slane %v7036_v9, 7  ;;  %vm12144_vm7 = vmmov %vm12130_vm11 }
 0x182   : > { %vm7811_vm15 = vcmp.lt.s32.totalorder %v12138_v10, 14  ;;  %v1870_v18 = vrot.slane %v7765_v40, 1  ;;  %v2063_v51 = vrot.slane %v7765_v40, 2  ;;  %v12146_v16 = vand.u32 15, %v12145_v36 }
 0x183   : > { %v12140_v50 = vsel %vm7811_vm15, 4294967295, %v12139_v50  ;;  %v1724_v59 = vsel %vm12144_vm7, %v12143_v29, %v12142_v49  ;;  %v12147_v12 = vmov 0  ;;  %v12151_v10 = vand.u32 15, %v12150_v43 }
 0x184   : > { %12141 = vst [vmem:[#allocation10_spill] sm:$0xff] %v12140_v50  ;;  %vm7825_vm11 = vcmp.ge.s32.totalorder %v12146_v16, 2  ;;  %v12152_v4 = vmov 0  ;;  %v12155_v33 = vrot.slane %v7583_v62, 6  ;;  %vm12156_vm7 = vcmp.lt.s32.totalorder %v6580_v24, 2 }
 0x185   : > { %v12148_v12 = vsel %vm7825_vm11, 4294967295, %v12147_v12  ;;  %vm7831_vm10 = vcmp.ge.s32.totalorder %v12151_v10, 2  ;;  %vm12157_vm0 = vmmov %vm12156_vm7  ;;  %v12158_v54 = vrot.slane %v7036_v9, 6  ;;  %v12160_v1 = vrot.slane %v7583_v62, 7 }
 0x186   : > { %12149 = vst [vmem:[#allocation13_spill] sm:$0xff] %v12148_v12  ;;  %v12153_v4 = vsel %vm7831_vm10, 4294967295, %v12152_v4  ;;  %v1529_v49 = vsel %vm12156_vm7, %v1484_v13, %v12155_v33  ;;  %v1530_v29 = vsel %vm12157_vm0, %v1483_v46, %v1484_v13  ;;  %vm12159_vm1 = vmmov %vm12157_vm0  ;;  %vm12161_vm8 = vcmp.lt.s32.totalorder %v6580_v24, 1 }
 0x187   : > { %12154 = vst [vmem:[#allocation17_spill] sm:$0xff] %v12153_v4  ;;  %v1531_v16 = vsel %vm12159_vm1, %v12158_v54, %v1483_v46  ;;  %v1722_v10 = vsel %vm12161_vm8, %v1677_v7, %v12160_v1  ;;  %v1549_v63 = vmax.f32 %v7765_v40, %v1530_v29  ;;  %v1550_v27 = vmax.f32 %v7583_v62, %v1529_v49  ;;  %vm12163_vm0 = vmmov %vm12161_vm8 }
 0x188   : > { %v1548_v61 = vmax.f32 %v7615_v3, %v1531_v16  ;;  %v12162_v33 = vrot.slane %v7615_v3, 7  ;;  %v12164_v9 = vrot.slane %v7583_v62, 1  ;;  %vm12165_vm1 = vcmp.lt.s32.totalorder %v6580_v24, 7 }
 0x189   : > { %v12166_v54 = vrot.slane %v7615_v3, 1  ;;  %vm12167_vm8 = vmmov %vm12165_vm1  ;;  %v12168_v16 = vrot.slane %v7583_v62, 2  ;;  %vm12169_vm7 = vcmp.lt.s32.totalorder %v6580_v24, 6  ;;  %v12170_v29 = vrot.slane %v7615_v3, 2 }
 0x18a   : > { %v1723_v13 = vsel %vm12163_vm0, %v12162_v33, %v1677_v7  ;;  %v1915_v46 = vsel %vm12165_vm1, %v1870_v18, %v12164_v9  ;;  %vm12171_vm5 = vmmov %vm12169_vm7  ;;  %v12172_v33 = vand.u32 15, %v12145_v36  ;;  %v12173_v40 = vmov 0  ;;  %v12180_v36 = vld [vmem:[#allocation25_spill] sm:$0xff] }
 0x18b   : > { %v1916_v1 = vsel %vm12167_vm8, %v12166_v54, %v1870_v18  ;;  %v2108_v49 = vsel %vm12169_vm7, %v2063_v51, %v12168_v16  ;;  %v2109_v7 = vsel %vm12171_vm5, %v12170_v29, %v2063_v51  ;;  %v12176_v9 = vand.u32 15, %v12150_v43  ;;  %v12181_v43 = vld [vmem:[#allocation14_spill] sm:$0xff] }
 0x18c   : > { %vm7874_vm0 = vcmp.ge.s32.totalorder %v12172_v33, 1  ;;  %v12177_v18 = vmov 0  ;;  %v1644_v54 = vsel %vm7694_vm12, %v1548_v61, %v7615_v3  ;;  %v1646_v51 = vsel %vm7700_vm3, %v1550_v27, %v7583_v62 }
 0x18d   : > { %v12174_v40 = vsel %vm7874_vm0, 4294967295, %v12173_v40  ;;  %vm7880_vm1 = vcmp.ge.s32.totalorder %v12176_v9, 1  ;;  %v1742_v16 = vmax.f32 %v1549_v63, %v1723_v13  ;;  %v7892_v29 = vmul.f32 %v7644_v53, %v12180_v36 }
 0x18e   : > { %12175 = vst [vmem:[#allocation85_spill] sm:$0xff] %v12174_v40  ;;  %v12178_v18 = vsel %vm7880_vm1, 4294967295, %v12177_v18  ;;  %v1741_v33 = vmax.f32 %v1644_v54, %v1724_v59  ;;  %v1743_v37 = vmax.f32 %v1646_v51, %v1722_v10  ;;  %v12182_v9 = vand.u32 15, %v12181_v43 }
 0x18f   : > { %12179 = vst [vmem:[#allocation86_spill] sm:$0xff] %v12178_v18  ;;  %v12183_v14 = vmov 0  ;;  %v1499_v56 = vrot.slane %v7630_v60, 6  ;;  %v12186_v61 = vrot.slane %v7630_v60, 7  ;;  %v12187_v31 = vrot.slane %v7313_v39, 7 }
 0x190   : > { %vm7896_vm5 = vcmp.lt.s32.totalorder %v12182_v9, 15  ;;  %vm12188_vm8 = vcmp.lt.s32.totalorder %v6580_v24, 1  ;;  %v1935_v27 = vmax.f32 %v1742_v16, %v1915_v46  ;;  %v1500_v53 = vrot.slane %v7892_v29, 6 }
 0x191   : > { %v12184_v14 = vsel %vm7896_vm5, 4294967295, %v12183_v14  ;;  %v1708_v63 = vsel %vm12188_vm8, %v12187_v31, %v12186_v61  ;;  %v1693_v59 = vrot.slane %v7892_v29, 7  ;;  %v1886_v10 = vrot.slane %v7892_v29, 1 }
 0x192   : > { %12185 = vst [vmem:[#allocation25_spill] sm:$0xff] %v12184_v14  ;;  %v1837_v13 = vsel %vm7741_vm4, %v1741_v33, %v1644_v54  ;;  %v1839_v36 = vsel %vm7747_vm9, %v1743_v37, %v1646_v51  ;;  %v12189_v9 = vrot.slane %v7313_v39, 6  ;;  %vm12190_vm7 = vcmp.lt.s32.totalorder %v6580_v24, 2 }
 0x193   : > { %v2079_v31 = vrot.slane %v7892_v29, 2  ;;  %v1934_v46 = vmax.f32 %v1837_v13, %v1916_v1  ;;  %v1936_v61 = vmax.f32 %v1839_v36, %v7716_v6  ;;  %v2031_v3 = vsel %vm7769_vm13, %v1935_v27, %v1742_v16  ;;  %vm12196_vm9 = vmmov %vm12190_vm7 }
 0x194   : > { %v1515_v62 = vsel %vm12190_vm7, %v12189_v9, %v1499_v56  ;;  %v12191_v17 = vand.u32 15, %v12181_v43  ;;  %v12192_v54 = vmov 0  ;;  %v12195_v37 = vrot.slane %v7606_v57, 6 }
 0x195   : > { %v2128_v33 = vmax.f32 %v2031_v3, %v2108_v49  ;;  %v1514_v1 = vsel %vm12190_vm7, %v1499_v56, %v1500_v53  ;;  %v1564_v6 = vmax.f32 %v7630_v60, %v1515_v62  ;;  %v7936_v16 = vmax.f32 %v1934_v46, %v2109_v7 }
 0x196   : > { %vm7924_vm8 = vcmp.lt.s32.totalorder %v12191_v17, 14  ;;  %v1513_v51 = vsel %vm12196_vm9, %v1500_v53, %v12195_v37  ;;  %v7939_v17 = vmax.f32 %v1936_v61, %v7730_v2  ;;  %v1565_v43 = vmax.f32 %v7892_v29, %v1514_v1 }
 0x197   : > { %v12193_v54 = vsel %vm7924_vm8, 4294967295, %v12192_v54  ;;  %v1566_v13 = vmax.f32 %v7606_v57, %v1513_v51  ;;  %v12198_v27 = vrot.slane %v7606_v57, 7  ;;  %vm12199_vm13 = vcmp.lt.s32.totalorder %v6580_v24, 1 }
 0x198   : > { %12194 = vst [vmem:[#allocation14_spill] sm:$0xff] %v12193_v54  ;;  %12197 = vst [vmem:[#allocation87_spill] sm:$0xff] %v7939_v17  ;;  %v7948_v49 = vsel %vm7811_vm15, %v2128_v33, %v2031_v3  ;;  %v1660_v62 = vsel %vm7825_vm11, %v1564_v6, %v7630_v60  ;;  %v12200_v2 = vrot.slane %v7630_v60, 7  ;;  %v12202_v61 = vrot.slane %v7606_v57, 1  ;;  %v12210_v6 = vld [vmem:[#allocation28_spill] sm:$0xff] }
 0x199   : > { %v1706_v36 = vsel %vm12199_vm13, %v1693_v59, %v12198_v27  ;;  %v1662_v56 = vsel %vm7831_vm10, %v1566_v13, %v7606_v57  ;;  %vm12201_vm9 = vmmov %vm12199_vm13  ;;  %v1757_v53 = vmax.f32 %v1660_v62, %v1708_v63  ;;  %vm12203_vm13 = vcmp.lt.s32.totalorder %v6580_v24, 7 }
 0x19a   : > { %v1707_v7 = vsel %vm12201_vm9, %v12200_v2, %v1693_v59  ;;  %v1759_v46 = vmax.f32 %v1662_v56, %v1706_v36  ;;  %v1899_v3 = vsel %vm12203_vm13, %v1886_v10, %v12202_v61  ;;  %v12204_v37 = vrot.slane %v7630_v60, 1  ;;  %vm12205_vm7 = vmmov %vm12203_vm13  ;;  %v12211_v36 = vld [vmem:[#allocation29_spill] sm:$0xff] }
 0x19b   : > { %v1758_v9 = vmax.f32 %v1565_v43, %v1707_v7  ;;  %v12206_v33 = vrot.slane %v7606_v57, 2  ;;  %vm12207_vm10 = vcmp.lt.s32.totalorder %v6580_v24, 6  ;;  %v12208_v59 = vrot.slane %v7630_v60, 2  ;;  %v12213_v7 = vld [vmem:[#allocation31_spill] sm:$0xff] }
 0x19c   : > { %v1900_v51 = vsel %vm12205_vm7, %v12204_v37, %v1886_v10  ;;  %vm12209_vm9 = vmmov %vm12207_vm10  ;;  %v7978_v13 = vmul.f32 %v7660_v38, %v12210_v6  ;;  %v1853_v43 = vsel %vm7874_vm0, %v1757_v53, %v1660_v62  ;;  %v1855_v10 = vsel %vm7880_vm1, %v1759_v46, %v1662_v56  ;;  %v12218_v53 = vld [vmem:[#allocation34_spill] sm:$0xff]  ;;  %v12229_v62 = vld [vmem:[#allocation33_spill] sm:$0xff] }
 0x19d   : > { %v2092_v1 = vsel %vm12207_vm10, %v2079_v31, %v12206_v33  ;;  %v2093_v63 = vsel %vm12209_vm9, %v12208_v59, %v2079_v31  ;;  %v1951_v27 = vmax.f32 %v1758_v9, %v1899_v3  ;;  %v7986_v2 = vmul.f32 %v7676_v35, %v12211_v36 }
 0x19e   : > { %v12214_v61 = vand.u32 15, %v12213_v7  ;;  %v12215_v37 = vmov 0  ;;  %v1950_v31 = vmax.f32 %v1853_v43, %v1900_v51  ;;  %v1952_v38 = vmax.f32 %v1855_v10, %v7792_v42 }
 0x19f   : > { %12212 = vst [vmem:[#allocation28_spill] sm:$0xff] %v7986_v2  ;;  %v12219_v56 = vand.u32 15, %v12218_v53  ;;  %v12220_v46 = vmov 0  ;;  %v12223_v35 = vand.u32 15, %v7454_v5  ;;  %v12224_v3 = vmov 0 }
 0x1a0   : > { %vm7990_vm10 = vcmp.lt.s32.totalorder %v12214_v61, 15  ;;  %v2047_v51 = vsel %vm7896_vm5, %v1951_v27, %v1758_v9  ;;  %v8014_v43 = vmax.f32 %v1950_v31, %v2093_v63  ;;  %v8017_v36 = vmax.f32 %v1952_v38, %v7800_v41 }
 0x1a1   : > { %v12216_v37 = vsel %vm7990_vm10, 4294967295, %v12215_v37  ;;  %vm7999_vm13 = vcmp.lt.s32.totalorder %v12219_v56, 15  ;;  %vm8005_vm7 = vcmp.ge.s32.totalorder %v12223_v35, 2  ;;  %v2144_v10 = vmax.f32 %v2047_v51, %v2092_v1  ;;  %v12228_v56 = vld [vmem:[#allocation30_spill] sm:$0xff]  ;;  %v12234_v1 = vld [vmem:[#allocation35_spill] sm:$0xff] }
 0x1a2   : > { %12217 = vst [vmem:[#allocation29_spill] sm:$0xff] %v12216_v37  ;;  %v12221_v46 = vsel %vm7999_vm13, 4294967295, %v12220_v46  ;;  %v12225_v3 = vsel %vm8005_vm7, 4294967295, %v12224_v3  ;;  %12227 = vst [vmem:[#allocation88_spill] sm:$0xff] %v8017_v36  ;;  %v8022_v35 = vmul.f32 %v7704_v45, %v12228_v56  ;;  %v8026_v9 = vmul.f32 %v7719_v48, %v12229_v62 }
 0x1a3   : > { %12222 = vst [vmem:[#allocation31_spill] sm:$0xff] %v12221_v46  ;;  %12226 = vst [vmem:[#allocation34_spill] sm:$0xff] %v12225_v3  ;;  %v12230_v27 = vand.u32 15, %v12218_v53  ;;  %v12231_v6 = vmov 0  ;;  %v8036_v41 = vmul.f32 %v7733_v21, %v12234_v1  ;;  %v12235_v63 = vand.u32 15, %v7454_v5  ;;  %v12515_v46 = vld [vmem:[#allocation59_spill] sm:$0xff] }
 0x1a4   : > { %v12236_v31 = vmov 0  ;;  %v8047_v48 = vsel %vm7924_vm8, %v2144_v10, %v2047_v51  ;;  %v8051_v38 = vmul.f32 %v7751_v0, %v7430_v58  ;;  %v8056_v21 = vmul.f32 %v7773_v8, %v7444_v30 }
 0x1a5   : > { %vm8030_vm9 = vcmp.lt.s32.totalorder %v12230_v27, 14  ;;  %vm8040_vm5 = vcmp.ge.s32.totalorder %v12235_v63, 1  ;;  %v11572_v53 = vrot.slane %v8022_v35, 1  ;;  %v11573_v56 = vrot.slane %v8022_v35, 2 }
 0x1a6   : > { %v12232_v6 = vsel %vm8030_vm9, 4294967295, %v12231_v6  ;;  %v12237_v31 = vsel %vm8040_vm5, 4294967295, %v12236_v31  ;;  %12239 = vst [vmem:[#allocation35_spill] sm:$0xff] %v8051_v38  ;;  %v12240_v51 = vand.u32 15, %v12033_v15  ;;  %v12241_v10 = vmov 0 }
 0x1a7   : > { %12233 = vst [vmem:[#allocation30_spill] sm:$0xff] %v12232_v6  ;;  %12238 = vst [vmem:[#allocation33_spill] sm:$0xff] %v12237_v31  ;;  %v11578_v58 = vrot.slane %v8026_v9, 1  ;;  %v11581_v0 = vrot.slane %v8026_v9, 2  ;;  %v1490_v30 = vrot.slane %v8036_v41, 6  ;;  %v1683_v8 = vrot.slane %v8036_v41, 7 }
 0x1a8   : > { %vm8064_vm8 = vcmp.lt.s32.totalorder %v12240_v51, 15  ;;  %v12244_v1 = vrot.slane %v7636_v11, 1  ;;  %vm12245_vm1 = vcmp.lt.s32.totalorder %v6580_v24, 7  ;;  %v12246_v51 = vrot.slane %v7636_v11, 2 }
 0x1a9   : > { %v12242_v10 = vsel %vm8064_vm8, 4294967295, %v12241_v10  ;;  %vm12247_vm0 = vcmp.lt.s32.totalorder %v6580_v24, 6  ;;  %v1876_v5 = vrot.slane %v8036_v41, 1  ;;  %v2069_v61 = vrot.slane %v8036_v41, 2 }
 0x1aa   : > { %12243 = vst [vmem:[#allocation89_spill] sm:$0xff] %v12242_v10  ;;  %v1913_v63 = vsel %vm12245_vm1, %v12244_v1, %v11572_v53  ;;  %v8084_v27 = vsel %vm12247_vm0, %v12246_v51, %v11573_v56  ;;  %v12248_v59 = vand.u32 15, %v6580_v24  ;;  %v12249_v62 = vmov 0 }
 0x1ab   : > { %v1937_v1 = vmax.f32 %v7735_v34, %v1913_v63  ;;  %v12252_v53 = vrot.slane %v7642_v47, 1  ;;  %v12253_v56 = vrot.slane %v7642_v47, 2  ;;  %v12255_v33 = vmov 0 }
 0x1ac   : > { %vm8090_vm11 = vcmp.ge.s32.totalorder %v12248_v59, 2  ;;  %v12254_v59 = vand.u32 15, %v12033_v15  ;;  %v12258_v63 = vrot.slane %v6832_v32, 6  ;;  %vm12259_vm3 = vcmp.lt.s32.totalorder %v6580_v24, 2 }
 0x1ad   : > { %v12250_v62 = vsel %vm8090_vm11, 4294967295, %v12249_v62  ;;  %v1897_v51 = vsel %vm12245_vm1, %v12252_v53, %v11578_v58  ;;  %v2090_v42 = vsel %vm12247_vm0, %v12253_v56, %v11581_v0  ;;  %v12260_v58 = vrot.slane %v7978_v13, 6  ;;  %vm12261_vm1 = vmmov %vm12259_vm3 }
 0x1ae   : > { %12251 = vst [vmem:[#allocation90_spill] sm:$0xff] %v12250_v62  ;;  %vm8109_vm15 = vcmp.lt.s32.totalorder %v12254_v59, 14  ;;  %v1523_v45 = vsel %vm12259_vm3, %v1490_v30, %v12258_v63  ;;  %v1953_v53 = vmax.f32 %v7807_v55, %v1897_v51  ;;  %v12262_v15 = vrot.slane %v6832_v32, 7 }
 0x1af   : > { %v12256_v33 = vsel %vm8109_vm15, 4294967295, %v12255_v33  ;;  %v1524_v54 = vsel %vm12261_vm1, %v12260_v58, %v1490_v30  ;;  %v1556_v56 = vmax.f32 %v6832_v32, %v1523_v45  ;;  %vm12263_vm0 = vcmp.lt.s32.totalorder %v6580_v24, 1 }
 0x1b0   : > { %12257 = vst [vmem:[#allocation91_spill] sm:$0xff] %v12256_v33  ;;  %v1716_v59 = vsel %vm12263_vm0, %v1683_v8, %v12262_v15  ;;  %v8130_v0 = vsel %vm7990_vm10, %v1937_v1, %v7735_v34  ;;  %v1555_v63 = vmax.f32 %v8036_v41, %v1524_v54  ;;  %v12264_v51 = vrot.slane %v7978_v13, 7  ;;  %vm12265_vm3 = vmmov %vm12263_vm0 }
 0x1b1   : > { %v12266_v58 = vrot.slane %v6832_v32, 1  ;;  %vm12267_vm1 = vcmp.lt.s32.totalorder %v6580_v24, 7  ;;  %v12268_v30 = vand.u32 15, %v6580_v24  ;;  %v12269_v15 = vmov 0 }
 0x1b2   : > { %v1717_v14 = vsel %vm12265_vm3, %v12264_v51, %v1683_v8  ;;  %v2049_v54 = vsel %vm7999_vm13, %v1953_v53, %v7807_v55  ;;  %v1652_v8 = vsel %vm8005_vm7, %v1556_v56, %v6832_v32  ;;  %v12272_v1 = vrot.slane %v7978_v13, 1  ;;  %vm12273_vm3 = vmmov %vm12267_vm1 }
 0x1b3   : > { %v1909_v45 = vsel %vm12267_vm1, %v1876_v5, %v12266_v58  ;;  %vm8143_vm0 = vcmp.ge.s32.totalorder %v12268_v30, 1  ;;  %v12274_v58 = vand.u32 15, %v7484_v19  ;;  %v12275_v30 = vmov 0 }
 0x1b4   : > { %v12270_v15 = vsel %vm8143_vm0, 4294967295, %v12269_v15  ;;  %v8159_v51 = vsel %vm12273_vm3, %v12272_v1, %v1876_v5  ;;  %v2146_v34 = vmax.f32 %v2049_v54, %v2090_v42  ;;  %v1748_v18 = vmax.f32 %v1555_v63, %v1717_v14 }
 0x1b5   : > { %12271 = vst [vmem:[#allocation92_spill] sm:$0xff] %v12270_v15  ;;  %vm8163_vm1 = vcmp.lt.s32.totalorder %v12274_v58, 15  ;;  %v1749_v40 = vmax.f32 %v1652_v8, %v1716_v59  ;;  %v12278_v55 = vrot.slane %v6832_v32, 2  ;;  %vm12279_vm10 = vcmp.lt.s32.totalorder %v6580_v24, 6 }
 0x1b6   : > { %v12276_v30 = vsel %vm8163_vm1, 4294967295, %v12275_v30  ;;  %v12280_v56 = vrot.slane %v7978_v13, 2  ;;  %vm12281_vm7 = vmmov %vm12279_vm10  ;;  %v1506_v1 = vrot.slane %v8051_v38, 6  ;;  %v1699_v58 = vrot.slane %v8051_v38, 7 }
 0x1b7   : > { %12277 = vst [vmem:[#allocation93_spill] sm:$0xff] %v12276_v30  ;;  %v2102_v53 = vsel %vm12279_vm10, %v2069_v61, %v12278_v55  ;;  %v1892_v4 = vrot.slane %v8051_v38, 1  ;;  %v12282_v14 = vand.u32 15, %v7488_v28  ;;  %v12283_v42 = vmov 0  ;;  %v12365_v30 = vld [vmem:[#allocation21_spill] sm:$0xff] }
 0x1b8   : > { %v8175_v5 = vsel %vm12281_vm7, %v12280_v56, %v2069_v61  ;;  %v8188_v59 = vsel %vm8030_vm9, %v2146_v34, %v2049_v54  ;;  %v1845_v61 = vsel %vm8040_vm5, %v1749_v40, %v1652_v8  ;;  %v1941_v63 = vmax.f32 %v1748_v18, %v1909_v45  ;;  %v12295_v34 = vld [vmem:[#allocation58_spill] sm:$0xff] }
 0x1b9   : > { %vm8182_vm3 = vcmp.ge.s32.totalorder %v12282_v14, 2  ;;  %12286 = vst [vmem:[#allocation95_spill] sm:$0xff] %v8188_v59  ;;  %v12287_v55 = vand.u32 15, %v7484_v19  ;;  %v12288_v56 = vmov 0  ;;  %v2085_v12 = vrot.slane %v8051_v38, 2 }
 0x1ba   : > { %v12284_v42 = vsel %vm8182_vm3, 4294967295, %v12283_v42  ;;  %v12291_v14 = vand.u32 15, %v7497_v52  ;;  %v12292_v50 = vmov 0  ;;  %v1942_v54 = vmax.f32 %v1845_v61, %v12295_v34 }
 0x1bb   : > { %12285 = vst [vmem:[#allocation94_spill] sm:$0xff] %v12284_v42  ;;  %vm8194_vm10 = vcmp.lt.s32.totalorder %v12287_v55, 14  ;;  %v12296_v25 = vrot.slane %v7986_v2, 6  ;;  %vm12297_vm5 = vcmp.lt.s32.totalorder %v6580_v24, 2  ;;  %v12298_v19 = vrot.slane %v6814_v23, 6  ;;  %v12399_v42 = vld [vmem:[#allocation11_spill] sm:$0xff] }
 0x1bc   : > { %v12289_v56 = vsel %vm8194_vm10, 4294967295, %v12288_v56  ;;  %vm8201_vm7 = vcmp.ge.s32.totalorder %v12291_v14, 2  ;;  %vm12299_vm4 = vmmov %vm12297_vm5  ;;  %v12300_v8 = vrot.slane %v7986_v2, 7  ;;  %vm12301_vm12 = vcmp.lt.s32.totalorder %v6580_v24, 1 }
 0x1bd   : > { %12290 = vst [vmem:[#allocation96_spill] sm:$0xff] %v12289_v56  ;;  %v12293_v50 = vsel %vm8201_vm7, 4294967295, %v12292_v50  ;;  %v1508_v40 = vsel %vm12297_vm5, %v12296_v25, %v1506_v1  ;;  %v1539_v45 = vsel %vm12299_vm4, %v1506_v1, %v12298_v19  ;;  %v2037_v14 = vsel %vm8064_vm8, %v1941_v63, %v1748_v18  ;;  %vm12303_vm5 = vmmov %vm12301_vm12 }
 0x1be   : > { %12294 = vst [vmem:[#allocation97_spill] sm:$0xff] %v12293_v50  ;;  %v1701_v55 = vsel %vm12301_vm12, %v12300_v8, %v1699_v58  ;;  %v1540_v61 = vmax.f32 %v6814_v23, %v1539_v45  ;;  %v1571_v34 = vmax.f32 %v8051_v38, %v1508_v40  ;;  %v12302_v31 = vrot.slane %v6814_v23, 7  ;;  %v12308_v8 = vld [vmem:[#allocation63_spill] sm:$0xff]  ;;  %v12408_v38 = vld [vmem:[#allocation12_spill] sm:$0xff] }
 0x1bf   : > { %v12304_v3 = vand.u32 15, %v7488_v28  ;;  %v12305_v1 = vmov 0  ;;  %v2134_v19 = vmax.f32 %v2037_v14, %v2102_v53  ;;  %v8233_v37 = vmax.f32 %v1942_v54, %v12308_v8 }
 0x1c0   : > { %v1732_v25 = vsel %vm12303_vm5, %v1699_v58, %v12302_v31  ;;  %v12310_v18 = vrot.slane %v7986_v2, 1  ;;  %vm12311_vm12 = vcmp.lt.s32.totalorder %v6580_v24, 7  ;;  %v12312_v40 = vrot.slane %v6814_v23, 1 }
 0x1c1   : > { %vm8228_vm4 = vcmp.ge.s32.totalorder %v12304_v3, 1  ;;  %12309 = vst [vmem:[#allocation63_spill] sm:$0xff] %v8233_v37  ;;  %vm12313_vm5 = vmmov %vm12311_vm12  ;;  %v12314_v28 = vand.u32 15, %v7497_v52  ;;  %v12315_v3 = vmov 0  ;;  %v1636_v53 = vsel %vm8090_vm11, %v1540_v61, %v6814_v23 }
 0x1c2   : > { %v12306_v1 = vsel %vm8228_vm4, 4294967295, %v12305_v1  ;;  %v8239_v63 = vsel %vm12311_vm12, %v12310_v18, %v1892_v4  ;;  %v1925_v31 = vsel %vm12313_vm5, %v1892_v4, %v12312_v40  ;;  %v1764_v58 = vmax.f32 %v1571_v34, %v1701_v55 }
 0x1c3   : > { %12307 = vst [vmem:[#allocation58_spill] sm:$0xff] %v12306_v1  ;;  %vm8247_vm8 = vcmp.ge.s32.totalorder %v12314_v28, 1  ;;  %v12318_v54 = vrot.slane %v7986_v2, 2  ;;  %vm12319_vm12 = vcmp.lt.s32.totalorder %v6580_v24, 6  ;;  %v12320_v8 = vrot.slane %v6814_v23, 2 }
 0x1c4   : > { %v12316_v3 = vsel %vm8247_vm8, 4294967295, %v12315_v3  ;;  %vm12321_vm5 = vmmov %vm12319_vm12  ;;  %v12322_v52 = vand.u32 15, %v7494_v20  ;;  %v12323_v18 = vmov 0  ;;  %v8272_v55 = vsel %vm8109_vm15, %v2134_v19, %v2037_v14 }
 0x1c5   : > { %12317 = vst [vmem:[#allocation98_spill] sm:$0xff] %v12316_v3  ;;  %v8258_v45 = vsel %vm12319_vm12, %v12318_v54, %v2085_v12  ;;  %v2118_v4 = vsel %vm12321_vm5, %v2085_v12, %v12320_v8  ;;  %12326 = vst [vmem:[#allocation100_spill] sm:$0xff] %v8272_v55  ;;  %v1733_v61 = vmax.f32 %v1636_v53, %v1732_v25  ;;  %v1487_v34 = vrot.slane %v8022_v35, 6 }
 0x1c6   : > { %vm8266_vm14 = vcmp.lt.s32.totalorder %v12322_v52, 15  ;;  %v1488_v40 = vrot.slane %v8056_v21, 6  ;;  %v1957_v28 = vmax.f32 %v1764_v58, %v1925_v31  ;;  %v1681_v23 = vrot.slane %v8056_v21, 7 }
 0x1c7   : > { %v12324_v18 = vsel %vm8266_vm14, 4294967295, %v12323_v18  ;;  %v12327_v12 = vrot.slane %v8022_v35, 7  ;;  %v12328_v54 = vrot.slane %v7636_v11, 7  ;;  %vm12329_vm12 = vcmp.lt.s32.totalorder %v6580_v24, 1 }
 0x1c8   : > { %12325 = vst [vmem:[#allocation99_spill] sm:$0xff] %v12324_v18  ;;  %v1874_v52 = vrot.slane %v8056_v21, 1  ;;  %v1829_v14 = vsel %vm8143_vm0, %v1733_v61, %v1636_v53  ;;  %v12330_v25 = vand.u32 15, %v7494_v20  ;;  %v12331_v19 = vmov 0  ;;  %v12339_v53 = vld [vmem:[#allocation53_spill] sm:$0xff]  ;;  %v12572_v15 = vld [vmem:[#allocation63_spill] sm:$0xff] }
 0x1c9   : > { %v1720_v8 = vsel %vm12329_vm12, %v12328_v54, %v12327_v12  ;;  %v12334_v31 = vrot.slane %v7978_v13, 6  ;;  %vm12335_vm15 = vcmp.lt.s32.totalorder %v6580_v24, 2  ;;  %v12337_v12 = vrot.slane %v7636_v11, 6 }
 0x1ca   : > { %vm8288_vm5 = vcmp.lt.s32.totalorder %v12330_v25, 14  ;;  %vm12336_vm6 = vmmov %vm12335_vm15  ;;  %v1926_v61 = vmax.f32 %v1829_v14, %v12339_v53  ;;  %v2053_v20 = vsel %vm8163_vm1, %v1957_v28, %v1764_v58  ;;  %v12340_v55 = vrot.slane %v7978_v13, 7 }
 0x1cb   : > { %v12332_v19 = vsel %vm8288_vm5, 4294967295, %v12331_v19  ;;  %v1525_v33 = vsel %vm12335_vm15, %v1488_v40, %v12334_v31  ;;  %v1526_v10 = vsel %vm12336_vm6, %v1487_v34, %v1488_v40  ;;  %vm12338_vm12 = vmmov %vm12336_vm6  ;;  %v2150_v37 = vmax.f32 %v2053_v20, %v2118_v4 }
 0x1cc   : > { %12333 = vst [vmem:[#allocation101_spill] sm:$0xff] %v12332_v19  ;;  %v1527_v54 = vsel %vm12338_vm12, %v12337_v12, %v1487_v34  ;;  %v1553_v26 = vmax.f32 %v8056_v21, %v1526_v10  ;;  %v1554_v31 = vmax.f32 %v7978_v13, %v1525_v33  ;;  %vm12341_vm6 = vcmp.lt.s32.totalorder %v6580_v24, 1  ;;  %v12348_v10 = vld [vmem:[#allocation54_spill] sm:$0xff] }
 0x1cd   : > { %v1552_v25 = vmax.f32 %v8022_v35, %v1527_v54  ;;  %v1718_v40 = vsel %vm12341_vm6, %v1681_v23, %v12340_v55  ;;  %v12342_v22 = vrot.slane %v8022_v35, 7  ;;  %vm12343_vm15 = vmmov %vm12341_vm6  ;;  %v12344_v14 = vand.u32 15, %v7504_v44 }
 0x1ce   : > { %v12345_v58 = vmov 0  ;;  %v8323_v4 = vmax.f32 %v1926_v61, %v12348_v10  ;;  %v12349_v55 = vrot.slane %v7978_v13, 1  ;;  %vm12350_vm6 = vcmp.lt.s32.totalorder %v6580_v24, 7  ;;  %v12364_v10 = vld [vmem:[#allocation24_spill] sm:$0xff] }
 0x1cf   : > { %v1719_v34 = vsel %vm12343_vm15, %v12342_v22, %v1681_v23  ;;  %vm8318_vm12 = vcmp.ge.s32.totalorder %v12344_v14, 2  ;;  %v1648_v33 = vsel %vm8182_vm3, %v1552_v25, %v8022_v35  ;;  %v12351_v22 = vld [vmem:[#allocation27_spill] sm:$0xff]  ;;  %v12353_v54 = vmov 0  ;;  %vm12357_vm1 = vmmov %vm12350_vm6  ;;  %v12358_v14 = vld [vmem:[#allocation76_spill] sm:$0xff] }
 0x1d0   : > { %v12346_v58 = vsel %vm8318_vm12, 4294967295, %v12345_v58  ;;  %v1746_v28 = vmax.f32 %v1553_v26, %v1719_v34  ;;  %v1911_v12 = vsel %vm12350_vm6, %v1874_v52, %v12349_v55  ;;  %v12352_v23 = vand.u32 15, %v12351_v22 }
 0x1d1   : > { %12347 = vst [vmem:[#allocation53_spill] sm:$0xff] %v12346_v58  ;;  %v8340_v53 = vsel %vm8194_vm10, %v2150_v37, %v2053_v20  ;;  %v1650_v61 = vsel %vm8201_vm7, %v1554_v31, %v7978_v13  ;;  %v1745_v26 = vmax.f32 %v1648_v33, %v1720_v8  ;;  %v12356_v25 = vrot.slane %v8022_v35, 1 }
 0x1d2   : > { %vm8334_vm15 = vcmp.ge.s32.totalorder %v12352_v23, 2  ;;  %v12359_v23 = vld [vmem:[#allocation55_spill] sm:$0xff]  ;;  %v1747_v20 = vmax.f32 %v1650_v61, %v1718_v40  ;;  %v12360_v56 = vand.u32 15, %v7504_v44  ;;  %v12361_v31 = vmov 0 }
 0x1d3   : > { %v12354_v54 = vsel %vm8334_vm15, 4294967295, %v12353_v54  ;;  %v1912_v34 = vsel %vm12357_vm1, %v12356_v25, %v1874_v52  ;;  %v2377_v37 = vmax.f32 %v12359_v23, %v8323_v4  ;;  %v1841_v8 = vsel %vm8228_vm4, %v1745_v26, %v1648_v33  ;;  %v12370_v33 = vld [vmem:[#allocation5_spill] sm:$0xff] }
 0x1d4   : > { %12355 = vst [vmem:[#allocation54_spill] sm:$0xff] %v12354_v54  ;;  %vm8357_vm6 = vcmp.ge.s32.totalorder %v12360_v56, 1  ;;  %v1939_v52 = vmax.f32 %v1746_v28, %v1911_v12  ;;  %v2067_v25 = vrot.slane %v8056_v21, 2  ;;  %v8366_v50 = vmul.f32 %v12365_v30, %v12364_v10 }
 0x1d5   : > { %v12362_v31 = vsel %vm8357_vm6, 4294967295, %v12361_v31  ;;  %v12366_v55 = vand.u32 15, %v12351_v22  ;;  %v12367_v40 = vmov 0  ;;  %v2505_v44 = vmax.f32 %v2377_v37, %v12358_v14 }
 0x1d6   : > { %12363 = vst [vmem:[#allocation27_spill] sm:$0xff] %v12362_v31  ;;  %v1843_v56 = vsel %vm8247_vm8, %v1747_v20, %v1650_v61  ;;  %v1938_v1 = vmax.f32 %v1841_v8, %v1912_v34  ;;  %v12371_v12 = vand.u32 15, %v12370_v33  ;;  %v12372_v26 = vmov 0  ;;  %v12379_v20 = vld [vmem:[#allocation78_spill] sm:$0xff] }
 0x1d7   : > { %vm8370_vm1 = vcmp.ge.s32.totalorder %v12366_v55, 1  ;;  %v1503_v30 = vrot.slane %v8026_v9, 6  ;;  %v1940_v22 = vmax.f32 %v1843_v56, %v8159_v51  ;;  %v2035_v10 = vsel %vm8266_vm14, %v1939_v52, %v1746_v28 }
 0x1d8   : > { %v12368_v40 = vsel %vm8370_vm1, 4294967295, %v12367_v40  ;;  %vm8379_vm10 = vcmp.lt.s32.totalorder %v12371_v12, 15  ;;  %v12375_v55 = vrot.slane %v7978_v13, 2  ;;  %vm12376_vm7 = vcmp.lt.s32.totalorder %v6580_v24, 6 }
 0x1d9   : > { %12369 = vst [vmem:[#allocation76_spill] sm:$0xff] %v12368_v40  ;;  %v12373_v26 = vsel %vm8379_vm10, 4294967295, %v12372_v26  ;;  %v12377_v61 = vrot.slane %v8022_v35, 2  ;;  %vm12378_vm8 = vmmov %vm12376_vm7  ;;  %v8396_v8 = vmax.f32 %v2505_v44, %v12379_v20  ;;  %v1504_v51 = vrot.slane %v8366_v50, 6  ;;  %v12450_v40 = vld [vmem:[#allocation56_spill] sm:$0xff] }
 0x1da   : > { %12374 = vst [vmem:[#allocation55_spill] sm:$0xff] %v12373_v26  ;;  %v2104_v37 = vsel %vm12376_vm7, %v2067_v25, %v12375_v55  ;;  %v8402_v28 = vmax.f32 %v1940_v22, %v8175_v5  ;;  %v12382_v52 = vand.u32 15, %v12370_v33  ;;  %v12383_v56 = vmov 0 }
 0x1db   : > { %v2105_v34 = vsel %vm12378_vm8, %v12377_v61, %v2067_v25  ;;  %v2132_v3 = vmax.f32 %v2035_v10, %v2104_v37  ;;  %v12386_v55 = vrot.slane %v7642_v47, 6  ;;  %vm12387_vm8 = vcmp.lt.s32.totalorder %v6580_v24, 2 }
 0x1dc   : > { %v8398_v12 = vmax.f32 %v1938_v1, %v2105_v34  ;;  %12381 = vst [vmem:[#allocation21_spill] sm:$0xff] %v8402_v28  ;;  %vm8406_vm14 = vcmp.lt.s32.totalorder %v12382_v52, 14  ;;  %v1697_v1 = vrot.slane %v8366_v50, 7  ;;  %v12388_v44 = vrot.slane %v8026_v9, 7  ;;  %vm12393_vm4 = vmmov %vm12387_vm8 }
 0x1dd   : > { %v12384_v56 = vsel %vm8406_vm14, 4294967295, %v12383_v56  ;;  %v1511_v25 = vsel %vm12387_vm8, %v12386_v55, %v1503_v30  ;;  %v12389_v37 = vrot.slane %v7642_v47, 7  ;;  %vm12390_vm7 = vcmp.lt.s32.totalorder %v6580_v24, 1  ;;  %vm12394_vm8 = vmmov %vm12393_vm4 }
 0x1de   : > { %12380 = vst [vmem:[#allocation24_spill] sm:$0xff] %v8398_v12  ;;  %12385 = vst [vmem:[#allocation5_spill] sm:$0xff] %v12384_v56  ;;  %v8423_v33 = vsel %vm8288_vm5, %v2132_v3, %v2035_v10  ;;  %v12392_v22 = vrot.slane %v7986_v2, 6  ;;  %v1510_v34 = vsel %vm12394_vm8, %v1503_v30, %v1504_v51  ;;  %v1568_v52 = vmax.f32 %v8026_v9, %v1511_v25 }
 0x1df   : > { %v1704_v5 = vsel %vm12390_vm7, %v12389_v37, %v12388_v44  ;;  %12391 = vst [vmem:[#allocation78_spill] sm:$0xff] %v8423_v33  ;;  %v1569_v55 = vmax.f32 %v8366_v50, %v1510_v34  ;;  %v12395_v44 = vrot.slane %v7986_v2, 7  ;;  %v12396_v10 = vrot.slane %v8026_v9, 7  ;;  %vm12397_vm5 = vmmov %vm12390_vm7 }
 0x1e0   : > { %v1509_v61 = vsel %vm12393_vm4, %v1504_v51, %v12392_v22  ;;  %v1664_v30 = vsel %vm8318_vm12, %v1568_v52, %v8026_v9  ;;  %v1890_v51 = vrot.slane %v8366_v50, 1  ;;  %v2083_v25 = vrot.slane %v8366_v50, 2  ;;  %v12398_v22 = vld [vmem:[#allocation23_spill] sm:$0xff] }
 0x1e1   : > { %v1570_v18 = vmax.f32 %v7986_v2, %v1509_v61  ;;  %v1702_v3 = vsel %vm12390_vm7, %v1697_v1, %v12395_v44  ;;  %v1703_v37 = vsel %vm12397_vm5, %v12396_v10, %v1697_v1  ;;  %v2273_v61 = vmax.f32 %v8017_v36, %v12398_v22 }
 0x1e2   : > { %v1761_v44 = vmax.f32 %v1664_v30, %v1704_v5  ;;  %v1762_v19 = vmax.f32 %v1569_v55, %v1703_v37  ;;  %v2274_v1 = vmax.f32 %v8188_v59, %v12399_v42  ;;  %v12400_v28 = vrot.slane %v7986_v2, 1 }
 0x1e3   : > { %v1666_v34 = vsel %vm8334_vm15, %v1570_v18, %v7986_v2  ;;  %vm12401_vm4 = vcmp.lt.s32.totalorder %v6580_v24, 7  ;;  %v12402_v33 = vrot.slane %v8026_v9, 1  ;;  %v12404_v12 = vrot.slane %v7986_v2, 2  ;;  %v12409_v2 = vld [vmem:[#allocation65_spill] sm:$0xff] }
 0x1e4   : > { %v1763_v10 = vmax.f32 %v1666_v34, %v1702_v3  ;;  %v1895_v52 = vsel %vm12401_vm4, %v1890_v51, %v12400_v28  ;;  %vm12403_vm5 = vmmov %vm12401_vm4  ;;  %vm12405_vm8 = vcmp.lt.s32.totalorder %v6580_v24, 6  ;;  %v1857_v5 = vsel %vm8357_vm6, %v1761_v44, %v1664_v30  ;;  %v12410_v44 = vld [vmem:[#allocation41_spill] sm:$0xff] }
 0x1e5   : > { %v1896_v22 = vsel %vm12403_vm5, %v12402_v33, %v1890_v51  ;;  %v2088_v18 = vsel %vm12405_vm8, %v2083_v25, %v12404_v12  ;;  %v1955_v55 = vmax.f32 %v1762_v19, %v1895_v52  ;;  %v12406_v3 = vrot.slane %v8026_v9, 2  ;;  %vm12407_vm7 = vmmov %vm12405_vm8 }
 0x1e6   : > { %v2401_v28 = vmax.f32 %v2273_v61, %v8014_v43  ;;  %v1859_v42 = vsel %vm8370_vm1, %v1763_v10, %v1666_v34  ;;  %v1954_v33 = vmax.f32 %v1857_v5, %v1896_v22  ;;  %v2402_v51 = vmax.f32 %v2274_v1, %v8047_v48 }
 0x1e7   : > { %v2089_v37 = vsel %vm12407_vm7, %v12406_v3, %v2083_v25  ;;  %v1462_v12 = vpack.c.bf16 %v12409_v2, %v12408_v38  ;;  %v1956_v17 = vmax.f32 %v1859_v42, %v8239_v63  ;;  %v2051_v30 = vsel %vm8379_vm10, %v1955_v55, %v1762_v19  ;;  %v12414_v42 = vld [vmem:[#allocation43_spill] sm:$0xff] }
 0x1e8   : > { %v1463_v52 = vpack.c.bf16 %v7636_v11, %v12410_v44  ;;  %v1464_v25 = vpack.c.bf16 %v8056_v21, %v8022_v35  ;;  %v8485_v61 = vmax.f32 %v1954_v33, %v2089_v37  ;;  %v2148_v34 = vmax.f32 %v2051_v30, %v2088_v18  ;;  %v12430_v37 = vld [vmem:[#allocation49_spill] sm:$0xff] }
 0x1e9   : > { %vm12412_vm4 = vcmask 64512   ;;  %v1465_v22 = vpack.c.bf16 %v8036_v41, %v7978_v13  ;;  %v2503_v2 = vmax.f32 %v8323_v4, %v12359_v23  ;;  %v2149_v38 = vmax.f32 %v1956_v17, %v8258_v45 }
 0x1ea   : > { %12411 = vst [vmem:[#allocation12_spill] sm:$0xff] %v8485_v61  ;;  %5972 = vmatprep.mubr.msk.bf16.mxu0 %vm12412_vm4, %v1462_v12  ;;  %vm12413_vm5 = vmmov %vm12412_vm4  ;;  %v8499_v21 = vsel %vm8406_vm14, %v2148_v34, %v2051_v30  ;;  %v2275_v13 = vmax.f32 %v8485_v61, %v8014_v43  ;;  %v2529_v41 = vmax.f32 %v2401_v28, %v8485_v61 }
 0x1eb   : > { %5973 = vmatmul.mubr.msk.bf16.gmra.mxu0 %vm12413_vm5, %v1463_v52  ;;  %12415 = vst [vmem:[#allocation65_spill] sm:$0xff] %v8499_v21  ;;  %vm12416_vm8 = vmmov %vm12412_vm4  ;;  %v8506_v17 = vmax.f32 %v2503_v2, %v12358_v14  ;;  %v2276_v45 = vmax.f32 %v8499_v21, %v8047_v48  ;;  %v2277_v19 = vmax.f32 %v2149_v38, %v8017_v36 }
 0x1ec   : > { %5976 = vmatprep.mubr.msk.bf16.mxu0 %vm12416_vm8, %v1464_v25  ;;  %v12417_v1 = vmax.f32 %v8340_v53, %v8188_v59  ;;  %v2530_v18 = vmax.f32 %v2402_v51, %v8499_v21  ;;  %v2403_v5 = vmax.f32 %v2275_v13, %v8017_v36  ;;  %v8519_v55 = vmax.f32 %v2529_v41, %v2149_v38  ;;  %vm12423_vm7 = vmmov %vm12412_vm4 }
 0x1ed   : > { %v2759_v3 = vpack.c.bf16 %v12414_v42, %v8506_v17  ;;  %v2404_v28 = vmax.f32 %v2276_v45, %v8188_v59  ;;  %v8526_v33 = vmax.f32 %v2277_v19, %v8485_v61  ;;  %vm12425_vm4 = vcmp.lt.s32.totalorder %v6580_v24, 2  ;;  %vm12427_vm8 = vmmov %vm12423_vm7 }
 0x1ee   : > { %v8515_v10 = vmax.f32 %v12417_v1, %v8499_v21  ;;  %12419 = vst [vmem:[#allocation43_spill] sm:$0xff] %v8519_v55  ;;  %v8529_v12 = vmax.f32 %v2530_v18, %v8340_v53  ;;  %v8532_v51 = vmax.f32 %v2403_v5, %v2149_v38  ;;  %v11669_v44 = vrot.slane %v8519_v55, 6  ;;  %vm12426_vm5 = vmmov %vm12425_vm4 }
 0x1ef   : > { %12420 = vst [vmem:[#allocation102_spill] sm:$0xff] %v8526_v33  ;;  %v11671_v52 = vrot.slane %v8519_v55, 7  ;;  %5930 = vmatprep.mubr.msk.bf16.mxu1 %vm12423_vm7, %v2759_v3  ;;  %v8539_v34 = vmax.f32 %v2404_v28, %v8340_v53  ;;  %v3232_v13 = vrot.slane %v8526_v33, 6  ;;  %v3360_v19 = vrot.slane %v8526_v33, 7  ;;  %vm12428_vm7 = vmmov %vm12425_vm4 }
 0x1f0   : > { %12418 = vst [vmem:[#allocation41_spill] sm:$0xff] %v8515_v10  ;;  %12421 = vst [vmem:[#allocation103_spill] sm:$0xff] %v8529_v12  ;;  %v11666_v30 = vrot.slane %v8515_v10, 6  ;;  %v11670_v25 = vrot.slane %v8515_v10, 7  ;;  %v3229_v2 = vrot.slane %v8529_v12, 6  ;;  %v3357_v41 = vrot.slane %v8529_v12, 7 }
 0x1f1   : > { %12422 = vst [vmem:[#allocation104_spill] sm:$0xff] %v8532_v51  ;;  %12424 = vst [vmem:[#allocation105_spill] sm:$0xff] %v8539_v34  ;;  %v3230_v38 = vrot.slane %v8532_v51, 6  ;;  %v3358_v45 = vrot.slane %v8532_v51, 7  ;;  %v3231_v18 = vrot.slane %v8539_v34, 6  ;;  %v3359_v3 = vrot.slane %v8539_v34, 7 }
 0x1f2   : > { %v3234_v53 = vsel %vm12425_vm4, %v3232_v13, %v11666_v30  ;;  %v3238_v5 = vsel %vm12426_vm5, %v11669_v44, %v3229_v2  ;;  %vm12429_vm4 = vcmp.lt.s32.totalorder %v6580_v24, 1  ;;  %v12431_v11 = vpack.c.bf16 %v12430_v37, %v6832_v32  ;;  %vm12432_vm5 = vmmov %vm12427_vm8 }
 0x1f3   : > { %5977 = vmatmul.mubr.msk.bf16.gmra.mxu0 %vm12427_vm8, %v1465_v22  ;;  %v3237_v28 = vsel %vm12428_vm7, %v3229_v2, %v3230_v38  ;;  %v3293_v63 = vmax.f32 %v8529_v12, %v3238_v5  ;;  %v3297_v35 = vmax.f32 %v8515_v10, %v3234_v53  ;;  %v3362_v30 = vsel %vm12429_vm4, %v3360_v19, %v11670_v25  ;;  %vm12433_vm3 = vmmov %vm12428_vm7 }
 0x1f4   : > { %5980 = vmatprep.mubr.msk.bf16.mxu0 %vm12432_vm5, %v12431_v11  ;;  %v3235_v22 = vsel %vm12433_vm3, %v3231_v18, %v3232_v13  ;;  %vm12434_vm8 = vmmov %vm12433_vm3  ;;  %v3294_v5 = vmax.f32 %v8532_v51, %v3237_v28  ;;  %v3364_v32 = vsel %vm12429_vm4, %v3358_v45, %v3359_v3  ;;  %v3488_v1 = vrot.slane %v8526_v33, 1 }
 0x1f5   : > { %v3236_v2 = vsel %vm12434_vm8, %v3230_v38, %v3231_v18  ;;  %vm12435_vm7 = vmmov %vm12429_vm4  ;;  %v3296_v25 = vmax.f32 %v8526_v33, %v3235_v22  ;;  %v8591_v38 = vmax.f32 %v3297_v35, %v3362_v30  ;;  %v3489_v30 = vrot.slane %v8515_v10, 1 }
 0x1f6   : > { %v3363_v53 = vsel %vm12435_vm7, %v3359_v3, %v3360_v19  ;;  %v3295_v44 = vmax.f32 %v8539_v34, %v3236_v2  ;;  %vm12436_vm5 = vmmov %vm12429_vm4  ;;  %v3326_v37 = vsel %vm8318_vm12, %v3294_v5, %v8532_v51  ;;  %v3485_v19 = vrot.slane %v8529_v12, 1 }
 0x1f7   : > { %v3365_v11 = vsel %vm12436_vm5, %v3357_v41, %v3358_v45  ;;  %vm12437_vm3 = vmmov %vm12429_vm4  ;;  %v3328_v18 = vsel %vm8334_vm15, %v3296_v25, %v8526_v33  ;;  %v3486_v2 = vrot.slane %v8532_v51, 1  ;;  %v3487_v5 = vrot.slane %v8539_v34, 1 }
 0x1f8   : > { %v3366_v13 = vsel %vm12437_vm3, %v11671_v52, %v3357_v41  ;;  %v3422_v28 = vmax.f32 %v3326_v37, %v3365_v11  ;;  %v3423_v45 = vmax.f32 %v3295_v44, %v3364_v32  ;;  %v3424_v22 = vmax.f32 %v3328_v18, %v3363_v53 }
 0x1f9   : > { %v3421_v3 = vmax.f32 %v3293_v63, %v3366_v13  ;;  %v12438_v41 = vrot.slane %v8519_v55, 1  ;;  %vm12439_vm8 = vcmp.lt.s32.totalorder %v6580_v24, 7  ;;  %v12445_v13 = vld [vmem:[#allocation39_spill] sm:$0xff]  ;;  %vm12447_vm3 = vcmask 64512  }
 0x1fa   : > { %v3454_v35 = vsel %vm8357_vm6, %v3422_v28, %v3326_v37  ;;  %v3456_v44 = vsel %vm8370_vm1, %v3424_v22, %v3328_v18  ;;  %vm12441_vm7 = vmmov %vm12439_vm8  ;;  %v12444_v37 = vld [vmem:[#allocation46_spill] sm:$0xff]  ;;  %v12449_v22 = vld [vmem:[#allocation72_spill] sm:$0xff]  ;;  %v3614_v31 = vrot.slane %v8532_v51, 2  ;;  %v11677_v56 = vrot.slane %v8506_v17, 2 }
 0x1fb   : > { %v8607_v25 = vsel %vm12439_vm8, %v12438_v41, %v3485_v19  ;;  %v3491_v53 = vsel %vm12441_vm7, %v3487_v5, %v3488_v1  ;;  %vm12442_vm4 = vmmov %vm12441_vm7  ;;  %v12446_v28 = vpack.c.bf16 %v12444_v37, %v12445_v13  ;;  %v12451_v54 = vpack.c.bf16 %v12449_v22, %v12450_v40 }
 0x1fc   : > { %12440 = vst [vmem:[#allocation49_spill] sm:$0xff] %v8607_v25  ;;  %v3492_v32 = vsel %vm12442_vm4, %v3486_v2, %v3487_v5  ;;  %vm12443_vm5 = vmmov %vm12442_vm4  ;;  %v3551_v18 = vmax.f32 %v3423_v45, %v3491_v53  ;;  %v12453_v53 = vrot.slane %v8396_v8, 6  ;;  %v12454_v40 = vrot.slane %v12414_v42, 6 }
 0x1fd   : > { %v3493_v11 = vsel %vm12443_vm5, %v3485_v19, %v3486_v2  ;;  %5981 = vmatmul.mubr.msk.bf16.gmra.mxu0 %vm12447_vm3, %v12446_v28  ;;  %vm12448_vm8 = vmmov %vm12442_vm4  ;;  %v3550_v63 = vmax.f32 %v3454_v35, %v3492_v32  ;;  %v3615_v19 = vrot.slane %v8539_v34, 2  ;;  %v3616_v2 = vrot.slane %v8526_v33, 2  ;;  %v12533_v34 = vld [vmem:[#allocation78_spill] sm:$0xff] }
 0x1fe   : > { %v3490_v41 = vsel %vm12448_vm8, %v3488_v1, %v3489_v30  ;;  %v3549_v52 = vmax.f32 %v3421_v3, %v3493_v11  ;;  %vm12452_vm7 = vmmov %vm12447_vm3  ;;  %v3583_v1 = vsel %vm8379_vm10, %v3551_v18, %v3423_v45  ;;  %v11675_v35 = vrot.slane %v8515_v10, 2 }
 0x1ff   : > { %5984 = vmatprep.mubr.msk.bf16.mxu0 %vm12452_vm7, %v12451_v54  ;;  %v3552_v5 = vmax.f32 %v3456_v44, %v3490_v41  ;;  %vm12455_vm4 = vcmp.lt.s32.totalorder %v6580_v24, 2  ;;  %vm12456_vm5 = vcmp.lt.s32.totalorder %v6580_v24, 6  ;;  %v12460_v45 = vmov %v12454_v40 }
 0x200   : > { %v3581_v37 = vsel %vm7999_vm13, %v3549_v52, %v3421_v3  ;;  %v3263_v54 = vsel %vm12455_vm4, %v12454_v40, %v12453_v53  ;;  %v3619_v44 = vsel %vm12456_vm5, %v3615_v19, %v3616_v2  ;;  %vm12457_vm3 = vmmov %vm12456_vm5  ;;  %v12458_v52 = vrot.slane %v8529_v12, 2 }
 0x201   : > { %v3620_v32 = vsel %vm12457_vm3, %v3614_v31, %v3615_v19  ;;  %vm12459_vm8 = vmmov %vm12457_vm3  ;;  %v12461_v11 = vrot.slane %v8506_v17, 6  ;;  %v3679_v22 = vmax.f32 %v3583_v1, %v3619_v44  ;;  %v12467_v53 = vrot.slane %v8515_v10, 6 }
 0x202   : > { %v3621_v3 = vsel %vm12459_vm8, %v12458_v52, %v3614_v31  ;;  %vm12462_vm7 = vmmov %vm12455_vm4  ;;  %v8660_v18 = vmax.f32 %v3550_v63, %v3620_v32  ;;  %v3330_v44 = vrot.slane %v8506_v17, 7  ;;  %vm12477_vm8 = vcmask 64512  }
 0x203   : > { %v3264_v13 = vsel %vm12462_vm7, %v12461_v11, %v12460_v45  ;;  %vm12463_vm4 = vmmov %vm12457_vm3  ;;  %v3677_v41 = vmax.f32 %v3581_v37, %v3621_v3  ;;  %v12466_v31 = vmov %v12461_v11  ;;  %v3268_v45 = vmax.f32 %v8396_v8, %v3263_v54 }
 0x204   : > { %v3618_v28 = vsel %vm12463_vm4, %v3616_v2, %v11675_v35  ;;  %12464 = vst [vmem:[#allocation46_spill] sm:$0xff] %v8660_v18  ;;  %vm12468_vm5 = vmmov %vm12462_vm7  ;;  %v3267_v52 = vmax.f32 %v12414_v42, %v3264_v13  ;;  %v8678_v63 = vsel %vm8406_vm14, %v3679_v22, %v3583_v1  ;;  %v12472_v11 = vrot.slane %v8396_v8, 7 }
 0x205   : > { %v8662_v19 = vmax.f32 %v3552_v5, %v3618_v28  ;;  %v3265_v40 = vsel %vm12468_vm5, %v12467_v53, %v12466_v31  ;;  %v8674_v2 = vsel %vm8030_vm9, %v3677_v41, %v3581_v37  ;;  %12470 = vst [vmem:[#allocation56_spill] sm:$0xff] %v8678_v63  ;;  %v3300_v3 = vsel %vm6795_vm2, %v3268_v45, %v8396_v8  ;;  %v12475_v28 = vld [vmem:[#allocation60_spill] sm:$0xff] }
 0x206   : > { %12469 = vst [vmem:[#allocation72_spill] sm:$0xff] %v8674_v2  ;;  %v3266_v5 = vmax.f32 %v8506_v17, %v3265_v40  ;;  %v12473_v54 = vrot.slane %v12414_v42, 7  ;;  %vm12474_vm3 = vcmp.lt.s32.totalorder %v6580_v24, 1  ;;  %v3458_v13 = vrot.slane %v8506_v17, 1 }
 0x207   : > { %12465 = vst [vmem:[#allocation39_spill] sm:$0xff] %v8662_v19  ;;  %v3459_v1 = vrot.slane %v12414_v42, 1  ;;  %v12476_v41 = vpack.c.bf16 %v7313_v39, %v12475_v28  ;;  %vm12479_vm7 = vmmov %vm12474_vm3  ;;  %v12480_v40 = vrot.slane %v8515_v10, 7  ;;  %v3460_v39 = vrot.slane %v8396_v8, 1 }
 0x208   : > { %v3391_v37 = vsel %vm12474_vm3, %v12473_v54, %v12472_v11  ;;  %v3298_v22 = vsel %vm8090_vm11, %v3266_v5, %v8506_v17  ;;  %v12478_v31 = vmov %v12473_v54  ;;  %vm12481_vm4 = vmmov %vm12474_vm3  ;;  %vm12482_vm5 = vcmp.lt.s32.totalorder %v6580_v24, 7  ;;  %v12483_v5 = vld [vmem:[#allocation45_spill] sm:$0xff] }
 0x209   : > { %5985 = vmatmul.mubr.msk.bf16.gmra.mxu0 %vm12477_vm8, %v12476_v41  ;;  %v3392_v53 = vsel %vm12479_vm7, %v3330_v44, %v12478_v31  ;;  %v3393_v45 = vsel %vm12481_vm4, %v12480_v40, %v3330_v44  ;;  %v3396_v11 = vmax.f32 %v3300_v3, %v3391_v37  ;;  %v3520_v28 = vsel %vm12482_vm5, %v3458_v13, %v3459_v1  ;;  %vm12485_vm8 = vmmov %vm12482_vm5  ;;  %v12488_v40 = vld [vmem:[#allocation42_spill] sm:$0xff] }
 0x20a   : > { %v3394_v54 = vmax.f32 %v3298_v22, %v3393_v45  ;;  %v8708_v35 = vmax.f32 %v3267_v52, %v3392_v53  ;;  %vm12484_vm3 = vnez %v12483_v5  ;;  %v8719_v31 = vsel %vm12485_vm8, %v3489_v30, %v3458_v13  ;;  %vm12486_vm7 = vmmov %vm12482_vm5  ;;  %v12487_v53 = vld [vmem:[#allocation20_spill] sm:$0xff] }
 0x20b   : > { %v8715_v41 = vsel %vm12484_vm3, %v3396_v11, %v3300_v3  ;;  %v11678_v44 = vrot.slane %v12414_v42, 2  ;;  %v8727_v37 = vsel %vm12486_vm7, %v3459_v1, %v3460_v39  ;;  %v8731_v45 = vmax.f32 %v12488_v40, %v12487_v53 }
 0x20c   : > { %v3426_v52 = vsel %vm8143_vm0, %v3394_v54, %v3298_v22  ;;  %v1470_v3 = vpack.c.bf16 %v7892_v29, %v7630_v60  ;;  %vm12489_vm4 = vcmp.lt.s32.totalorder %v6580_v24, 6  ;;  %v12490_v1 = vmax.f32 %v12358_v14, %v8323_v4  ;;  %v12492_v4 = vld [vmem:[#allocation57_spill] sm:$0xff] }
 0x20d   : > { %v3522_v30 = vmax.f32 %v3426_v52, %v3520_v28  ;;  %v3648_v22 = vsel %vm12489_vm4, %v11677_v56, %v11678_v44  ;;  %v2760_v54 = vpack.c.bf16 %v8731_v45, %v8396_v8  ;;  %v3205_v60 = vrot.slane %v8731_v45, 6 }
 0x20e   : > { %v2379_v11 = vmax.f32 %v12490_v1, %v12359_v23  ;;  %v11684_v29 = vrot.slane %v8731_v45, 7  ;;  %v11679_v28 = vrot.slane %v8731_v45, 1  ;;  %vm12491_vm5 = vcmask 64512  }
 0x20f   : > { %5988 = vmatprep.mubr.msk.bf16.mxu0 %vm12491_vm5, %v1470_v3  ;;  %v8753_v52 = vmax.f32 %v3522_v30, %v3648_v22  ;;  %v2508_v1 = vmax.f32 %v12492_v4, %v12487_v53  ;;  %vm12493_vm8 = vmmov %vm12491_vm5  ;;  %v12494_v44 = vrot.slane %v8396_v8, 6  ;;  %vm12495_vm7 = vcmp.lt.s32.totalorder %v6580_v24, 2 }
 0x210   : > { %v2507_v56 = vmax.f32 %v2379_v11, %v12379_v20  ;;  %5931 = vmatmul.mubr.msk.bf16.vlgmr.msra.gmra.mxu1 %vm12493_vm8, %v2760_v54  ;;  %vm12496_vm4 = vcmp.lt.s32.totalorder %v6580_v24, 7  ;;  %v12497_v30 = vand.u32 15, %v12213_v7  ;;  %v12498_v22 = vmov 0 }
 0x211   : > { %v8764_v13 = vsel %vm12495_vm7, %v12494_v44, %v3205_v60  ;;  %v8770_v3 = vsel %vm12496_vm4, %v3460_v39, %v11679_v28  ;;  %v2253_v11 = vmax.f32 %v12379_v20, %v12359_v23  ;;  %v12501_v44 = vld [vmem:[#allocation40_spill] sm:$0xff]  ;;  %v8787_v39 = vmax.f32 %v2508_v1, %v7948_v49  ;;  %v12503_v23 = vld [vmem:[#allocation37_spill] sm:$0xff]  ;;  %vm12504_vm7 = vmmov %vm12493_vm8 }
 0x212   : > { %vm8774_vm5 = vcmp.lt.s32.totalorder %v12497_v30, 14  ;;  %5997 = vmatpush3.bf16.msra.mxu1 %v12501_v44  ;;  %v8784_v4 = vmax.f32 %v2507_v56, %v7936_v16  ;;  %v12502_v7 = vmax.f32 %v8130_v0, %v8084_v27  ;;  %v2254_v40 = vmax.f32 %v12487_v53, %v12503_v23 }
 0x213   : > { %v12499_v22 = vsel %vm8774_vm5, 4294967295, %v12498_v22  ;;  %v2381_v28 = vmax.f32 %v2253_v11, %v12358_v14  ;;  %v1471_v56 = vpack.c.bf16 %v7642_v47, %v7606_v57  ;;  %v2255_v1 = vmax.f32 %v7936_v16, %v12358_v14 }
 0x214   : > { %12500 = vst [vmem:[#allocation60_spill] sm:$0xff] %v12499_v22  ;;  %v8795_v30 = vsel %vm8774_vm5, %v12502_v7, %v8130_v0  ;;  %v2761_v44 = vpack.c.bf16 %v8787_v39, %v8784_v4  ;;  %v3206_v27 = vrot.slane %v8784_v4, 6  ;;  %v3207_v54 = vrot.slane %v8787_v39, 6 }
 0x215   : > { %v3334_v0 = vrot.slane %v8784_v4, 7  ;;  %v3335_v7 = vrot.slane %v8787_v39, 7  ;;  %5989 = vmatmul.mubr.msk.bf16.gmra.mxu0 %vm12493_vm8, %v1471_v56  ;;  %vm12505_vm4 = vcmp.lt.s32.totalorder %v6580_v24, 2  ;;  %vm12507_vm14 = vcmp.lt.s32.totalorder %v6580_v24, 1 }
 0x216   : > { %5934 = vmatprep.mubr.msk.bf16.mxu1 %vm12504_vm7, %v2761_v44  ;;  %v3260_v47 = vsel %vm12505_vm4, %v3206_v27, %v3207_v54  ;;  %vm12506_vm1 = vmmov %vm12505_vm4  ;;  %v11690_v23 = vrot.slane %v8787_v39, 2  ;;  %v12509_v44 = vrot.slane %v8787_v39, 1  ;;  %v12510_v6 = vrot.slane %v8784_v4, 1 }
 0x217   : > { %v3261_v14 = vsel %vm12506_vm1, %v3205_v60, %v3206_v27  ;;  %v3389_v26 = vsel %vm12507_vm14, %v11684_v29, %v3334_v0  ;;  %v3271_v57 = vmax.f32 %v8787_v39, %v3260_v47  ;;  %vm12508_vm8 = vmmov %vm12507_vm14  ;;  %vm12511_vm1 = vcmp.lt.s32.totalorder %v6580_v24, 7 }
 0x218   : > { %v3270_v11 = vmax.f32 %v8784_v4, %v3261_v14  ;;  %v3388_v56 = vsel %vm12508_vm8, %v3334_v0, %v3335_v7  ;;  %v3516_v60 = vsel %vm12511_vm1, %v12510_v6, %v12509_v44  ;;  %v12512_v27 = vrot.slane %v8784_v4, 2  ;;  %v12514_v14 = vld [vmem:[#allocation79_spill] sm:$0xff] }
 0x219   : > { %vm12513_vm14 = vcmp.lt.s32.totalorder %v6580_v24, 6  ;;  %v2382_v58 = vmax.f32 %v2254_v40, %v12514_v14  ;;  %v2509_v47 = vmax.f32 %v2381_v28, %v7936_v16  ;;  %v2256_v0 = vmax.f32 %v7948_v49, %v12514_v14  ;;  %v12517_v40 = vld [vmem:[#allocation87_spill] sm:$0xff] }
 0x21a   : > { %v3644_v29 = vsel %vm12513_vm14, %v12512_v27, %v11690_v23  ;;  %vm12516_vm7 = vnez %v12515_v46  ;;  %v8847_v18 = vmax.f32 %v3271_v57, %v3388_v56  ;;  %v2383_v6 = vmax.f32 %v2255_v1, %v12379_v20  ;;  %v12519_v57 = vld [vmem:[#allocation28_spill] sm:$0xff]  ;;  %v12573_v46 = vld [vmem:[#allocation82_spill] sm:$0xff] }
 0x21b   : > { %v3302_v19 = vsel %vm12516_vm7, %v3270_v11, %v8784_v4  ;;  %v1472_v44 = vpack.c.bf16 %v8366_v50, %v8026_v9  ;;  %v2510_v27 = vmax.f32 %v2382_v58, %v7948_v49  ;;  %v8854_v23 = vmax.f32 %v2509_v47, %v12517_v40  ;;  %v12520_v50 = vld [vmem:[#allocation35_spill] sm:$0xff] }
 0x21c   : > { %v3398_v33 = vmax.f32 %v3302_v19, %v3389_v26  ;;  %v2384_v28 = vmax.f32 %v2256_v0, %v12487_v53  ;;  %v2511_v14 = vmax.f32 %v2383_v6, %v12517_v40  ;;  %vm12518_vm4 = vcmask 64512   ;;  %v12521_v26 = vld [vmem:[#allocation62_spill] sm:$0xff] }
 0x21d   : > { %5992 = vmatprep.mubr.msk.bf16.mxu0 %vm12518_vm4, %v1472_v44  ;;  %v2257_v11 = vmax.f32 %v12517_v40, %v12379_v20  ;;  %v2258_v1 = vmax.f32 %v8795_v30, %v12487_v53  ;;  %v1473_v9 = vpack.c.bf16 %v12520_v50, %v12519_v57  ;;  %vm12522_vm8 = vnez %v12521_v26  ;;  %vm12523_vm1 = vmmov %vm12518_vm4  ;;  %v12528_v44 = vld [vmem:[#allocation24_spill] sm:$0xff] }
 0x21e   : > { %v3430_v58 = vsel %vm12522_vm8, %v3398_v33, %v3302_v19  ;;  %v8868_v56 = vmax.f32 %v2510_v27, %v8795_v30  ;;  %v3208_v47 = vrot.slane %v8854_v23, 6  ;;  %v3336_v0 = vrot.slane %v8854_v23, 7 }
 0x21f   : > { %v3526_v6 = vmax.f32 %v3430_v58, %v3516_v60  ;;  %v2512_v53 = vmax.f32 %v2384_v28, %v8795_v30  ;;  %5993 = vmatmul.mubr.msk.bf16.gmra.mxu0 %vm12523_vm1, %v1473_v9  ;;  %vm12524_vm14 = vcmp.lt.s32.totalorder %v6580_v24, 2  ;;  %vm12525_vm4 = vcmp.lt.s32.totalorder %v6580_v24, 1 }
 0x220   : > { %v2762_v57 = vpack.c.bf16 %v8868_v56, %v8854_v23  ;;  %v3209_v33 = vrot.slane %v8868_v56, 6  ;;  %v3259_v19 = vsel %vm12524_vm14, %v3207_v54, %v3208_v47  ;;  %v3337_v27 = vrot.slane %v8868_v56, 7  ;;  %vm12526_vm15 = vmmov %vm12524_vm14 }
 0x221   : > { %v8882_v50 = vmax.f32 %v3526_v6, %v3644_v29  ;;  %v3272_v60 = vmax.f32 %v8854_v23, %v3259_v19  ;;  %v3387_v58 = vsel %vm12525_vm4, %v3335_v7, %v3336_v0  ;;  %v11696_v28 = vrot.slane %v8868_v56, 1  ;;  %vm12527_vm10 = vmmov %vm12525_vm4  ;;  %v12529_v19 = vld [vmem:[#allocation61_spill] sm:$0xff] }
 0x222   : > { %5935 = vmatmul.mubr.msk.bf16.gmra.mxu1 %vm12523_vm1, %v2762_v57  ;;  %v3258_v9 = vsel %vm12526_vm15, %v3208_v47, %v3209_v33  ;;  %v3386_v20 = vsel %vm12527_vm10, %v3336_v0, %v3337_v27  ;;  %v8895_v29 = vmax.f32 %v2511_v14, %v12528_v44  ;;  %vm12530_vm14 = vnez %v12529_v19 }
 0x223   : > { %v3273_v6 = vmax.f32 %v8868_v56, %v3258_v9  ;;  %v3304_v7 = vsel %vm12530_vm14, %v3272_v60, %v8854_v23  ;;  %v12531_v57 = vrot.slane %v8854_v23, 1  ;;  %vm12532_vm15 = vcmp.lt.s32.totalorder %v6580_v24, 7 }
 0x224   : > { %v8908_v0 = vmax.f32 %v2512_v53, %v12533_v34  ;;  %v3400_v54 = vmax.f32 %v3304_v7, %v3387_v58  ;;  %v12534_v14 = vrot.slane %v8868_v56, 2  ;;  %v12535_v51 = vrot.slane %v8854_v23, 2 }
 0x225   : > { %v3514_v47 = vsel %vm12532_vm15, %v12531_v57, %v11696_v28  ;;  %vm12536_vm10 = vcmp.lt.s32.totalorder %v6580_v24, 6  ;;  %v3210_v60 = vrot.slane %v8895_v29, 6  ;;  %v3338_v25 = vrot.slane %v8895_v29, 7  ;;  %v12537_v28 = vld [vmem:[#allocation64_spill] sm:$0xff] }
 0x226   : > { %v3642_v9 = vsel %vm12536_vm10, %v12535_v51, %v12534_v14  ;;  %v8918_v21 = vmax.f32 %v3273_v6, %v3386_v20  ;;  %v2763_v57 = vpack.c.bf16 %v8908_v0, %v8895_v29  ;;  %v3211_v53 = vrot.slane %v8908_v0, 6 }
 0x227   : > { %v3339_v58 = vrot.slane %v8908_v0, 7  ;;  %vm12538_vm4 = vnez %v12537_v28  ;;  %vm12539_vm1 = vcmp.lt.s32.totalorder %v6580_v24, 2  ;;  %vm12540_vm15 = vcmp.lt.s32.totalorder %v6580_v24, 1 }
 0x228   : > { %v3432_v61 = vsel %vm12538_vm4, %v3400_v54, %v3304_v7  ;;  %v3257_v12 = vsel %vm12539_vm1, %v3209_v33, %v3210_v60  ;;  %v3385_v51 = vsel %vm12540_vm15, %v3337_v27, %v3338_v25  ;;  %vm12541_vm10 = vcmask 64512   ;;  %vm12542_vm6 = vmmov %vm12539_vm1 }
 0x229   : > { %v3528_v20 = vmax.f32 %v3432_v61, %v3514_v47  ;;  %5938 = vmatprep.mubr.msk.bf16.mxu1 %vm12541_vm10, %v2763_v57  ;;  %v3256_v6 = vsel %vm12542_vm6, %v3210_v60, %v3211_v53  ;;  %v3274_v55 = vmax.f32 %v8895_v29, %v3257_v12  ;;  %vm12543_vm9 = vmmov %vm12540_vm15  ;;  %v11706_v33 = vrot.slane %v8908_v0, 1  ;;  %v12544_v61 = vld [vmem:[#allocation15_spill] sm:$0xff] }
 0x22a   : > { %v3384_v59 = vsel %vm12543_vm9, %v3338_v25, %v3339_v58  ;;  %v3275_v54 = vmax.f32 %v8908_v0, %v3256_v6  ;;  %v11707_v27 = vrot.slane %v8908_v0, 2  ;;  %vm12545_vm1 = vnez %v12544_v61 }
 0x22b   : > { %v8941_v14 = vmax.f32 %v3528_v20, %v3642_v9  ;;  %v3306_v47 = vsel %vm12545_vm1, %v3274_v55, %v8895_v29  ;;  %v2385_v60 = vmax.f32 %v2257_v11, %v7936_v16  ;;  %v2386_v12 = vmax.f32 %v2258_v1, %v7948_v49  ;;  %v12550_v20 = vld [vmem:[#allocation18_spill] sm:$0xff] }
 0x22c   : > { %v3402_v57 = vmax.f32 %v3306_v47, %v3385_v51  ;;  %v8948_v25 = vmax.f32 %v3275_v54, %v3384_v59  ;;  %v12546_v6 = vrot.slane %v8895_v29, 1  ;;  %vm12547_vm9 = vcmp.lt.s32.totalorder %v6580_v24, 7 }
 0x22d   : > { %v12548_v9 = vrot.slane %v8895_v29, 2  ;;  %vm12549_vm6 = vcmp.lt.s32.totalorder %v6580_v24, 6  ;;  %v2513_v11 = vmax.f32 %v2385_v60, %v12528_v44  ;;  %v2514_v1 = vmax.f32 %v2386_v12, %v12533_v34  ;;  %v12558_v12 = vld [vmem:[#allocation100_spill] sm:$0xff] }
 0x22e   : > { %v3512_v7 = vsel %vm12547_vm9, %v12546_v6, %v11706_v33  ;;  %v2259_v59 = vmax.f32 %v12528_v44, %v7936_v16  ;;  %v2260_v51 = vmax.f32 %v12533_v34, %v7948_v49  ;;  %vm12551_vm15 = vnez %v12550_v20  ;;  %v12552_v6 = vld [vmem:[#allocation6_spill] sm:$0xff] }
 0x22f   : > { %v3640_v55 = vsel %vm12549_vm6, %v12548_v9, %v11707_v27  ;;  %v3434_v54 = vsel %vm12551_vm15, %v3402_v57, %v3306_v47  ;;  %v12553_v33 = vand.u32 15, %v12552_v6  ;;  %v12554_v61 = vmov 0  ;;  %v12557_v9 = vld [vmem:[#allocation21_spill] sm:$0xff]  ;;  %v12559_v57 = vld [vmem:[#allocation80_spill] sm:$0xff]  ;;  %v12560_v6 = vld [vmem:[#allocation83_spill] sm:$0xff] }
 0x230   : > { %v2261_v60 = vmax.f32 %v12557_v9, %v12517_v40  ;;  %v2262_v27 = vmax.f32 %v12558_v12, %v8795_v30  ;;  %v3530_v36 = vmax.f32 %v3434_v54, %v3512_v7  ;;  %v8981_v16 = vmax.f32 %v2513_v11, %v12557_v9 }
 0x231   : > { %vm8972_vm10 = vcmp.lt.s32.totalorder %v12553_v33, 14  ;;  %v8984_v49 = vmax.f32 %v2514_v1, %v12558_v12  ;;  %v2387_v47 = vmax.f32 %v2259_v59, %v12517_v40  ;;  %v2388_v33 = vmax.f32 %v2260_v51, %v8795_v30 }
 0x232   : > { %v12555_v61 = vsel %vm8972_vm10, 4294967295, %v12554_v61  ;;  %v12561_v20 = vmax.f32 %v12559_v57, %v12560_v6  ;;  %v2389_v7 = vmax.f32 %v2261_v60, %v12528_v44  ;;  %v2390_v11 = vmax.f32 %v2262_v27, %v12533_v34 }
 0x233   : > { %12556 = vst [vmem:[#allocation20_spill] sm:$0xff] %v12555_v61  ;;  %v8998_v54 = vmax.f32 %v3530_v36, %v3640_v55  ;;  %v2764_v1 = vpack.c.bf16 %v8984_v49, %v8981_v16  ;;  %v3212_v40 = vrot.slane %v8981_v16, 6  ;;  %v3213_v30 = vrot.slane %v8984_v49, 6 }
 0x234   : > { %v8994_v28 = vsel %vm8972_vm10, %v12561_v20, %v12559_v57  ;;  %v3340_v59 = vrot.slane %v8981_v16, 7  ;;  %v3341_v51 = vrot.slane %v8984_v49, 7  ;;  %v3469_v57 = vrot.slane %v8984_v49, 1 }
 0x235   : > { %12562 = vst [vmem:[#allocation42_spill] sm:$0xff] %v8998_v54  ;;  %vm12563_vm9 = vcmask 64512   ;;  %vm12564_vm6 = vcmp.lt.s32.totalorder %v6580_v24, 2  ;;  %vm12566_vm13 = vcmp.lt.s32.totalorder %v6580_v24, 1  ;;  %v3597_v5 = vrot.slane %v8984_v49, 2 }
 0x236   : > { %5939 = vmatmul.mubr.msk.bf16.gmra.mxu1 %vm12563_vm9, %v2764_v1  ;;  %v3254_v36 = vsel %vm12564_vm6, %v3212_v40, %v3213_v30  ;;  %vm12565_vm12 = vmmov %vm12564_vm6  ;;  %v3382_v20 = vsel %vm12566_vm13, %v3340_v59, %v3341_v51  ;;  %v12568_v1 = vrot.slane %v8981_v16, 1  ;;  %vm12569_vm9 = vcmp.lt.s32.totalorder %v6580_v24, 7 }
 0x237   : > { %v3255_v55 = vsel %vm12565_vm12, %v3211_v53, %v3212_v40  ;;  %v3277_v61 = vmax.f32 %v8984_v49, %v3254_v36  ;;  %vm12567_vm10 = vmmov %vm12566_vm13  ;;  %v2515_v53 = vmax.f32 %v2387_v47, %v12557_v9  ;;  %v2516_v40 = vmax.f32 %v2388_v33, %v12558_v12  ;;  %v12577_v33 = vld [vmem:[#allocation81_spill] sm:$0xff] }
 0x238   : > { %v3276_v6 = vmax.f32 %v8981_v16, %v3255_v55  ;;  %v3383_v27 = vsel %vm12567_vm10, %v3339_v58, %v3340_v59  ;;  %v3510_v26 = vsel %vm12569_vm9, %v12568_v1, %v3469_v57  ;;  %v12570_v55 = vld [vmem:[#allocation16_spill] sm:$0xff]  ;;  %v2517_v19 = vmax.f32 %v2389_v7, %v12572_v15 }
 0x239   : > { %vm12571_vm12 = vnez %v12570_v55  ;;  %v3405_v60 = vmax.f32 %v3277_v61, %v3382_v20  ;;  %v2518_v58 = vmax.f32 %v2390_v11, %v12573_v46  ;;  %v12574_v62 = vrot.slane %v8981_v16, 2  ;;  %v12580_v20 = vld [vmem:[#allocation19_spill] sm:$0xff] }
 0x23a   : > { %v3308_v36 = vsel %vm12571_vm12, %v3276_v6, %v8981_v16  ;;  %vm12575_vm13 = vcmp.lt.s32.totalorder %v6580_v24, 6  ;;  %v2643_v49 = vmax.f32 %v2515_v53, %v12572_v15  ;;  %v9040_v47 = vmax.f32 %v2516_v40, %v12573_v46 }
 0x23b   : > { %v3404_v59 = vmax.f32 %v3308_v36, %v3383_v27  ;;  %v3638_v1 = vsel %vm12575_vm13, %v12574_v62, %v3597_v5  ;;  %v9043_v32 = vmax.f32 %v2517_v19, %v12577_v33  ;;  %v9046_v61 = vmax.f32 %v2518_v58, %v8994_v28 }
 0x23c   : > { %12576 = vst [vmem:[#allocation57_spill] sm:$0xff] %v9040_v47  ;;  %v2263_v7 = vmax.f32 %v12572_v15, %v12528_v44  ;;  %v2264_v11 = vmax.f32 %v12573_v46, %v12533_v34  ;;  %vm12581_vm10 = vnez %v12580_v20  ;;  %v2765_v27 = vpack.c.bf16 %v9040_v47, %v2643_v49 }
 0x23d   : > { %12578 = vst [vmem:[#allocation40_spill] sm:$0xff] %v9043_v32  ;;  %12579 = vst [vmem:[#allocation37_spill] sm:$0xff] %v9046_v61  ;;  %v3436_v62 = vsel %vm12581_vm10, %v3404_v59, %v3308_v36  ;;  %v3214_v6 = vrot.slane %v2643_v49, 6  ;;  %v3215_v53 = vrot.slane %v9040_v47, 6  ;;  %v3342_v19 = vrot.slane %v2643_v49, 7 }
 0x23e   : > { %v3532_v40 = vmax.f32 %v3436_v62, %v3510_v26  ;;  %v3343_v55 = vrot.slane %v9040_v47, 7  ;;  %v3470_v58 = vrot.slane %v2643_v49, 1  ;;  %vm12582_vm6 = vcmask 64512  }
 0x23f   : > { %5942 = vmatprep.mubr.msk.bf16.mxu1 %vm12582_vm6, %v2765_v27  ;;  %vm12583_vm9 = vcmp.lt.s32.totalorder %v6580_v24, 2  ;;  %v11722_v36 = vrot.slane %v9040_v47, 1  ;;  %v3598_v59 = vrot.slane %v2643_v49, 2  ;;  %vm12586_vm10 = vcmp.lt.s32.totalorder %v6580_v24, 1 }
 0x240   : > { %v3252_v44 = vsel %vm12583_vm9, %v3214_v6, %v3215_v53  ;;  %vm12584_vm13 = vmmov %vm12583_vm9  ;;  %v9063_v20 = vmax.f32 %v3532_v40, %v3638_v1  ;;  %v3380_v62 = vsel %vm12586_vm10, %v3342_v19, %v3343_v55  ;;  %vm12588_vm6 = vcmp.lt.s32.totalorder %v6580_v24, 7 }
 0x241   : > { %v3253_v34 = vsel %vm12584_vm13, %v3213_v30, %v3214_v6  ;;  %v3279_v26 = vmax.f32 %v9040_v47, %v3252_v44  ;;  %vm12587_vm12 = vmmov %vm12586_vm10  ;;  %v3508_v63 = vsel %vm12588_vm6, %v3470_v58, %v11722_v36  ;;  %v11723_v1 = vrot.slane %v9040_v47, 2  ;;  %v12590_v6 = vld [vmem:[#allocation94_spill] sm:$0xff]  ;;  %v12595_v36 = vld [vmem:[#allocation29_spill] sm:$0xff] }
 0x242   : > { %12585 = vst [vmem:[#allocation79_spill] sm:$0xff] %v9063_v20  ;;  %v3278_v54 = vmax.f32 %v2643_v49, %v3253_v34  ;;  %v3381_v27 = vsel %vm12587_vm12, %v3341_v51, %v3342_v19  ;;  %vm12589_vm9 = vmmov %vm12588_vm6  ;;  %vm12591_vm13 = vnez %v12590_v6  ;;  %vm12593_vm10 = vcmp.lt.s32.totalorder %v6580_v24, 6 }
 0x243   : > { %v3509_v30 = vsel %vm12589_vm9, %v3469_v57, %v3470_v58  ;;  %v9079_v44 = vmax.f32 %v3279_v26, %v3380_v62  ;;  %v9083_v20 = vsel %vm12593_vm10, %v3597_v5, %v3598_v59  ;;  %vm12594_vm12 = vmmov %vm12593_vm10  ;;  %v2766_v57 = vpack.c.bf16 %v9046_v61, %v9043_v32  ;;  %v12597_v62 = vld [vmem:[#allocation58_spill] sm:$0xff] }
 0x244   : > { %v3310_v40 = vsel %vm12591_vm13, %v3278_v54, %v2643_v49  ;;  %v3533_v34 = vmax.f32 %v3405_v60, %v3509_v30  ;;  %v3636_v19 = vsel %vm12594_vm12, %v3598_v59, %v11723_v1  ;;  %v3216_v58 = vrot.slane %v9043_v32, 6 }
 0x245   : > { %12592 = vst [vmem:[#allocation87_spill] sm:$0xff] %v9079_v44  ;;  %v3406_v51 = vmax.f32 %v3310_v40, %v3381_v27  ;;  %vm12596_vm6 = vnez %v12595_v36  ;;  %v3217_v49 = vrot.slane %v9046_v61, 6  ;;  %v3344_v5 = vrot.slane %v9043_v32, 7  ;;  %v12632_v44 = vld [vmem:[#allocation23_spill] sm:$0xff] }
 0x246   : > { %v9094_v54 = vsel %vm12596_vm6, %v3533_v34, %v3405_v60  ;;  %v3345_v26 = vrot.slane %v9046_v61, 7  ;;  %vm12598_vm9 = vnez %v12597_v62  ;;  %vm12599_vm10 = vcmask 64512  }
 0x247   : > { %v3438_v27 = vsel %vm12598_vm9, %v3406_v51, %v3310_v40  ;;  %5943 = vmatmul.mubr.msk.bf16.gmra.mxu1 %vm12599_vm10, %v2766_v57  ;;  %vm12600_vm12 = vcmp.lt.s32.totalorder %v6580_v24, 2  ;;  %vm12602_vm6 = vcmp.lt.s32.totalorder %v6580_v24, 1  ;;  %v11724_v57 = vrot.slane %v9046_v61, 1 }
 0x248   : > { %v3251_v30 = vsel %vm12600_vm12, %v3215_v53, %v3216_v58  ;;  %v3534_v34 = vmax.f32 %v3438_v27, %v3508_v63  ;;  %vm12601_vm13 = vmmov %vm12600_vm12  ;;  %v3378_v62 = vsel %vm12602_vm6, %v3344_v5, %v3345_v26  ;;  %v11726_v53 = vrot.slane %v9043_v32, 2  ;;  %v12605_v63 = vld [vmem:[#allocation97_spill] sm:$0xff] }
 0x249   : > { %v3250_v1 = vsel %vm12601_vm13, %v3216_v58, %v3217_v49  ;;  %v3280_v6 = vmax.f32 %v9043_v32, %v3251_v30  ;;  %vm12603_vm9 = vmmov %vm12602_vm6  ;;  %vm12606_vm10 = vnez %v12605_v63  ;;  %v11725_v27 = vrot.slane %v9046_v61, 2 }
 0x24a   : > { %v3281_v40 = vmax.f32 %v9046_v61, %v3250_v1  ;;  %v3379_v51 = vsel %vm12603_vm9, %v3343_v55, %v3344_v5  ;;  %v9117_v59 = vmax.f32 %v3534_v34, %v3636_v19  ;;  %v2391_v30 = vmax.f32 %v2263_v7, %v12557_v9  ;;  %v12611_v34 = vld [vmem:[#allocation98_spill] sm:$0xff] }
 0x24b   : > { %v3312_v58 = vsel %vm12606_vm10, %v3280_v6, %v9043_v32  ;;  %v12608_v55 = vrot.slane %v9043_v32, 1  ;;  %vm12609_vm13 = vcmp.lt.s32.totalorder %v6580_v24, 7  ;;  %v2392_v19 = vmax.f32 %v2264_v11, %v12558_v12  ;;  %v12630_v61 = vld [vmem:[#allocation34_spill] sm:$0xff] }
 0x24c   : > { %12604 = vst [vmem:[#allocation28_spill] sm:$0xff] %v9117_v59  ;;  %v3408_v60 = vmax.f32 %v3312_v58, %v3379_v51  ;;  %v9124_v36 = vmax.f32 %v3281_v40, %v3378_v62  ;;  %vm12610_vm6 = vcmp.lt.s32.totalorder %v6580_v24, 6  ;;  %v2519_v7 = vmax.f32 %v2391_v30, %v12577_v33  ;;  %v12613_v51 = vld [vmem:[#allocation22_spill] sm:$0xff] }
 0x24d   : > { %v3506_v1 = vsel %vm12609_vm13, %v12608_v55, %v11724_v57  ;;  %v3634_v6 = vsel %vm12610_vm6, %v11726_v53, %v11725_v27  ;;  %v2265_v5 = vmax.f32 %v12577_v33, %v12557_v9  ;;  %v2266_v62 = vmax.f32 %v8994_v28, %v12558_v12  ;;  %v12614_v57 = vld [vmem:[#allocation26_spill] sm:$0xff] }
 0x24e   : > { %12607 = vst [vmem:[#allocation35_spill] sm:$0xff] %v9124_v36  ;;  %vm12612_vm9 = vnez %v12611_v34  ;;  %v2520_v11 = vmax.f32 %v2392_v19, %v8994_v28  ;;  %v2267_v55 = vmax.f32 %v12613_v51, %v12572_v15  ;;  %v2268_v63 = vmax.f32 %v12614_v57, %v12573_v46 }
 0x24f   : > { %v3440_v40 = vsel %vm12612_vm9, %v3408_v60, %v3312_v58  ;;  %v9152_v30 = vmax.f32 %v2519_v7, %v12613_v51  ;;  %v2393_v9 = vmax.f32 %v2265_v5, %v12572_v15  ;;  %v2394_v53 = vmax.f32 %v2266_v62, %v12573_v46 }
 0x250   : > { %v3536_v27 = vmax.f32 %v3440_v40, %v3506_v1  ;;  %v9157_v12 = vmax.f32 %v2520_v11, %v12614_v57  ;;  %v2395_v60 = vmax.f32 %v2267_v55, %v12577_v33  ;;  %v2396_v58 = vmax.f32 %v2268_v63, %v8994_v28 }
 0x251   : > { %v12616_v19 = vrot.slane %v8731_v45, 7  ;;  %v12617_v34 = vrot.slane %v8396_v8, 7  ;;  %vm12618_vm12 = vcmp.lt.s32.totalorder %v6580_v24, 1  ;;  %v3218_v15 = vrot.slane %v9152_v30, 6 }
 0x252   : > { %12615 = vst [vmem:[#allocation24_spill] sm:$0xff] %v9157_v12  ;;  %v9167_v7 = vmax.f32 %v3536_v27, %v3634_v6  ;;  %v3346_v46 = vrot.slane %v9152_v30, 7  ;;  %v2767_v62 = vpack.c.bf16 %v9157_v12, %v9152_v30  ;;  %v3219_v63 = vrot.slane %v9157_v12, 6  ;;  %vm12621_vm6 = vmmov %vm12618_vm12 }
 0x253   : > { %v3390_v1 = vsel %vm12618_vm12, %v12617_v34, %v12616_v19  ;;  %v3347_v40 = vrot.slane %v9157_v12, 7  ;;  %vm12620_vm13 = vcmp.lt.s32.totalorder %v6580_v24, 2  ;;  %v11739_v55 = vrot.slane %v9157_v12, 2  ;;  %vm12624_vm10 = vmmov %vm12621_vm6 }
 0x254   : > { %12619 = vst [vmem:[#allocation78_spill] sm:$0xff] %v9167_v7  ;;  %v3249_v34 = vsel %vm12620_vm13, %v3217_v49, %v3218_v15  ;;  %v3377_v27 = vsel %vm12621_vm6, %v3345_v26, %v3346_v46  ;;  %vm12622_vm12 = vcmask 64512   ;;  %vm12623_vm9 = vmmov %vm12620_vm13  ;;  %v12625_v36 = vrot.slane %v9157_v12, 1 }
 0x255   : > { %5946 = vmatprep.mubr.msk.bf16.mxu1 %vm12622_vm12, %v2767_v62  ;;  %v3248_v19 = vsel %vm12623_vm9, %v3218_v15, %v3219_v63  ;;  %v3282_v5 = vmax.f32 %v9152_v30, %v3249_v34  ;;  %v3376_v11 = vsel %vm12624_vm10, %v3346_v46, %v3347_v40  ;;  %v12626_v49 = vrot.slane %v9152_v30, 1 }
 0x256   : > { %vm12627_vm13 = vcmp.lt.s32.totalorder %v6580_v24, 7  ;;  %v3283_v6 = vmax.f32 %v9157_v12, %v3248_v19  ;;  %v12628_v62 = vrot.slane %v9152_v30, 2  ;;  %vm12629_vm9 = vcmp.lt.s32.totalorder %v6580_v24, 6 }
 0x257   : > { %v3504_v26 = vsel %vm12627_vm13, %v12626_v49, %v12625_v36  ;;  %v2521_v34 = vmax.f32 %v2393_v9, %v12613_v51  ;;  %v2522_v46 = vmax.f32 %v2394_v53, %v12614_v57  ;;  %vm12631_vm10 = vnez %v12630_v61  ;;  %v12633_v36 = vld [vmem:[#allocation11_spill] sm:$0xff]  ;;  %vm12641_vm6 = vmmov %vm12627_vm13 }
 0x258   : > { %v3632_v15 = vsel %vm12629_vm9, %v12628_v62, %v11739_v55  ;;  %v3314_v7 = vsel %vm12631_vm10, %v3282_v5, %v9152_v30  ;;  %v2523_v47 = vmax.f32 %v2395_v60, %v12632_v44  ;;  %v2524_v49 = vmax.f32 %v2396_v58, %v12633_v36  ;;  %vm12644_vm12 = vmmov %vm12641_vm6 }
 0x259   : > { %v12634_v19 = vmax.f32 %v8731_v45, %v8764_v13  ;;  %v3410_v32 = vmax.f32 %v3314_v7, %v3377_v27  ;;  %v9214_v59 = vmax.f32 %v3283_v6, %v3376_v11  ;;  %v9217_v9 = vmax.f32 %v2521_v34, %v12632_v44 }
 0x25a   : > { %v9220_v53 = vmax.f32 %v2522_v46, %v12633_v36  ;;  %v9223_v5 = vmax.f32 %v2523_v47, %v8014_v43  ;;  %v9226_v60 = vmax.f32 %v2524_v49, %v8047_v48  ;;  %v12639_v58 = vrot.slane %v8981_v16, 1  ;;  %v12645_v47 = vld [vmem:[#allocation33_spill] sm:$0xff] }
 0x25b   : > { %v9212_v12 = vmax.f32 %v12634_v19, %v3390_v1  ;;  %12635 = vst [vmem:[#allocation6_spill] sm:$0xff] %v9214_v59  ;;  %12636 = vst [vmem:[#allocation21_spill] sm:$0xff] %v9217_v9  ;;  %v12640_v13 = vrot.slane %v8908_v0, 1  ;;  %v12642_v11 = vrot.slane %v8895_v29, 1  ;;  %v12643_v27 = vrot.slane %v8868_v56, 1 }
 0x25c   : > { %12637 = vst [vmem:[#allocation100_spill] sm:$0xff] %v9220_v53  ;;  %12638 = vst [vmem:[#allocation80_spill] sm:$0xff] %v9223_v5  ;;  %vm12646_vm13 = vnez %v12645_v47  ;;  %v2768_v34 = vpack.c.bf16 %v9220_v53, %v9217_v9  ;;  %v3220_v46 = vrot.slane %v9217_v9, 6  ;;  %v3221_v49 = vrot.slane %v9220_v53, 6 }
 0x25d   : > { %v9234_v1 = vsel %vm12641_vm6, %v12640_v13, %v12639_v58  ;;  %v9242_v6 = vsel %vm12644_vm12, %v12643_v27, %v12642_v11  ;;  %v3442_v62 = vsel %vm12646_vm13, %v3410_v32, %v3314_v7  ;;  %v3348_v58 = vrot.slane %v9217_v9, 7 }
 0x25e   : > { %v3538_v19 = vmax.f32 %v3442_v62, %v3504_v26  ;;  %v3349_v13 = vrot.slane %v9220_v53, 7  ;;  %vm12647_vm9 = vcmask 64512   ;;  %vm12648_vm6 = vcmp.lt.s32.totalorder %v6580_v24, 2 }
 0x25f   : > { %5947 = vmatmul.mubr.msk.bf16.gmra.mxu1 %vm12647_vm9, %v2768_v34  ;;  %v3246_v11 = vsel %vm12648_vm6, %v3220_v46, %v3221_v49  ;;  %vm12649_vm12 = vmmov %vm12648_vm6  ;;  %v11740_v7 = vrot.slane %v9220_v53, 1  ;;  %vm12651_vm13 = vcmp.lt.s32.totalorder %v6580_v24, 1  ;;  %vm12654_vm6 = vcmp.lt.s32.totalorder %v6580_v24, 7 }
 0x260   : > { %v3247_v32 = vsel %vm12649_vm12, %v3219_v63, %v3220_v46  ;;  %v9260_v47 = vmax.f32 %v3538_v19, %v3632_v15  ;;  %v3285_v62 = vmax.f32 %v9220_v53, %v3246_v11  ;;  %v3374_v55 = vsel %vm12651_vm13, %v3348_v58, %v3349_v13  ;;  %vm12652_vm9 = vmmov %vm12651_vm13  ;;  %v12655_v11 = vld [vmem:[#allocation48_spill] sm:$0xff] }
 0x261   : > { %v3284_v26 = vmax.f32 %v9217_v9, %v3247_v32  ;;  %v3375_v34 = vsel %vm12652_vm9, %v3347_v40, %v3348_v58  ;;  %v12653_v63 = vrot.slane %v9217_v9, 1  ;;  %v11743_v15 = vrot.slane %v9220_v53, 2 }
 0x262   : > { %12650 = vst [vmem:[#allocation83_spill] sm:$0xff] %v9260_v47  ;;  %v2769_v19 = vpack.c.bf16 %v9226_v60, %v9223_v5  ;;  %vm12656_vm12 = vnez %v12655_v11  ;;  %v9280_v27 = vmax.f32 %v3285_v62, %v3374_v55  ;;  %v3222_v40 = vrot.slane %v9223_v5, 6 }
 0x263   : > { %v3502_v46 = vsel %vm12654_vm6, %v12653_v63, %v11740_v7  ;;  %v3316_v32 = vsel %vm12656_vm12, %v3284_v26, %v9217_v9  ;;  %v11746_v58 = vrot.slane %v9226_v60, 6  ;;  %v12658_v63 = vrot.slane %v9217_v9, 2 }
 0x264   : > { %12657 = vst [vmem:[#allocation63_spill] sm:$0xff] %v9280_v27  ;;  %v3412_v61 = vmax.f32 %v3316_v32, %v3375_v34  ;;  %vm12659_vm13 = vcmp.lt.s32.totalorder %v6580_v24, 6  ;;  %vm12660_vm9 = vcmask 64512   ;;  %v3350_v59 = vrot.slane %v9223_v5, 7  ;;  %v12663_v27 = vld [vmem:[#allocation51_spill] sm:$0xff] }
 0x265   : > { %v3630_v7 = vsel %vm12659_vm13, %v12658_v63, %v11743_v15  ;;  %5950 = vmatprep.mubr.msk.bf16.mxu1 %vm12660_vm9, %v2769_v19  ;;  %v11747_v26 = vrot.slane %v9226_v60, 7  ;;  %vm12661_vm6 = vcmp.lt.s32.totalorder %v6580_v24, 2  ;;  %v11749_v34 = vrot.slane %v9223_v5, 1 }
 0x266   : > { %v3244_v55 = vsel %vm12661_vm6, %v3222_v40, %v11746_v58  ;;  %vm12662_vm12 = vmmov %vm12661_vm6  ;;  %v11748_v11 = vrot.slane %v9226_v60, 1  ;;  %vm12664_vm13 = vnez %v12663_v27  ;;  %vm12665_vm9 = vcmp.lt.s32.totalorder %v6580_v24, 1 }
 0x267   : > { %v3245_v62 = vsel %vm12662_vm12, %v3221_v49, %v3222_v40  ;;  %v3444_v63 = vsel %vm12664_vm13, %v3412_v61, %v3316_v32  ;;  %v3287_v15 = vmax.f32 %v9226_v60, %v3244_v55  ;;  %v3372_v53 = vsel %vm12665_vm9, %v3350_v59, %v11747_v26  ;;  %vm12666_vm6 = vmmov %vm12665_vm9  ;;  %v12668_v40 = vld [vmem:[#allocation67_spill] sm:$0xff] }
 0x268   : > { %v3286_v19 = vmax.f32 %v9223_v5, %v3245_v62  ;;  %v3540_v58 = vmax.f32 %v3444_v63, %v3502_v46  ;;  %v3373_v49 = vsel %vm12666_vm6, %v3349_v13, %v3350_v59  ;;  %vm12667_vm12 = vcmp.lt.s32.totalorder %v6580_v24, 7 }
 0x269   : > { %v3500_v61 = vsel %vm12667_vm12, %v11749_v34, %v11748_v11  ;;  %vm12669_vm13 = vnez %v12668_v40  ;;  %v9321_v62 = vmax.f32 %v3287_v15, %v3372_v53  ;;  %v11750_v46 = vrot.slane %v9226_v60, 2  ;;  %vm12673_vm9 = vmmov %vm12667_vm12  ;;  %v12693_v40 = vld [vmem:[#allocation93_spill] sm:$0xff] }
 0x26a   : > { %v3318_v55 = vsel %vm12669_vm13, %v3286_v19, %v9223_v5  ;;  %v12671_v63 = vrot.slane %v8854_v23, 1  ;;  %v12672_v59 = vrot.slane %v8787_v39, 1  ;;  %v9330_v26 = vmax.f32 %v3540_v58, %v3630_v7  ;;  %vm12677_vm6 = vmmov %vm12673_vm9 }
 0x26b   : > { %12670 = vst [vmem:[#allocation82_spill] sm:$0xff] %v9321_v62  ;;  %v3414_v11 = vmax.f32 %v3318_v55, %v3373_v49  ;;  %v12675_v34 = vrot.slane %v8784_v4, 1  ;;  %v12676_v32 = vrot.slane %v8731_v45, 1  ;;  %v3524_v15 = vmax.f32 %v8715_v41, %v8770_v3 }
 0x26c   : > { %v3515_v13 = vsel %vm12673_vm9, %v12672_v59, %v12671_v63  ;;  %12674 = vst [vmem:[#allocation81_spill] sm:$0xff] %v9330_v26  ;;  %v12678_v19 = vrot.slane %v9223_v5, 2  ;;  %vm12679_vm12 = vcmp.lt.s32.totalorder %v6580_v24, 6  ;;  %v3529_v49 = vmax.f32 %v8918_v21, %v9242_v6  ;;  %v12680_v59 = vld [vmem:[#allocation74_spill] sm:$0xff] }
 0x26d   : > { %v3517_v53 = vsel %vm12677_vm6, %v12676_v32, %v12675_v34  ;;  %v3527_v58 = vmax.f32 %v8847_v18, %v3515_v13  ;;  %vm12681_vm9 = vnez %v12680_v59  ;;  %v3531_v41 = vmax.f32 %v8948_v25, %v9234_v1  ;;  %v12689_v1 = vld [vmem:[#allocation38_spill] sm:$0xff]  ;;  %v12691_v59 = vld [vmem:[#allocation9_spill] sm:$0xff] }
 0x26e   : > { %v3628_v63 = vsel %vm12679_vm12, %v12678_v19, %v11750_v46  ;;  %v3525_v7 = vmax.f32 %v9212_v12, %v3517_v53  ;;  %v3446_v34 = vsel %vm12681_vm9, %v3414_v11, %v3318_v55  ;;  %v3553_v3 = vmax.f32 %v8591_v38, %v8719_v31  ;;  %v12683_v19 = vld [vmem:[#allocation47_spill] sm:$0xff]  ;;  %v12685_v46 = vld [vmem:[#allocation70_spill] sm:$0xff] }
 0x26f   : > { %v12682_v32 = vmax.f32 %v8708_v35, %v8727_v37  ;;  %vm12684_vm6 = vnez %v12683_v19  ;;  %v3542_v13 = vmax.f32 %v3446_v34, %v3500_v61  ;;  %vm12686_vm12 = vnez %v12685_v46  ;;  %v12687_v11 = vld [vmem:[#allocation66_spill] sm:$0xff] }
 0x270   : > { %v3557_v6 = vsel %vm12686_vm12, %v3525_v7, %v9212_v12  ;;  %vm12688_vm9 = vnez %v12687_v11  ;;  %vm12690_vm13 = vnez %v12689_v1  ;;  %vm12692_vm10 = vnez %v12691_v59 }
 0x271   : > { %v3555_v53 = vsel %vm12684_vm6, %v12682_v32, %v8708_v35  ;;  %v3559_v55 = vsel %vm12688_vm9, %v3527_v58, %v8847_v18  ;;  %v3561_v31 = vsel %vm12690_vm13, %v3529_v49, %v8918_v21  ;;  %v3563_v37 = vsel %vm12692_vm10, %v3531_v41, %v8948_v25 }
 0x272   : > { %vm12694_vm15 = vnez %v12693_v40  ;;  %v3588_v61 = vrot.slane %v8396_v8, 2  ;;  %v12695_v12 = vrot.slane %v8981_v16, 2  ;;  %v12696_v7 = vrot.slane %v8908_v0, 2 }
 0x273   : > { %v3585_v35 = vsel %vm12694_vm15, %v3553_v3, %v8591_v38  ;;  %vm12697_vm1 = vcmp.lt.s32.totalorder %v6580_v24, 6  ;;  %v9384_v58 = vmax.f32 %v3542_v13, %v3628_v63  ;;  %v12699_v21 = vrot.slane %v8895_v29, 2 }
 0x274   : > { %v3639_v18 = vsel %vm12697_vm1, %v12696_v7, %v12695_v12  ;;  %v12700_v49 = vrot.slane %v8868_v56, 2  ;;  %vm12701_vm10 = vmmov %vm12697_vm1  ;;  %v12702_v38 = vrot.slane %v8854_v23, 2  ;;  %v12703_v8 = vrot.slane %v8787_v39, 2 }
 0x275   : > { %12698 = vst [vmem:[#allocation22_spill] sm:$0xff] %v9384_v58  ;;  %vm12704_vm15 = vmmov %vm12697_vm1  ;;  %v12705_v0 = vrot.slane %v8784_v4, 2  ;;  %v12706_v34 = vrot.slane %v8731_v45, 2  ;;  %v12709_v41 = vrot.slane %v12414_v42, 2  ;;  %v12711_v23 = vrot.slane %v8506_v17, 2 }
 0x276   : > { %v3641_v25 = vsel %vm12701_vm10, %v12700_v49, %v12699_v21  ;;  %v3643_v16 = vsel %vm12704_vm15, %v12703_v8, %v12702_v38  ;;  %vm12708_vm13 = vmmov %vm12697_vm1  ;;  %v12712_v3 = vrot.slane %v8515_v10, 2  ;;  %v3659_v21 = vmax.f32 %v3563_v37, %v3639_v18  ;;  %v12714_v38 = vld [vmem:[#allocation32_spill] sm:$0xff]  ;;  %v12717_v8 = vld [vmem:[#allocation50_spill] sm:$0xff] }
 0x277   : > { %v3645_v63 = vsel %vm12697_vm1, %v12706_v34, %v12705_v0  ;;  %v12707_v29 = vmov %v12706_v34  ;;  %vm12710_vm10 = vmmov %vm12697_vm1  ;;  %v3655_v7 = vmax.f32 %v3559_v55, %v3643_v16  ;;  %v3657_v45 = vmax.f32 %v3561_v31, %v3641_v25  ;;  %v12719_v34 = vld [vmem:[#allocation68_spill] sm:$0xff]  ;;  %v12721_v18 = vld [vmem:[#allocation7_spill] sm:$0xff] }
 0x278   : > { %v3646_v56 = vsel %vm12708_vm13, %v3588_v61, %v12707_v29  ;;  %v3647_v39 = vsel %vm12710_vm10, %v12709_v41, %v3588_v61  ;;  %vm12713_vm15 = vmmov %vm12697_vm1  ;;  %v3653_v32 = vmax.f32 %v3557_v6, %v3645_v63  ;;  %vm12715_vm13 = vnez %v12714_v38  ;;  %v12723_v16 = vld [vmem:[#allocation10_spill] sm:$0xff] }
 0x279   : > { %v3649_v4 = vsel %vm12713_vm15, %v12712_v3, %v12711_v23  ;;  %v3651_v13 = vmax.f32 %v3555_v53, %v3647_v39  ;;  %v3652_v12 = vmax.f32 %v3524_v15, %v3646_v56  ;;  %v12716_v61 = vmax.f32 %v9094_v54, %v9083_v20 }
 0x27a   : > { %v3681_v49 = vmax.f32 %v3585_v35, %v3649_v4  ;;  %v3685_v42 = vsel %vm12715_vm13, %v3653_v32, %v3557_v6  ;;  %vm12718_vm1 = vnez %v12717_v8  ;;  %vm12720_vm10 = vnez %v12719_v34  ;;  %v12728_v4 = vld [vmem:[#allocation56_spill] sm:$0xff] }
 0x27b   : > { %v9426_v17 = vsel %vm8774_vm5, %v12716_v61, %v9094_v54  ;;  %v3683_v0 = vsel %vm12718_vm1, %v3651_v13, %v3555_v53  ;;  %v9432_v15 = vsel %vm12720_vm10, %v3655_v7, %v3559_v55  ;;  %vm12722_vm15 = vnez %v12721_v18  ;;  %v12725_v54 = vld [vmem:[#allocation96_spill] sm:$0xff]  ;;  %v12730_v61 = vld [vmem:[#allocation42_spill] sm:$0xff] }
 0x27c   : > { %v9436_v25 = vsel %vm12722_vm15, %v3657_v45, %v3561_v31  ;;  %v3718_v6 = vmax.f32 %v8882_v50, %v8753_v52  ;;  %vm12724_vm13 = vnez %v12723_v16  ;;  %vm12726_vm5 = vnez %v12725_v54 }
 0x27d   : > { %v9442_v20 = vsel %vm12724_vm13, %v3659_v21, %v3563_v37  ;;  %v9446_v63 = vsel %vm12726_vm5, %v3681_v49, %v3585_v35  ;;  %v3719_v53 = vmax.f32 %v9432_v15, %v3683_v0  ;;  %v3720_v55 = vmax.f32 %v8941_v14, %v3652_v12 }
 0x27e   : > { %12727 = vst [vmem:[#allocation26_spill] sm:$0xff] %v9446_v63  ;;  %v3721_v29 = vmax.f32 %v9436_v25, %v3685_v42  ;;  %v3745_v31 = vmax.f32 %v9446_v63, %v8674_v2  ;;  %v3780_v56 = vmax.f32 %v3652_v12, %v8753_v52  ;;  %v3781_v41 = vmax.f32 %v3685_v42, %v3683_v0 }
 0x27f   : > { %v3782_v39 = vmax.f32 %v3718_v6, %v3652_v12  ;;  %v3783_v23 = vmax.f32 %v3719_v53, %v3685_v42  ;;  %v3784_v37 = vmax.f32 %v3720_v55, %v8882_v50  ;;  %v3842_v3 = vmax.f32 %v8753_v52, %v3652_v12 }
 0x280   : > { %v3785_v35 = vmax.f32 %v3721_v29, %v9432_v15  ;;  %v9458_v32 = vmax.f32 %v3745_v31, %v12728_v4  ;;  %v3843_v13 = vmax.f32 %v3683_v0, %v3685_v42  ;;  %v3844_v7 = vmax.f32 %v3780_v56, %v8882_v50  ;;  %v12732_v31 = vld [vmem:[#allocation79_spill] sm:$0xff] }
 0x281   : > { %v3845_v45 = vmax.f32 %v3781_v41, %v9432_v15  ;;  %v3846_v21 = vmax.f32 %v3782_v39, %v8941_v14  ;;  %v3847_v49 = vmax.f32 %v3783_v23, %v9436_v25  ;;  %v3848_v6 = vmax.f32 %v3784_v37, %v12730_v61 }
 0x282   : > { %12729 = vst [vmem:[#allocation23_spill] sm:$0xff] %v9458_v32  ;;  %v3849_v53 = vmax.f32 %v3785_v35, %v9442_v20  ;;  %v9467_v52 = vmax.f32 %v3842_v3, %v8882_v50  ;;  %v9470_v12 = vmax.f32 %v3843_v13, %v9432_v15  ;;  %v9473_v42 = vmax.f32 %v3844_v7, %v8941_v14 }
 0x283   : > { %v9476_v0 = vmax.f32 %v3845_v45, %v9436_v25  ;;  %v9479_v55 = vmax.f32 %v3846_v21, %v12730_v61  ;;  %v9482_v29 = vmax.f32 %v3847_v49, %v9442_v20  ;;  %v9485_v56 = vmax.f32 %v3848_v6, %v12732_v31 }
 0x284   : > { %v9488_v41 = vmax.f32 %v3849_v53, %v9426_v17  ;;  %v4231_v39 = vrot.slane %v9467_v52, 6  ;;  %v4232_v23 = vrot.slane %v9470_v12, 6  ;;  %v4233_v37 = vrot.slane %v9473_v42, 6 }
 0x285   : > { %12731 = vst [vmem:[#allocation11_spill] sm:$0xff] %v9482_v29  ;;  %12733 = vst [vmem:[#allocation47_spill] sm:$0xff] %v9485_v56  ;;  %v4234_v3 = vrot.slane %v9476_v0, 6  ;;  %v4235_v35 = vrot.slane %v9479_v55, 6  ;;  %v4236_v13 = vrot.slane %v9482_v29, 6  ;;  %v11756_v7 = vrot.slane %v9485_v56, 6 }
 0x286   : > { %12734 = vst [vmem:[#allocation70_spill] sm:$0xff] %v9488_v41  ;;  %vm12735_vm5 = vcmp.lt.s32.totalorder %v6580_v24, 2  ;;  %v4359_v6 = vrot.slane %v9467_v52, 7  ;;  %v12741_v63 = vrot.slane %v9458_v32, 6  ;;  %v11767_v58 = vrot.slane %v9485_v56, 7 }
 0x287   : > { %v4292_v21 = vsel %vm12735_vm5, %v4232_v23, %v4233_v37  ;;  %vm12736_vm13 = vmmov %vm12735_vm5  ;;  %v12753_v5 = vrot.slane %v9458_v32, 7  ;;  %v4494_v16 = vrot.slane %v9488_v41, 1 }
 0x288   : > { %v4293_v49 = vsel %vm12736_vm13, %v4231_v39, %v4232_v23  ;;  %vm12737_vm15 = vmmov %vm12735_vm5  ;;  %v4297_v2 = vmax.f32 %v9473_v42, %v4292_v21  ;;  %v4362_v21 = vrot.slane %v9476_v0, 7 }
 0x289   : > { %v4288_v53 = vsel %vm12737_vm15, %v4236_v13, %v11756_v7  ;;  %vm12738_vm10 = vmmov %vm12735_vm5  ;;  %v4296_v4 = vmax.f32 %v9470_v12, %v4293_v49 }
 0x28a   : > { %v4289_v54 = vsel %vm12738_vm10, %v4235_v35, %v4236_v13  ;;  %vm12739_vm1 = vmmov %vm12735_vm5  ;;  %v4301_v62 = vmax.f32 %v9485_v56, %v4288_v53 }
 0x28b   : > { %v4290_v40 = vsel %vm12739_vm1, %v4234_v3, %v4235_v35  ;;  %vm12740_vm9 = vmmov %vm12739_vm1  ;;  %v4300_v35 = vmax.f32 %v9482_v29, %v4289_v54 }
 0x28c   : > { %v4291_v45 = vsel %vm12740_vm9, %v4233_v37, %v4234_v3  ;;  %vm12742_vm5 = vmmov %vm12739_vm1  ;;  %v4299_v13 = vmax.f32 %v9479_v55, %v4290_v40  ;;  %v4329_v3 = vsel %vm6795_vm2, %v4297_v2, %v9473_v42  ;;  %v4363_v2 = vrot.slane %v9479_v55, 7 }
 0x28d   : > { %v4294_v23 = vsel %vm12742_vm5, %v12741_v63, %v4231_v39  ;;  %v4298_v7 = vmax.f32 %v9476_v0, %v4291_v45  ;;  %v4360_v63 = vrot.slane %v9470_v12, 7  ;;  %v4361_v39 = vrot.slane %v9473_v42, 7 }
 0x28e   : > { %v4295_v27 = vmax.f32 %v9467_v52, %v4294_v23  ;;  %v4331_v54 = vsel %vm12516_vm7, %v4299_v13, %v9479_v55  ;;  %v4333_v23 = vsel %vm12530_vm14, %v4301_v62, %v9485_v56  ;;  %v4364_v37 = vrot.slane %v9482_v29, 7 }
 0x28f   : > { %vm12747_vm2 = vcmp.lt.s32.totalorder %v6580_v24, 1 }
 0x290   : > { %v4327_v49 = vsel %vm8090_vm11, %v4295_v27, %v9467_v52  ;;  %v4419_v45 = vsel %vm12747_vm2, %v4361_v39, %v4362_v21  ;;  %vm12748_vm11 = vmmov %vm12747_vm2 }
 0x291   : > { %v4418_v27 = vsel %vm12748_vm11, %v4362_v21, %v4363_v2  ;;  %vm12749_vm7 = vmmov %vm12747_vm2  ;;  %v4426_v40 = vmax.f32 %v4298_v7, %v4419_v45  ;;  %v11771_v7 = vrot.slane %v9467_v52, 1  ;;  %v4488_v45 = vrot.slane %v9470_v12, 1 }
 0x292   : > { %v4420_v13 = vsel %vm12749_vm7, %v4360_v63, %v4361_v39  ;;  %vm12750_vm9 = vmmov %vm12747_vm2  ;;  %v4427_v47 = vmax.f32 %v4331_v54, %v4418_v27  ;;  %v4492_v27 = vrot.slane %v9482_v29, 1 }
 0x293   : > { %v4421_v62 = vsel %vm12750_vm9, %v4359_v6, %v4360_v63  ;;  %vm12751_vm14 = vmmov %vm12747_vm2  ;;  %v4425_v39 = vmax.f32 %v4329_v3, %v4420_v13  ;;  %v4493_v13 = vrot.slane %v9485_v56, 1 }
 0x294   : > { %v4416_v53 = vsel %vm12751_vm14, %v4364_v37, %v11767_v58  ;;  %vm12752_vm13 = vmmov %vm12747_vm2  ;;  %v4424_v10 = vmax.f32 %v4296_v4, %v4421_v62  ;;  %v4489_v58 = vrot.slane %v9473_v42, 1  ;;  %v4490_v4 = vrot.slane %v9476_v0, 1 }
 0x295   : > { %v4417_v22 = vsel %vm12752_vm13, %v4363_v2, %v4364_v37  ;;  %vm12754_vm1 = vmmov %vm12747_vm2  ;;  %v4429_v63 = vmax.f32 %v4333_v23, %v4416_v53  ;;  %v4457_v32 = vsel %vm12484_vm3, %v4425_v39, %v4329_v3  ;;  %v11770_v37 = vrot.slane %v9467_v52, 2 }
 0x296   : > { %v4422_v21 = vsel %vm12754_vm1, %v12753_v5, %v4359_v6  ;;  %v4428_v9 = vmax.f32 %v4300_v35, %v4417_v22  ;;  %v4459_v5 = vsel %vm12522_vm8, %v4427_v47, %v4331_v54  ;;  %v4491_v35 = vrot.slane %v9479_v55, 1 }
 0x297   : > { %v4423_v26 = vmax.f32 %v4327_v49, %v4422_v21  ;;  %v4461_v22 = vsel %vm12538_vm4, %v4429_v63, %v4333_v23  ;;  %vm12766_vm2 = vnez %v12687_v11  ;;  %vm12774_vm1 = vnez %v12717_v8 }
 0x298   : > { %v2270_v8 = vmax.f32 %v12633_v36, %v8994_v28  ;;  %v11778_v28 = vrot.slane %v9488_v41, 6 }
 0x299   : > { %v4455_v2 = vsel %vm8143_vm0, %v4423_v26, %v4327_v49  ;;  %vm12759_vm0 = vcmp.lt.s32.totalorder %v6580_v24, 7 }
 0x29a   : > { %v4547_v26 = vsel %vm12759_vm0, %v4489_v58, %v4490_v4  ;;  %vm12760_vm3 = vmmov %vm12759_vm0 }
 0x29b   : > { %v4548_v59 = vsel %vm12760_vm3, %v4488_v45, %v4489_v58  ;;  %vm12761_vm8 = vmmov %vm12759_vm0  ;;  %v4553_v53 = vmax.f32 %v4457_v32, %v4547_v26  ;;  %v4618_v32 = vrot.slane %v9476_v0, 2  ;;  %vm12776_vm3 = vnez %v12719_v34 }
 0x29c   : > { %v4549_v47 = vsel %vm12761_vm8, %v11771_v7, %v4488_v45  ;;  %vm12762_vm4 = vmmov %vm12759_vm0  ;;  %v4552_v62 = vmax.f32 %v4424_v10, %v4548_v59  ;;  %vm12781_vm8 = vcmp.lt.s32.totalorder %v6580_v24, 2 }
 0x29d   : > { %v4544_v3 = vsel %vm12762_vm4, %v4492_v27, %v4493_v13  ;;  %vm12763_vm10 = vmmov %vm12759_vm0  ;;  %v4551_v23 = vmax.f32 %v4455_v2, %v4549_v47  ;;  %v4616_v2 = vrot.slane %v9470_v12, 2  ;;  %vm12783_vm4 = vcmp.lt.s32.totalorder %v6580_v24, 1 }
 0x29e   : > { %v4545_v49 = vsel %vm12763_vm10, %v4491_v35, %v4492_v27  ;;  %vm12764_vm15 = vmmov %vm12759_vm0  ;;  %v4556_v63 = vmax.f32 %v4428_v9, %v4544_v3  ;;  %v4584_v6 = vsel %vm12684_vm6, %v4552_v62, %v4424_v10  ;;  %v4622_v10 = vrot.slane %v9488_v41, 2 }
 0x29f   : > { %v4546_v54 = vsel %vm12764_vm15, %v4490_v4, %v4491_v35  ;;  %vm12765_vm5 = vmmov %vm12759_vm0  ;;  %v4555_v39 = vmax.f32 %v4459_v5, %v4545_v49  ;;  %v4617_v35 = vrot.slane %v9473_v42, 2  ;;  %v4619_v5 = vrot.slane %v9479_v55, 2 }
 0x2a0   : > { %v4543_v58 = vsel %vm12765_vm5, %v4493_v13, %v4494_v16  ;;  %v4554_v21 = vmax.f32 %v4426_v40, %v4546_v54  ;;  %v4588_v27 = vsel %vm12766_vm2, %v4556_v63, %v4428_v9  ;;  %v4621_v13 = vrot.slane %v9485_v56, 2  ;;  %vm12788_vm15 = vmmov %vm12781_vm8 }
 0x2a1   : > { %v4557_v45 = vmax.f32 %v4461_v22, %v4543_v58  ;;  %v4620_v22 = vrot.slane %v9482_v29, 2  ;;  %vm12767_vm6 = vcmp.lt.s32.totalorder %v6580_v24, 6  ;;  %vm12775_vm0 = vnez %v12714_v38  ;;  %vm12790_vm5 = vmmov %vm12783_vm4 }
 0x2a2   : > { %v4586_v4 = vsel %vm12686_vm12, %v4554_v21, %v4426_v40  ;;  %v4676_v46 = vsel %vm12767_vm6, %v4616_v2, %v4617_v35  ;;  %vm12768_vm12 = vmmov %vm12767_vm6  ;;  %vm12786_vm10 = vcmask 64512  }
 0x2a3   : > { %v4677_v19 = vsel %vm12768_vm12, %v11770_v37, %v4616_v2  ;;  %vm12769_vm11 = vmmov %vm12767_vm6  ;;  %v4680_v3 = vmax.f32 %v4584_v6, %v4676_v46 }
 0x2a4   : > { %v4673_v9 = vsel %vm12769_vm11, %v4619_v5, %v4620_v22  ;;  %vm12770_vm7 = vmmov %vm12767_vm6  ;;  %v9621_v26 = vmax.f32 %v4551_v23, %v4677_v19  ;;  %vm12794_vm11 = vcmp.lt.s32.totalorder %v6580_v24, 7 }
 0x2a5   : > { %v4674_v11 = vsel %vm12770_vm7, %v4618_v32, %v4619_v5  ;;  %vm12771_vm9 = vmmov %vm12767_vm6  ;;  %v9631_v58 = vmax.f32 %v4555_v39, %v4673_v9  ;;  %v9637_v23 = vsel %vm12774_vm1, %v4680_v3, %v4584_v6  ;;  %v12777_v6 = vmax.f32 %v12730_v61, %v8882_v50  ;;  %v12778_v9 = vld [vmem:[#allocation28_spill] sm:$0xff] }
 0x2a6   : > { %v4675_v40 = vsel %vm12771_vm9, %v4617_v35, %v4618_v32  ;;  %vm12772_vm14 = vmmov %vm12767_vm6  ;;  %v4682_v54 = vmax.f32 %v4586_v4, %v4674_v11  ;;  %v11772_v5 = vrot.slane %v9488_v41, 7 }
 0x2a7   : > { %v4671_v59 = vsel %vm12772_vm14, %v4621_v13, %v4622_v10  ;;  %vm12773_vm13 = vmmov %vm12767_vm6  ;;  %v9629_v49 = vmax.f32 %v4553_v53, %v4675_v40  ;;  %v2269_v53 = vmax.f32 %v12632_v44, %v12577_v33  ;;  %v3786_v35 = vmax.f32 %v12777_v6, %v8941_v14 }
 0x2a8   : > { %v4672_v47 = vsel %vm12773_vm13, %v4620_v22, %v4621_v13  ;;  %v9633_v21 = vmax.f32 %v4557_v45, %v4671_v59  ;;  %v9647_v39 = vsel %vm12775_vm0, %v4682_v54, %v4586_v4  ;;  %v2398_v4 = vmax.f32 %v2270_v8, %v12614_v57  ;;  %v12785_v8 = vld [vmem:[#allocation95_spill] sm:$0xff]  ;;  %vm12791_vm2 = vmmov %vm12786_vm10 }
 0x2a9   : > { %v4684_v62 = vmax.f32 %v4588_v27, %v4672_v47  ;;  %v4809_v63 = vmax.f32 %v9629_v49, %v9621_v26  ;;  %v4871_v2 = vmax.f32 %v9621_v26, %v9629_v49  ;;  %v4810_v32 = vmax.f32 %v9647_v39, %v9637_v23  ;;  %vm12792_vm6 = vmmov %vm12781_vm8 }
 0x2aa   : > { %v4872_v33 = vmax.f32 %v9637_v23, %v9647_v39  ;;  %v2397_v34 = vmax.f32 %v2269_v53, %v12613_v51  ;;  %v2526_v19 = vmax.f32 %v2398_v4, %v8047_v48  ;;  %v12780_v40 = vrot.slane %v9485_v56, 6  ;;  %vm12793_vm12 = vmmov %vm12783_vm4 }
 0x2ab   : > { %v9651_v45 = vsel %vm12776_vm3, %v4684_v62, %v4588_v27  ;;  %v4935_v38 = vmax.f32 %v4871_v2, %v9631_v58  ;;  %v3850_v27 = vmax.f32 %v3786_v35, %v12732_v31  ;;  %v9675_v46 = vmax.f32 %v4809_v63, %v9631_v58  ;;  %v12784_v62 = vld [vmem:[#allocation88_spill] sm:$0xff]  ;;  %vm12795_vm9 = vmmov %vm12794_vm11 }
 0x2ac   : > { %v9670_v50 = vmax.f32 %v4810_v32, %v9651_v45  ;;  %v4936_v22 = vmax.f32 %v4872_v33, %v9651_v45  ;;  %v2525_v13 = vmax.f32 %v2397_v34, %v8014_v43  ;;  %v4287_v59 = vsel %vm12781_vm8, %v12780_v40, %v11778_v28  ;;  %vm12796_vm14 = vmmov %vm12770_vm7 }
 0x2ad   : > { %v9679_v11 = vmax.f32 %v3850_v27, %v12778_v9  ;;  %v12782_v47 = vrot.slane %v9485_v56, 7  ;;  %v4302_v2 = vmax.f32 %v9488_v41, %v4287_v59  ;;  %v4937_v53 = vmax.f32 %v9675_v46, %v9633_v21  ;;  %v12802_v56 = vld [vmem:[#allocation57_spill] sm:$0xff]  ;;  %vm12804_vm1 = vmmov %vm12795_vm9 }
 0x2ae   : > { %v4999_v54 = vpack.c.bf16 %v4936_v22, %v4935_v38  ;;  %v9694_v63 = vmax.f32 %v2525_v13, %v12784_v62  ;;  %v9700_v6 = vmax.f32 %v2526_v19, %v12785_v8  ;;  %v2271_v33 = vmax.f32 %v8014_v43, %v12613_v51  ;;  %vm12811_vm8 = vmmov %vm12770_vm7 }
 0x2af   : > { %12779 = vst [vmem:[#allocation66_spill] sm:$0xff] %v9679_v11  ;;  %v4415_v3 = vsel %vm12783_vm4, %v12782_v47, %v11772_v5  ;;  %v11777_v35 = vrot.slane %v9679_v11, 1  ;;  %v11781_v32 = vrot.slane %v9679_v11, 2  ;;  %v12787_v43 = vrot.slane %v9226_v60, 6  ;;  %vm12814_vm4 = vmmov %vm12770_vm7 }
 0x2b0   : > { %6032 = vmatprep.mubr.msk.bf16.mxu0 %vm12786_vm10, %v4999_v54  ;;  %v3224_v38 = vrot.slane %v9694_v63, 6  ;;  %v3352_v34 = vrot.slane %v9694_v63, 7  ;;  %v11776_v4 = vrot.slane %v9694_v63, 1  ;;  %v11775_v27 = vrot.slane %v9694_v63, 2 }
 0x2b1   : > { %v2770_v22 = vpack.c.bf16 %v9700_v6, %v9694_v63  ;;  %v3225_v13 = vrot.slane %v9700_v6, 6  ;;  %v3353_v46 = vrot.slane %v9700_v6, 7  ;;  %v11774_v19 = vrot.slane %v9700_v6, 1 }
 0x2b2   : > { %v3243_v51 = vsel %vm12788_vm15, %v12787_v43, %v3224_v38  ;;  %v12789_v40 = vrot.slane %v9226_v60, 7  ;;  %v11773_v47 = vrot.slane %v9700_v6, 2  ;;  %v4430_v54 = vmax.f32 %v4302_v2, %v4415_v3 }
 0x2b3   : > { %5951 = vmatmul.mubr.msk.bf16.gmra.mxu1 %vm12791_vm2, %v2770_v22  ;;  %v3242_v37 = vsel %vm12792_vm6, %v3224_v38, %v3225_v13  ;;  %v3288_v7 = vmax.f32 %v9694_v63, %v3243_v51  ;;  %v3370_v5 = vsel %vm12793_vm12, %v3352_v34, %v3353_v46  ;;  %v3498_v43 = vsel %vm12794_vm11, %v11776_v4, %v11774_v19  ;;  %v12797_v38 = vld [vmem:[#allocation69_spill] sm:$0xff]  ;;  %vm12822_vm2 = vmmov %vm12792_vm6 }
 0x2b4   : > { %v3371_v59 = vsel %vm12790_vm5, %v12789_v40, %v3352_v34  ;;  %v3289_v40 = vmax.f32 %v9700_v6, %v3242_v37  ;;  %v3626_v3 = vsel %vm12770_vm7, %v11775_v27, %v11773_v47  ;;  %v4542_v2 = vsel %vm12795_vm9, %v4494_v16, %v11777_v35  ;;  %v12799_v16 = vld [vmem:[#allocation43_spill] sm:$0xff]  ;;  %v12800_v35 = vld [vmem:[#allocation40_spill] sm:$0xff]  ;;  %vm12823_vm6 = vmmov %vm12793_vm12 }
 0x2b5   : > { %v4670_v37 = vsel %vm12796_vm14, %v4622_v10, %v11781_v32  ;;  %vm12798_vm13 = vnez %v12797_v38  ;;  %v4558_v22 = vmax.f32 %v4430_v54, %v4542_v2  ;;  %v2272_v51 = vmax.f32 %v8047_v48, %v12614_v57  ;;  %vm12827_vm7 = vmmov %vm12822_vm2 }
 0x2b6   : > { %v3320_v34 = vsel %vm12798_vm13, %v3288_v7, %v9694_v63  ;;  %v2399_v47 = vmax.f32 %v2271_v33, %v12632_v44  ;;  %v9762_v27 = vmax.f32 %v3289_v40, %v3370_v5  ;;  %v3612_v4 = vrot.slane %v12799_v16, 2  ;;  %v12806_v44 = vld [vmem:[#allocation87_spill] sm:$0xff]  ;;  %vm12828_vm9 = vmmov %vm12822_vm2 }
 0x2b7   : > { %v3416_v19 = vmax.f32 %v3320_v34, %v3371_v59  ;;  %v12801_v28 = vrot.slane %v12800_v35, 1  ;;  %v12803_v29 = vrot.slane %v12802_v56, 1  ;;  %vm12805_vm0 = vnez %v12689_v1  ;;  %v12807_v5 = vld [vmem:[#allocation75_spill] sm:$0xff] }
 0x2b8   : > { %v4590_v7 = vsel %vm12805_vm0, %v4558_v22, %v4430_v54  ;;  %v2400_v2 = vmax.f32 %v2272_v51, %v12633_v36  ;;  %v2527_v48 = vmax.f32 %v2399_v47, %v12784_v62  ;;  %vm12808_vm3 = vnez %v12807_v5  ;;  %v12809_v40 = vld [vmem:[#allocation103_spill] sm:$0xff]  ;;  %v12815_v47 = vld [vmem:[#allocation12_spill] sm:$0xff]  ;;  %v12819_v22 = vld [vmem:[#allocation65_spill] sm:$0xff] }
 0x2b9   : > { %v3507_v10 = vsel %vm12804_vm1, %v12803_v29, %v12801_v28  ;;  %v3448_v33 = vsel %vm12808_vm3, %v3416_v19, %v3320_v34  ;;  %v4686_v59 = vmax.f32 %v4590_v7, %v4670_v37  ;;  %v12810_v32 = vrot.slane %v12809_v40, 2  ;;  %v12816_v19 = vld [vmem:[#allocation99_spill] sm:$0xff]  ;;  %vm12832_vm1 = vmmov %vm12823_vm6 }
 0x2ba   : > { %v3535_v57 = vmax.f32 %v12806_v44, %v3507_v10  ;;  %v12812_v29 = vrot.slane %v12800_v35, 2  ;;  %v12813_v1 = vrot.slane %v12802_v56, 2  ;;  %v3544_v28 = vmax.f32 %v3448_v33, %v3498_v43  ;;  %vm12833_vm0 = vmmov %vm12832_vm1 }
 0x2bb   : > { %v9782_v38 = vsel %vm12811_vm8, %v3612_v4, %v12810_v32  ;;  %v2528_v62 = vmax.f32 %v2400_v2, %v12785_v8  ;;  %v9792_v54 = vmax.f32 %v2527_v48, %v12815_v47  ;;  %vm12817_vm10 = vnez %v12816_v19  ;;  %v12820_v48 = vld [vmem:[#allocation101_spill] sm:$0xff] }
 0x2bc   : > { %v3635_v36 = vsel %vm12814_vm4, %v12813_v1, %v12812_v29  ;;  %v3567_v37 = vsel %vm12817_vm10, %v3535_v57, %v12806_v44  ;;  %vm12818_vm15 = vnez %v12721_v18  ;;  %v3723_v56 = vmax.f32 %v9442_v20, %v9432_v15 }
 0x2bd   : > { %v9799_v32 = vsel %vm12818_vm15, %v4686_v59, %v4590_v7  ;;  %v3663_v35 = vmax.f32 %v3567_v37, %v3635_v36  ;;  %v3724_v43 = vmax.f32 %v12732_v31, %v8941_v14  ;;  %v9805_v34 = vmax.f32 %v3544_v28, %v3626_v3 }
 0x2be   : > { %v4938_v8 = vmax.f32 %v9670_v50, %v9799_v32  ;;  %v2656_v51 = vmax.f32 %v2528_v62, %v12819_v22  ;;  %v3226_v10 = vrot.slane %v9792_v54, 6  ;;  %v3354_v18 = vrot.slane %v9792_v54, 7 }
 0x2bf   : > { %v11783_v7 = vrot.slane %v9792_v54, 1  ;;  %v11782_v2 = vrot.slane %v9792_v54, 2  ;;  %vm12821_vm5 = vnez %v12820_v48  ;;  %vm12824_vm12 = vcmask 64512  }
 0x2c0   : > { %v9816_v15 = vsel %vm12821_vm5, %v3663_v35, %v3567_v37  ;;  %v5000_v14 = vpack.c.bf16 %v4938_v8, %v4937_v53  ;;  %v2771_v3 = vpack.c.bf16 %v2656_v51, %v9792_v54  ;;  %v3227_v44 = vrot.slane %v2656_v51, 6  ;;  %vm12825_vm11 = vmmov %vm12824_vm12 }
 0x2c1   : > { %v3241_v50 = vsel %vm12822_vm2, %v3225_v13, %v3226_v10  ;;  %v3355_v33 = vrot.slane %v2656_v51, 7  ;;  %v3369_v59 = vsel %vm12823_vm6, %v3353_v46, %v3354_v18  ;;  %v3483_v29 = vrot.slane %v2656_v51, 1  ;;  %v12829_v46 = vld [vmem:[#allocation13_spill] sm:$0xff] }
 0x2c2   : > { %v3290_v57 = vmax.f32 %v9792_v54, %v3241_v50  ;;  %6033 = vmatmul.mubr.msk.bf16.vlgmr.msra.gmra.mxu0 %vm12824_vm12, %v5000_v14  ;;  %5954 = vmatprep.mubr.msk.bf16.mxu1 %vm12825_vm11, %v2771_v3  ;;  %v12826_v1 = vrot.slane %v12799_v16, 6  ;;  %v3240_v36 = vsel %vm12828_vm9, %v3226_v10, %v3227_v44  ;;  %v3611_v13 = vrot.slane %v2656_v51, 2  ;;  %v12837_v3 = vld [vmem:[#allocation17_spill] sm:$0xff] }
 0x2c3   : > { %v3787_v28 = vmax.f32 %v3723_v56, %v9436_v25  ;;  %v3291_v62 = vmax.f32 %v2656_v51, %v3240_v36  ;;  %vm12830_vm14 = vnez %v12829_v46  ;;  %v12831_v35 = vrot.slane %v12799_v16, 7  ;;  %v12868_v46 = vld [vmem:[#allocation37_spill] sm:$0xff] }
 0x2c4   : > { %v3239_v53 = vsel %vm12827_vm7, %v3227_v44, %v12826_v1  ;;  %v3322_v37 = vsel %vm12830_vm14, %v3290_v57, %v9792_v54  ;;  %v3368_v22 = vsel %vm12833_vm0, %v3354_v18, %v3355_v33  ;;  %v12834_v10 = vrot.slane %v12799_v16, 1 }
 0x2c5   : > { %v3292_v47 = vmax.f32 %v12799_v16, %v3239_v53  ;;  %v3367_v8 = vsel %vm12832_vm1, %v3355_v33, %v12831_v35  ;;  %v3418_v14 = vmax.f32 %v3322_v37, %v3369_v59  ;;  %vm12835_vm8 = vcmp.lt.s32.totalorder %v6580_v24, 7  ;;  %v12841_v59 = vld [vmem:[#allocation85_spill] sm:$0xff]  ;;  %v12843_v35 = vld [vmem:[#allocation86_spill] sm:$0xff]  ;;  %vm12854_vm1 = vmmov %vm12833_vm0 }
 0x2c6   : > { %v3495_v56 = vsel %vm12835_vm8, %v3483_v29, %v12834_v10  ;;  %vm12836_vm4 = vmmov %vm12835_vm8  ;;  %vm12838_vm15 = vnez %v12837_v3  ;;  %v3419_v50 = vmax.f32 %v3291_v62, %v3368_v22  ;;  %vm12839_vm2 = vcmp.lt.s32.totalorder %v6580_v24, 6 }
 0x2c7   : > { %v3496_v51 = vsel %vm12836_vm4, %v11783_v7, %v3483_v29  ;;  %v3324_v44 = vsel %vm12838_vm15, %v3292_v47, %v12799_v16  ;;  %v9856_v57 = vsel %vm12839_vm2, %v3611_v13, %v3612_v4  ;;  %vm12840_vm6 = vmmov %vm12839_vm2  ;;  %vm12842_vm12 = vnez %v12841_v59 }
 0x2c8   : > { %v3624_v18 = vsel %vm12840_vm6, %v11782_v2, %v3611_v13  ;;  %v3420_v33 = vmax.f32 %v3324_v44, %v3367_v8  ;;  %v3450_v1 = vsel %vm12842_vm12, %v3418_v14, %v3322_v37  ;;  %v3788_v29 = vmax.f32 %v3724_v43, %v12730_v61  ;;  %v12846_v43 = vld [vmem:[#allocation49_spill] sm:$0xff]  ;;  %vm12855_vm0 = vmmov %vm12828_vm9 }
 0x2c9   : > { %v3851_v53 = vmax.f32 %v3787_v28, %v9426_v17  ;;  %v3546_v36 = vmax.f32 %v3450_v1, %v3496_v51  ;;  %v3547_v47 = vmax.f32 %v3419_v50, %v3495_v56  ;;  %v4239_v62 = vrot.slane %v9679_v11, 6  ;;  %v12847_v28 = vld [vmem:[#allocation25_spill] sm:$0xff]  ;;  %v12850_v1 = vld [vmem:[#allocation78_spill] sm:$0xff]  ;;  %vm12858_vm4 = vmmov %vm12854_vm1 }
 0x2ca   : > { %v4367_v4 = vrot.slane %v9679_v11, 7  ;;  %vm12844_vm11 = vnez %v12843_v35  ;;  %v3852_v10 = vmax.f32 %v3788_v29, %v12778_v9  ;;  %v4747_v37 = vmax.f32 %v9631_v58, %v9621_v26  ;;  %v12864_v35 = vld [vmem:[#allocation18_spill] sm:$0xff] }
 0x2cb   : > { %v3452_v22 = vsel %vm12844_vm11, %v3420_v33, %v3324_v44  ;;  %v9872_v13 = vmax.f32 %v3851_v53, %v9816_v15  ;;  %vm12848_vm7 = vnez %v12847_v28  ;;  %v9881_v56 = vmax.f32 %v3546_v36, %v3624_v18 }
 0x2cc   : > { %v3548_v8 = vmax.f32 %v3452_v22, %v12846_v43  ;;  %v9879_v14 = vsel %vm12848_vm7, %v3547_v47, %v3419_v50  ;;  %v12849_v51 = vrot.slane %v9488_v41, 6  ;;  %v9890_v29 = vmax.f32 %v3852_v10, %v12850_v1  ;;  %v12856_v43 = vld [vmem:[#allocation15_spill] sm:$0xff] }
 0x2cd   : > { %12845 = vst [vmem:[#allocation38_spill] sm:$0xff] %v9872_v13  ;;  %v4240_v26 = vrot.slane %v9872_v13, 6  ;;  %v4368_v18 = vrot.slane %v9872_v13, 7  ;;  %v12853_v36 = vrot.slane %v9488_v41, 7  ;;  %v4496_v22 = vrot.slane %v9872_v13, 1 }
 0x2ce   : > { %v4286_v44 = vsel %vm12828_vm9, %v12849_v51, %v4239_v62  ;;  %12851 = vst [vmem:[#allocation32_spill] sm:$0xff] %v9890_v29  ;;  %v9895_v50 = vmax.f32 %v3548_v8, %v9782_v38  ;;  %vm12857_vm8 = vnez %v12856_v43  ;;  %v4624_v38 = vrot.slane %v9872_v13, 2 }
 0x2cf   : > { %v4303_v53 = vmax.f32 %v9679_v11, %v4286_v44  ;;  %v4414_v47 = vsel %vm12854_vm1, %v12853_v36, %v4367_v4  ;;  %v4285_v10 = vsel %vm12855_vm0, %v4239_v62, %v4240_v26  ;;  %v11784_v44 = vrot.slane %v9890_v29, 1 }
 0x2d0   : > { %12852 = vst [vmem:[#allocation50_spill] sm:$0xff] %v9895_v50  ;;  %v4304_v8 = vmax.f32 %v9872_v13, %v4285_v10  ;;  %v4413_v33 = vsel %vm12858_vm4, %v4367_v4, %v4368_v18  ;;  %v12859_v36 = vrot.slane %v9679_v11, 1  ;;  %vm12860_vm2 = vcmp.lt.s32.totalorder %v6580_v24, 7 }
 0x2d1   : > { %v4335_v51 = vsel %vm12857_vm8, %v4303_v53, %v9679_v11  ;;  %vm12861_vm6 = vmmov %vm12860_vm2  ;;  %v4625_v53 = vrot.slane %v9890_v29, 2  ;;  %v12862_v43 = vrot.slane %v9679_v11, 2  ;;  %vm12863_vm9 = vcmp.lt.s32.totalorder %v6580_v24, 6 }
 0x2d2   : > { %v4431_v2 = vmax.f32 %v4335_v51, %v4414_v47  ;;  %v4541_v7 = vsel %vm12860_vm2, %v12859_v36, %v4496_v22  ;;  %v4540_v62 = vsel %vm12861_vm6, %v4496_v22, %v11784_v44  ;;  %v4748_v4 = vmax.f32 %v9651_v45, %v9637_v23  ;;  %vm12866_vm0 = vmmov %vm12863_vm9 }
 0x2d3   : > { %v4669_v10 = vsel %vm12863_vm9, %v12862_v43, %v4624_v38  ;;  %v4432_v47 = vmax.f32 %v4304_v8, %v4413_v33  ;;  %vm12865_vm1 = vnez %v12864_v35  ;;  %v4811_v36 = vmax.f32 %v4747_v37, %v9629_v49  ;;  %vm12870_vm8 = vmmov %vm12860_vm2  ;;  %v12872_v37 = vld [vmem:[#allocation35_spill] sm:$0xff] }
 0x2d4   : > { %v4463_v3 = vsel %vm12865_vm1, %v4431_v2, %v4335_v51  ;;  %v2772_v28 = vpack.c.bf16 %v12809_v40, %v12799_v16  ;;  %v4668_v44 = vsel %vm12866_vm0, %v4624_v38, %v4625_v53  ;;  %v4812_v59 = vmax.f32 %v4748_v4, %v9647_v39  ;;  %vm12875_vm2 = vmmov %vm12866_vm0 }
 0x2d5   : > { %v4559_v22 = vmax.f32 %v4463_v3, %v4541_v7  ;;  %v12867_v43 = vrot.slane %v9152_v30, 1  ;;  %v12869_v13 = vrot.slane %v12868_v46, 1  ;;  %v4560_v35 = vmax.f32 %v4432_v47, %v4540_v62 }
 0x2d6   : > { %v4875_v2 = vmax.f32 %v4811_v36, %v9633_v21  ;;  %vm12871_vm4 = vcmask 64512   ;;  %v12873_v40 = vrot.slane %v9152_v30, 2  ;;  %v12874_v7 = vrot.slane %v12868_v46, 2  ;;  %v12878_v30 = vld [vmem:[#allocation89_spill] sm:$0xff] }
 0x2d7   : > { %v3505_v23 = vsel %vm12870_vm8, %v12869_v13, %v12867_v43  ;;  %5955 = vmatmul.mubr.msk.bf16.gmra.mxu1 %vm12871_vm4, %v2772_v28  ;;  %v9951_v33 = vmax.f32 %v4559_v22, %v4669_v10  ;;  %v4876_v51 = vmax.f32 %v4812_v59, %v9799_v32  ;;  %v3725_v13 = vmax.f32 %v9426_v17, %v9436_v25  ;;  %v12876_v28 = vld [vmem:[#allocation9_spill] sm:$0xff] }
 0x2d8   : > { %v3537_v16 = vmax.f32 %v12872_v37, %v3505_v23  ;;  %v3633_v3 = vsel %vm12875_vm2, %v12874_v7, %v12873_v40  ;;  %v3726_v38 = vmax.f32 %v12778_v9, %v12730_v61  ;;  %vm12877_vm6 = vnez %v12876_v28  ;;  %v12882_v23 = vld [vmem:[#allocation10_spill] sm:$0xff]  ;;  %v12890_v28 = vld [vmem:[#allocation105_spill] sm:$0xff] }
 0x2d9   : > { %v4592_v8 = vsel %vm12877_vm6, %v4560_v35, %v4432_v47  ;;  %vm12879_vm9 = vnez %v12878_v30  ;;  %v4241_v62 = vrot.slane %v9890_v29, 6  ;;  %v4369_v10 = vrot.slane %v9890_v29, 7  ;;  %v12976_v30 = vld [vmem:[#allocation34_spill] sm:$0xff] }
 0x2da   : > { %v3569_v46 = vsel %vm12879_vm9, %v3537_v16, %v12872_v37  ;;  %v4688_v4 = vmax.f32 %v4592_v8, %v4668_v44  ;;  %v4939_v59 = vmax.f32 %v4875_v2, %v9951_v33  ;;  %v3789_v25 = vmax.f32 %v3725_v13, %v9442_v20  ;;  %v12884_v44 = vld [vmem:[#allocation91_spill] sm:$0xff] }
 0x2db   : > { %v3665_v36 = vmax.f32 %v3569_v46, %v3633_v3  ;;  %v3790_v22 = vmax.f32 %v3726_v38, %v12732_v31  ;;  %vm12880_vm1 = vcmp.lt.s32.totalorder %v6580_v24, 2  ;;  %vm12881_vm0 = vcmp.lt.s32.totalorder %v6580_v24, 1  ;;  %v12887_v3 = vld [vmem:[#allocation16_spill] sm:$0xff] }
 0x2dc   : > { %v4284_v61 = vsel %vm12880_vm1, %v4240_v26, %v4241_v62  ;;  %v4412_v47 = vsel %vm12881_vm0, %v4368_v18, %v4369_v10  ;;  %v4749_v43 = vmax.f32 %v9633_v21, %v9629_v49  ;;  %vm12883_vm8 = vnez %v12882_v23  ;;  %v12889_v38 = vld [vmem:[#allocation104_spill] sm:$0xff] }
 0x2dd   : > { %v9976_v35 = vsel %vm12883_vm8, %v4688_v4, %v4592_v8  ;;  %vm12885_vm4 = vnez %v12884_v44  ;;  %v3853_v37 = vmax.f32 %v3789_v25, %v9816_v15  ;;  %v4305_v16 = vmax.f32 %v9890_v29, %v4284_v61 }
 0x2de   : > { %v9980_v2 = vsel %vm12885_vm4, %v3665_v36, %v3569_v46  ;;  %v4940_v26 = vmax.f32 %v4876_v51, %v9976_v35  ;;  %v3854_v40 = vmax.f32 %v3790_v22, %v12850_v1  ;;  %v4750_v18 = vmax.f32 %v9799_v32, %v9647_v39  ;;  %v12891_v46 = vld [vmem:[#allocation21_spill] sm:$0xff]  ;;  %v12893_v51 = vld [vmem:[#allocation24_spill] sm:$0xff]  ;;  %v12896_v22 = vld [vmem:[#allocation83_spill] sm:$0xff] }
 0x2df   : > { %v4813_v49 = vmax.f32 %v4749_v43, %v9631_v58  ;;  %v9990_v7 = vmax.f32 %v3853_v37, %v9980_v2  ;;  %vm12888_vm2 = vnez %v12887_v3  ;;  %v2773_v8 = vpack.c.bf16 %v12890_v28, %v12889_v38  ;;  %v12900_v28 = vld [vmem:[#allocation19_spill] sm:$0xff] }
 0x2e0   : > { %v4337_v13 = vsel %vm12888_vm2, %v4305_v16, %v9890_v29  ;;  %v12892_v4 = vrot.slane %v12891_v46, 1  ;;  %v12894_v36 = vrot.slane %v12893_v51, 1  ;;  %vm12895_vm6 = vcmp.lt.s32.totalorder %v6580_v24, 7 }
 0x2e1   : > { %12886 = vst [vmem:[#allocation68_spill] sm:$0xff] %v9990_v7  ;;  %v5001_v39 = vpack.c.bf16 %v4940_v26, %v4939_v59  ;;  %v10004_v61 = vmax.f32 %v3854_v40, %v12896_v22  ;;  %v4433_v43 = vmax.f32 %v4337_v13, %v4412_v47  ;;  %v4814_v23 = vmax.f32 %v4750_v18, %v9651_v45 }
 0x2e2   : > { %v3503_v25 = vsel %vm12895_vm6, %v12894_v36, %v12892_v4  ;;  %v4242_v37 = vrot.slane %v9990_v7, 6  ;;  %v4370_v16 = vrot.slane %v9990_v7, 7  ;;  %v4498_v3 = vrot.slane %v9990_v7, 1 }
 0x2e3   : > { %12897 = vst [vmem:[#allocation7_spill] sm:$0xff] %v10004_v61  ;;  %v4626_v38 = vrot.slane %v9990_v7, 2  ;;  %vm12898_vm1 = vcmask 64512   ;;  %vm12901_vm8 = vnez %v12900_v28  ;;  %v4499_v26 = vrot.slane %v10004_v61, 1 }
 0x2e4   : > { %5958 = vmatprep.mubr.msk.bf16.mxu1 %vm12898_vm1, %v2773_v8  ;;  %vm12899_vm0 = vmmov %vm12898_vm1  ;;  %v4465_v59 = vsel %vm12901_vm8, %v4433_v43, %v4337_v13  ;;  %v4627_v47 = vrot.slane %v10004_v61, 2  ;;  %v4877_v40 = vmax.f32 %v4813_v49, %v9951_v33  ;;  %vm12902_vm2 = vcmp.lt.s32.totalorder %v6580_v24, 2 }
 0x2e5   : > { %6036 = vmatprep.mubr.msk.bf16.mxu0 %vm12899_vm0, %v5001_v39  ;;  %v4283_v18 = vsel %vm12902_vm2, %v4241_v62, %v4242_v37  ;;  %vm12903_vm6 = vcmp.lt.s32.totalorder %v6580_v24, 1  ;;  %v12904_v36 = vrot.slane %v9890_v29, 1  ;;  %vm12905_vm1 = vcmp.lt.s32.totalorder %v6580_v24, 7 }
 0x2e6   : > { %v4411_v4 = vsel %vm12903_vm6, %v4369_v10, %v4370_v16  ;;  %vm12906_vm0 = vcmp.lt.s32.totalorder %v6580_v24, 6  ;;  %v4306_v39 = vmax.f32 %v9990_v7, %v4283_v18  ;;  %vm12907_vm8 = vmmov %vm12905_vm1  ;;  %v4878_v28 = vmax.f32 %v4814_v23, %v9976_v35  ;;  %v12909_v10 = vld [vmem:[#allocation6_spill] sm:$0xff] }
 0x2e7   : > { %v4539_v8 = vsel %vm12905_vm1, %v12904_v36, %v4498_v3  ;;  %v4667_v13 = vsel %vm12906_vm0, %v4625_v53, %v4626_v38  ;;  %v4538_v43 = vsel %vm12907_vm8, %v4498_v3, %v4499_v26  ;;  %vm12908_vm11 = vmmov %vm12906_vm0  ;;  %v3539_v11 = vmax.f32 %v12909_v10, %v3503_v25  ;;  %v12913_v25 = vld [vmem:[#allocation52_spill] sm:$0xff] }
 0x2e8   : > { %v4561_v49 = vmax.f32 %v4465_v59, %v4539_v8  ;;  %v4666_v62 = vsel %vm12908_vm11, %v4626_v38, %v4627_v47  ;;  %v12910_v29 = vrot.slane %v12891_v46, 2  ;;  %v12911_v36 = vrot.slane %v12893_v51, 2  ;;  %vm12912_vm2 = vmmov %vm12906_vm0 }
 0x2e9   : > { %v3727_v18 = vmax.f32 %v9816_v15, %v9442_v20  ;;  %v4434_v7 = vmax.f32 %v4306_v39, %v4411_v4  ;;  %v3728_v38 = vmax.f32 %v12850_v1, %v12732_v31  ;;  %v4243_v23 = vrot.slane %v10004_v61, 6 }
 0x2ea   : > { %v3631_v53 = vsel %vm12912_vm2, %v12911_v36, %v12910_v29  ;;  %v10043_v3 = vmax.f32 %v4561_v49, %v4667_v13  ;;  %vm12914_vm11 = vnez %v12913_v25  ;;  %v4371_v59 = vrot.slane %v10004_v61, 7 }
 0x2eb   : > { %v3571_v46 = vsel %vm12914_vm11, %v3539_v11, %v12909_v10  ;;  %v3791_v51 = vmax.f32 %v3727_v18, %v9426_v17  ;;  %v4751_v29 = vmax.f32 %v9951_v33, %v9631_v58  ;;  %v4562_v20 = vmax.f32 %v4434_v7, %v4538_v43  ;;  %v12917_v10 = vld [vmem:[#allocation29_spill] sm:$0xff] }
 0x2ec   : > { %v4941_v4 = vmax.f32 %v4877_v40, %v10043_v3  ;;  %v3667_v8 = vmax.f32 %v3571_v46, %v3631_v53  ;;  %v3792_v13 = vmax.f32 %v3728_v38, %v12778_v9  ;;  %vm12915_vm6 = vcmp.lt.s32.totalorder %v6580_v24, 2  ;;  %v12919_v43 = vld [vmem:[#allocation73_spill] sm:$0xff] }
 0x2ed   : > { %v3855_v31 = vmax.f32 %v3791_v51, %v9980_v2  ;;  %v4282_v39 = vsel %vm12915_vm6, %v4242_v37, %v4243_v23  ;;  %vm12916_vm1 = vcmp.lt.s32.totalorder %v6580_v24, 1  ;;  %v4752_v49 = vmax.f32 %v9976_v35, %v9651_v45  ;;  %v12921_v45 = vld [vmem:[#allocation81_spill] sm:$0xff] }
 0x2ee   : > { %v4410_v11 = vsel %vm12916_vm1, %v4370_v16, %v4371_v59  ;;  %vm12918_vm0 = vnez %v12917_v10  ;;  %vm12920_vm8 = vnez %v12919_v43  ;;  %v3856_v36 = vmax.f32 %v3792_v13, %v12896_v22  ;;  %v12926_v10 = vld [vmem:[#allocation80_spill] sm:$0xff] }
 0x2ef   : > { %v4594_v58 = vsel %vm12918_vm0, %v4562_v20, %v4434_v7  ;;  %v10068_v40 = vsel %vm12920_vm8, %v3667_v8, %v3571_v46  ;;  %v4307_v53 = vmax.f32 %v10004_v61, %v4282_v39  ;;  %v4815_v16 = vmax.f32 %v4751_v29, %v9633_v21  ;;  %v12922_v7 = vld [vmem:[#allocation94_spill] sm:$0xff]  ;;  %v12925_v8 = vld [vmem:[#allocation41_spill] sm:$0xff]  ;;  %v12931_v29 = vld [vmem:[#allocation60_spill] sm:$0xff] }
 0x2f0   : > { %v4690_v18 = vmax.f32 %v4594_v58, %v4666_v62  ;;  %v10073_v37 = vmax.f32 %v3855_v31, %v10068_v40  ;;  %v4816_v38 = vmax.f32 %v4752_v49, %v9799_v32  ;;  %v10078_v51 = vmax.f32 %v3856_v36, %v12921_v45  ;;  %v12924_v20 = vld [vmem:[#allocation102_spill] sm:$0xff]  ;;  %v12928_v62 = vld [vmem:[#allocation100_spill] sm:$0xff] }
 0x2f1   : > { %vm12923_vm2 = vnez %v12922_v7  ;;  %v2774_v13 = vpack.c.bf16 %v12925_v8, %v12924_v20  ;;  %v12927_v39 = vrot.slane %v12926_v10, 1  ;;  %v12929_v5 = vrot.slane %v12928_v62, 1  ;;  %v13002_v43 = vld [vmem:[#allocation48_spill] sm:$0xff] }
 0x2f2   : > { %v4339_v46 = vsel %vm12923_vm2, %v4307_v53, %v10004_v61  ;;  %vm12930_vm6 = vcmp.lt.s32.totalorder %v6580_v24, 7  ;;  %vm12932_vm1 = vnez %v12931_v29  ;;  %v4244_v36 = vrot.slane %v10073_v37, 6 }
 0x2f3   : > { %v3501_v31 = vsel %vm12930_vm6, %v12929_v5, %v12927_v39  ;;  %v10093_v49 = vsel %vm12932_vm1, %v4690_v18, %v4594_v58  ;;  %v4372_v50 = vrot.slane %v10073_v37, 7  ;;  %v4435_v7 = vmax.f32 %v4339_v46, %v4410_v11  ;;  %v12936_v18 = vld [vmem:[#allocation58_spill] sm:$0xff] }
 0x2f4   : > { %v4942_v53 = vmax.f32 %v4878_v28, %v10093_v49  ;;  %v4500_v20 = vrot.slane %v10073_v37, 1  ;;  %v4501_v8 = vrot.slane %v10078_v51, 1  ;;  %v4628_v61 = vrot.slane %v10073_v37, 2 }
 0x2f5   : > { %vm12933_vm0 = vcmask 64512   ;;  %vm12934_vm2 = vcmp.lt.s32.totalorder %v6580_v24, 2  ;;  %vm12935_vm6 = vcmp.lt.s32.totalorder %v6580_v24, 1  ;;  %vm12937_vm1 = vnez %v12936_v18 }
 0x2f6   : > { %5959 = vmatmul.mubr.msk.bf16.gmra.mxu1 %vm12933_vm0, %v2774_v13  ;;  %v4281_v5 = vsel %vm12934_vm2, %v4243_v23, %v4244_v36  ;;  %v4409_v58 = vsel %vm12935_vm6, %v4371_v59, %v4372_v50  ;;  %v4467_v39 = vsel %vm12937_vm1, %v4435_v7, %v4339_v46  ;;  %v4629_v11 = vrot.slane %v10078_v51, 2 }
 0x2f7   : > { %v5002_v28 = vpack.c.bf16 %v4942_v53, %v4941_v4  ;;  %v4308_v29 = vmax.f32 %v10073_v37, %v4281_v5  ;;  %vm12938_vm15 = vcmp.lt.s32.totalorder %v6580_v24, 7  ;;  %vm12940_vm2 = vcmp.lt.s32.totalorder %v6580_v24, 6  ;;  %v12943_v5 = vld [vmem:[#allocation63_spill] sm:$0xff] }
 0x2f8   : > { %v4536_v41 = vsel %vm12938_vm15, %v4500_v20, %v4501_v8  ;;  %vm12939_vm0 = vmmov %vm12938_vm15  ;;  %v4664_v59 = vsel %vm12940_vm2, %v4628_v61, %v4629_v11  ;;  %v4879_v4 = vmax.f32 %v4815_v16, %v10043_v3  ;;  %vm12942_vm1 = vcmask 64512  }
 0x2f9   : > { %v4537_v13 = vsel %vm12939_vm0, %v4499_v26, %v4500_v20  ;;  %vm12941_vm6 = vmmov %vm12940_vm2  ;;  %6037 = vmatmul.mubr.msk.bf16.gmra.mxu0 %vm12942_vm1, %v5002_v28  ;;  %v4436_v7 = vmax.f32 %v4308_v29, %v4409_v58  ;;  %v4880_v53 = vmax.f32 %v4816_v38, %v10093_v49  ;;  %v3541_v18 = vmax.f32 %v12943_v5, %v3501_v31  ;;  %v12947_v31 = vld [vmem:[#allocation71_spill] sm:$0xff] }
 0x2fa   : > { %v4563_v23 = vmax.f32 %v4467_v39, %v4537_v13  ;;  %v4665_v46 = vsel %vm12941_vm6, %v4627_v47, %v4628_v61  ;;  %v12944_v26 = vrot.slane %v12926_v10, 2  ;;  %v12945_v20 = vrot.slane %v12928_v62, 2  ;;  %vm12946_vm15 = vmmov %vm12940_vm2 }
 0x2fb   : > { %v3729_v61 = vmax.f32 %v9980_v2, %v9426_v17  ;;  %v3730_v47 = vmax.f32 %v12896_v22, %v12778_v9  ;;  %v4245_v16 = vrot.slane %v10078_v51, 6  ;;  %v4564_v38 = vmax.f32 %v4436_v7, %v4536_v41 }
 0x2fc   : > { %v3629_v39 = vsel %vm12946_vm15, %v12945_v20, %v12944_v26  ;;  %v10132_v13 = vmax.f32 %v4563_v23, %v4665_v46  ;;  %vm12948_vm0 = vnez %v12947_v31  ;;  %v4373_v62 = vrot.slane %v10078_v51, 7 }
 0x2fd   : > { %v3573_v10 = vsel %vm12948_vm0, %v3541_v18, %v12943_v5  ;;  %v4753_v58 = vmax.f32 %v10043_v3, %v9633_v21  ;;  %v3793_v17 = vmax.f32 %v3729_v61, %v9816_v15  ;;  %v3794_v23 = vmax.f32 %v3730_v47, %v12850_v1  ;;  %v12951_v18 = vld [vmem:[#allocation20_spill] sm:$0xff] }
 0x2fe   : > { %v4943_v28 = vmax.f32 %v4879_v4, %v10132_v13  ;;  %v3669_v29 = vmax.f32 %v3573_v10, %v3629_v39  ;;  %v4596_v9 = vsel %vm12817_vm10, %v4564_v38, %v4436_v7  ;;  %vm12949_vm2 = vcmp.lt.s32.totalorder %v6580_v24, 2  ;;  %v12953_v39 = vld [vmem:[#allocation22_spill] sm:$0xff] }
 0x2ff   : > { %v4280_v41 = vsel %vm12949_vm2, %v4244_v36, %v4245_v16  ;;  %vm12950_vm6 = vcmp.lt.s32.totalorder %v6580_v24, 1  ;;  %v4754_v5 = vmax.f32 %v10093_v49, %v9799_v32  ;;  %v4692_v21 = vmax.f32 %v4596_v9, %v4664_v59 }
 0x300   : > { %v4408_v46 = vsel %vm12950_vm6, %v4372_v50, %v4373_v62  ;;  %vm12952_vm1 = vnez %v12951_v18  ;;  %v3857_v26 = vmax.f32 %v3793_v17, %v10068_v40  ;;  %v3858_v20 = vmax.f32 %v3794_v23, %v12921_v45 }
 0x301   : > { %v10158_v4 = vsel %vm12952_vm1, %v3669_v29, %v3573_v10  ;;  %v4309_v19 = vmax.f32 %v10078_v51, %v4280_v41  ;;  %v4817_v7 = vmax.f32 %v4753_v58, %v9951_v33  ;;  %v10165_v36 = vmax.f32 %v4754_v5, %v9976_v35 }
 0x302   : > { %v3970_v50 = vpack.c.bf16 %v9470_v12, %v9467_v52  ;;  %v10171_v32 = vsel %vm12821_vm5, %v4692_v21, %v4596_v9  ;;  %v10174_v59 = vmax.f32 %v3857_v26, %v10158_v4  ;;  %v10177_v61 = vmax.f32 %v3858_v20, %v12953_v39  ;;  %v12957_v12 = vld [vmem:[#allocation97_spill] sm:$0xff] }
 0x303   : > { %v12954_v47 = vrot.slane %v9694_v63, 1  ;;  %v12955_v38 = vrot.slane %v9226_v60, 1  ;;  %vm12956_vm10 = vcmp.lt.s32.totalorder %v6580_v24, 7  ;;  %v4944_v58 = vmax.f32 %v4880_v53, %v10171_v32 }
 0x304   : > { %vm12958_vm15 = vnez %v12957_v12  ;;  %v4881_v29 = vmax.f32 %v4817_v7, %v10132_v13  ;;  %v4882_v17 = vmax.f32 %v10165_v36, %v10171_v32  ;;  %vm12959_vm5 = vcmask 64512   ;;  %v12960_v36 = vld [vmem:[#allocation98_spill] sm:$0xff] }
 0x305   : > { %v3499_v10 = vsel %vm12956_vm10, %v12955_v38, %v12954_v47  ;;  %v4341_v48 = vsel %vm12958_vm15, %v4309_v19, %v10078_v51  ;;  %5998 = vmatprep.mubr.msk.bf16.mxu1 %vm12959_vm5, %v3970_v50  ;;  %v4246_v23 = vrot.slane %v10174_v59, 6  ;;  %v4374_v9 = vrot.slane %v10174_v59, 7 }
 0x306   : > { %v4437_v41 = vmax.f32 %v4341_v48, %v4408_v46  ;;  %v4502_v5 = vrot.slane %v10174_v59, 1  ;;  %v5003_v21 = vpack.c.bf16 %v4944_v58, %v4943_v28  ;;  %v4503_v53 = vrot.slane %v10177_v61, 1  ;;  %v12966_v58 = vld [vmem:[#allocation82_spill] sm:$0xff] }
 0x307   : > { %v4630_v26 = vrot.slane %v10174_v59, 2  ;;  %v4631_v20 = vrot.slane %v10177_v61, 2  ;;  %v4279_v19 = vsel %vm12949_vm2, %v4245_v16, %v4246_v23  ;;  %v4407_v7 = vsel %vm12950_vm6, %v4373_v62, %v4374_v9 }
 0x308   : > { %vm12961_vm10 = vnez %v12960_v36  ;;  %vm12962_vm15 = vcmp.lt.s32.totalorder %v6580_v24, 7  ;;  %6040 = vmatprep.mubr.msk.bf16.mxu0 %vm12959_vm5, %v5003_v21  ;;  %v4310_v46 = vmax.f32 %v10174_v59, %v4279_v19  ;;  %vm12964_vm2 = vcmp.lt.s32.totalorder %v6580_v24, 6 }
 0x309   : > { %v4469_v50 = vsel %vm12961_vm10, %v4437_v41, %v4341_v48  ;;  %v4535_v28 = vsel %vm12962_vm15, %v4501_v8, %v4502_v5  ;;  %vm12963_vm7 = vmmov %vm12962_vm15  ;;  %v4662_v16 = vsel %vm12964_vm2, %v4630_v26, %v4631_v20  ;;  %v3543_v12 = vmax.f32 %v12966_v58, %v3499_v10  ;;  %v12970_v10 = vld [vmem:[#allocation77_spill] sm:$0xff] }
 0x30a   : > { %v4534_v47 = vsel %vm12963_vm7, %v4502_v5, %v4503_v53  ;;  %v4565_v38 = vmax.f32 %v4469_v50, %v4535_v28  ;;  %vm12965_vm6 = vmmov %vm12964_vm2  ;;  %v12967_v8 = vrot.slane %v9694_v63, 2  ;;  %v12968_v48 = vrot.slane %v9226_v60, 2 }
 0x30b   : > { %v4663_v62 = vsel %vm12965_vm6, %v4629_v11, %v4630_v26  ;;  %vm12969_vm10 = vmmov %vm12964_vm2  ;;  %v3731_v5 = vmax.f32 %v10068_v40, %v9816_v15  ;;  %v4438_v21 = vmax.f32 %v4310_v46, %v4407_v7  ;;  %v3732_v36 = vmax.f32 %v12921_v45, %v12850_v1 }
 0x30c   : > { %v3627_v41 = vsel %vm12969_vm10, %v12968_v48, %v12967_v8  ;;  %v10228_v19 = vmax.f32 %v4565_v38, %v4663_v62  ;;  %v4247_v11 = vrot.slane %v10177_v61, 6  ;;  %vm12971_vm7 = vnez %v12970_v10 }
 0x30d   : > { %v3575_v63 = vsel %vm12971_vm7, %v3543_v12, %v12966_v58  ;;  %v3795_v60 = vmax.f32 %v3731_v5, %v9980_v2  ;;  %v4375_v26 = vrot.slane %v10177_v61, 7  ;;  %v4755_v50 = vmax.f32 %v10132_v13, %v9951_v33 }
 0x30e   : > { %v4566_v15 = vmax.f32 %v4438_v21, %v4534_v47  ;;  %v4945_v7 = vmax.f32 %v4881_v29, %v10228_v19  ;;  %v3671_v28 = vmax.f32 %v3575_v63, %v3627_v41  ;;  %v3796_v46 = vmax.f32 %v3732_v36, %v12896_v22  ;;  %v12974_v47 = vld [vmem:[#allocation84_spill] sm:$0xff] }
 0x30f   : > { %v3859_v1 = vmax.f32 %v3795_v60, %v10158_v4  ;;  %vm12972_vm15 = vcmp.lt.s32.totalorder %v6580_v24, 2  ;;  %vm12973_vm5 = vcmp.lt.s32.totalorder %v6580_v24, 1  ;;  %v4756_v58 = vmax.f32 %v10171_v32, %v9976_v35 }
 0x310   : > { %v4278_v38 = vsel %vm12972_vm15, %v4246_v23, %v4247_v11  ;;  %v4406_v62 = vsel %vm12973_vm5, %v4374_v9, %v4375_v26  ;;  %v4598_v33 = vsel %vm12879_vm9, %v4566_v15, %v4438_v21  ;;  %vm12975_vm2 = vnez %v12974_v47 }
 0x311   : > { %v10253_v29 = vsel %vm12975_vm2, %v3671_v28, %v3575_v63  ;;  %v3860_v12 = vmax.f32 %v3796_v46, %v12953_v39  ;;  %v4311_v8 = vmax.f32 %v10177_v61, %v4278_v38  ;;  %v4694_v48 = vmax.f32 %v4598_v33, %v4662_v16 }
 0x312   : > { %v10258_v23 = vmax.f32 %v3859_v1, %v10253_v29  ;;  %v4819_v9 = vmax.f32 %v4755_v50, %v10043_v3  ;;  %v4820_v41 = vmax.f32 %v4756_v58, %v10093_v49  ;;  %vm12977_vm9 = vnez %v12976_v30  ;;  %v12983_v58 = vld [vmem:[#allocation33_spill] sm:$0xff] }
 0x313   : > { %v10263_v35 = vmax.f32 %v3860_v12, %v9805_v34  ;;  %v4343_v5 = vsel %vm12977_vm9, %v4311_v8, %v10177_v61  ;;  %v3971_v21 = vpack.c.bf16 %v9476_v0, %v9473_v42  ;;  %v12978_v36 = vrot.slane %v9792_v54, 1 }
 0x314   : > { %v12979_v16 = vrot.slane %v9700_v6, 1  ;;  %vm12980_vm6 = vcmp.lt.s32.totalorder %v6580_v24, 7  ;;  %v10278_v60 = vsel %vm12885_vm4, %v4694_v48, %v4598_v33  ;;  %v4248_v50 = vrot.slane %v10258_v23, 6  ;;  %vm12982_vm4 = vmmov %vm12973_vm5 }
 0x315   : > { %v4376_v15 = vrot.slane %v10258_v23, 7  ;;  %v4439_v28 = vmax.f32 %v4343_v5, %v4406_v62  ;;  %v4946_v46 = vmax.f32 %v4882_v17, %v10278_v60  ;;  %v4504_v42 = vrot.slane %v10258_v23, 1  ;;  %vm12985_vm9 = vmmov %vm12980_vm6 }
 0x316   : > { %v3497_v63 = vsel %vm12980_vm6, %v12979_v16, %v12978_v36  ;;  %v4505_v0 = vrot.slane %v10263_v35, 1  ;;  %v4632_v1 = vrot.slane %v10258_v23, 2  ;;  %vm12981_vm10 = vcmask 64512  }
 0x317   : > { %5999 = vmatmul.mubr.msk.bf16.vlgmr.msra.gmra.mxu1 %vm12981_vm10, %v3971_v21  ;;  %v4277_v44 = vsel %vm12972_vm15, %v4247_v11, %v4248_v50  ;;  %v4405_v38 = vsel %vm12982_vm4, %v4375_v26, %v4376_v15  ;;  %vm12984_vm5 = vnez %v12983_v58  ;;  %v4633_v62 = vrot.slane %v10263_v35, 2 }
 0x318   : > { %v4471_v33 = vsel %vm12984_vm5, %v4439_v28, %v4343_v5  ;;  %v5004_v17 = vpack.c.bf16 %v4946_v46, %v4945_v7  ;;  %v4312_v12 = vmax.f32 %v10258_v23, %v4277_v44  ;;  %v4532_v8 = vsel %vm12985_vm9, %v4504_v42, %v4505_v0 }
 0x319   : > { %v4533_v48 = vsel %vm12980_vm6, %v4503_v53, %v4504_v42  ;;  %vm12986_vm10 = vcmp.lt.s32.totalorder %v6580_v24, 6  ;;  %v4883_v7 = vmax.f32 %v4819_v9, %v10228_v19  ;;  %vm12988_vm4 = vcmask 64512  }
 0x31a   : > { %v4567_v11 = vmax.f32 %v4471_v33, %v4533_v48  ;;  %v4660_v26 = vsel %vm12986_vm10, %v4632_v1, %v4633_v62  ;;  %vm12987_vm15 = vmmov %vm12986_vm10  ;;  %6041 = vmatmul.mubr.msk.bf16.gmra.mxu0 %vm12988_vm4, %v5004_v17  ;;  %v4440_v5 = vmax.f32 %v4312_v12, %v4405_v38  ;;  %v4884_v21 = vmax.f32 %v4820_v41, %v10278_v60  ;;  %v12996_v12 = vld [vmem:[#allocation8_spill] sm:$0xff] }
 0x31b   : > { %v4661_v30 = vsel %vm12987_vm15, %v4631_v20, %v4632_v1  ;;  %v3545_v36 = vmax.f32 %v9762_v27, %v3497_v63  ;;  %v12989_v53 = vrot.slane %v9792_v54, 2  ;;  %v12990_v16 = vrot.slane %v9700_v6, 2  ;;  %vm12991_vm5 = vmmov %vm12986_vm10  ;;  %v12992_v63 = vld [vmem:[#allocation44_spill] sm:$0xff] }
 0x31c   : > { %v10317_v46 = vmax.f32 %v4567_v11, %v4661_v30  ;;  %v3733_v20 = vmax.f32 %v10158_v4, %v9980_v2  ;;  %v3734_v9 = vmax.f32 %v12953_v39, %v12896_v22  ;;  %v4249_v42 = vrot.slane %v10263_v35, 6 }
 0x31d   : > { %v3625_v28 = vsel %vm12991_vm5, %v12990_v16, %v12989_v53  ;;  %v4568_v41 = vmax.f32 %v4440_v5, %v4532_v8  ;;  %vm12993_vm9 = vnez %v12992_v63  ;;  %v4377_v6 = vrot.slane %v10263_v35, 7  ;;  %v13000_v53 = vld [vmem:[#allocation14_spill] sm:$0xff] }
 0x31e   : > { %v3577_v54 = vsel %vm12993_vm9, %v3545_v36, %v9762_v27  ;;  %v4757_v1 = vmax.f32 %v10228_v19, %v10043_v3  ;;  %v4947_v44 = vmax.f32 %v4883_v7, %v10317_v46  ;;  %v3797_v2 = vmax.f32 %v3733_v20, %v10068_v40 }
 0x31f   : > { %v3673_v38 = vmax.f32 %v3577_v54, %v3625_v28  ;;  %v3798_v58 = vmax.f32 %v3734_v9, %v12921_v45  ;;  %v4600_v22 = vsel %vm12914_vm11, %v4568_v41, %v4440_v5  ;;  %vm12994_vm6 = vcmp.lt.s32.totalorder %v6580_v24, 2 }
 0x320   : > { %v4276_v33 = vsel %vm12994_vm6, %v4248_v50, %v4249_v42  ;;  %vm12995_vm10 = vcmp.lt.s32.totalorder %v6580_v24, 1  ;;  %v4758_v17 = vmax.f32 %v10278_v60, %v10093_v49  ;;  %v4696_v3 = vmax.f32 %v4600_v22, %v4660_v26  ;;  %vm13004_vm5 = vmmov %vm12994_vm6 }
 0x321   : > { %v4404_v27 = vsel %vm12995_vm10, %v4376_v15, %v4377_v6  ;;  %vm12997_vm15 = vnez %v12996_v12  ;;  %v3861_v48 = vmax.f32 %v3797_v2, %v10253_v29  ;;  %v3862_v11 = vmax.f32 %v3798_v58, %v9805_v34  ;;  %v12998_v15 = vld [vmem:[#allocation11_spill] sm:$0xff]  ;;  %vm13005_vm6 = vmmov %vm12995_vm10 }
 0x322   : > { %v10343_v8 = vsel %vm12997_vm15, %v3673_v38, %v3577_v54  ;;  %v4313_v25 = vmax.f32 %v10263_v35, %v4276_v33  ;;  %v4821_v30 = vmax.f32 %v4757_v1, %v10132_v13  ;;  %v10350_v50 = vmax.f32 %v4758_v17, %v10171_v32  ;;  %v13006_v33 = vld [vmem:[#allocation51_spill] sm:$0xff] }
 0x323   : > { %v3972_v7 = vpack.c.bf16 %v12998_v15, %v9479_v55  ;;  %v10356_v49 = vsel %vm12920_vm8, %v4696_v3, %v4600_v22  ;;  %v10359_v26 = vmax.f32 %v3861_v48, %v10343_v8  ;;  %v10362_v5 = vmax.f32 %v3862_v11, %v9881_v56 }
 0x324   : > { %v12999_v36 = vmax.f32 %v9879_v14, %v9856_v57  ;;  %vm13001_vm11 = vnez %v13000_v53  ;;  %v4948_v55 = vmax.f32 %v4884_v21, %v10356_v49  ;;  %vm13003_vm8 = vnez %v13002_v43 }
 0x325   : > { %v4345_v28 = vsel %vm13003_vm8, %v4313_v25, %v10263_v35  ;;  %v4885_v20 = vmax.f32 %v4821_v30, %v10317_v46  ;;  %v4886_v9 = vmax.f32 %v10350_v50, %v10356_v49  ;;  %6002 = vmatprep.mubr.msk.bf16.mxu1 %vm12988_vm4, %v3972_v7  ;;  %v4250_v41 = vrot.slane %v10359_v26, 6 }
 0x326   : > { %v10370_v16 = vsel %vm13001_vm11, %v12999_v36, %v9879_v14  ;;  %v4378_v57 = vrot.slane %v10359_v26, 7  ;;  %v4441_v54 = vmax.f32 %v4345_v28, %v4404_v27  ;;  %v4506_v14 = vrot.slane %v10359_v26, 1 }
 0x327   : > { %v5005_v1 = vpack.c.bf16 %v4948_v55, %v4947_v44  ;;  %v4507_v21 = vrot.slane %v10362_v5, 1  ;;  %v4634_v38 = vrot.slane %v10359_v26, 2  ;;  %v4635_v2 = vrot.slane %v10362_v5, 2 }
 0x328   : > { %v4275_v58 = vsel %vm13004_vm5, %v4249_v42, %v4250_v41  ;;  %v4403_v22 = vsel %vm13005_vm6, %v4377_v6, %v4378_v57  ;;  %vm13007_vm10 = vnez %v13006_v33  ;;  %vm13008_vm8 = vcmp.lt.s32.totalorder %v6580_v24, 7 }
 0x329   : > { %v4473_v17 = vsel %vm13007_vm10, %v4441_v54, %v4345_v28  ;;  %v4531_v44 = vsel %vm13008_vm8, %v4505_v0, %v4506_v14  ;;  %6044 = vmatprep.mubr.msk.bf16.mxu0 %vm12988_vm4, %v5005_v1  ;;  %v4314_v27 = vmax.f32 %v10359_v26, %v4275_v58  ;;  %vm13009_vm11 = vmmov %vm13008_vm8  ;;  %vm13010_vm5 = vcmp.lt.s32.totalorder %v6580_v24, 6  ;;  %v13016_v58 = vld [vmem:[#allocation47_spill] sm:$0xff] }
 0x32a   : > { %v4530_v3 = vsel %vm13009_vm11, %v4506_v14, %v4507_v21  ;;  %v4569_v48 = vmax.f32 %v4473_v17, %v4531_v44  ;;  %v4658_v42 = vsel %vm13010_vm5, %v4634_v38, %v4635_v2  ;;  %vm13011_vm6 = vmmov %vm13010_vm5  ;;  %v3735_v11 = vmax.f32 %v10253_v29, %v10068_v40 }
 0x32b   : > { %v4659_v6 = vsel %vm13011_vm6, %v4633_v62, %v4634_v38  ;;  %v3736_v0 = vmax.f32 %v9805_v34, %v12921_v45  ;;  %v4251_v25 = vrot.slane %v10362_v5, 6  ;;  %v4442_v30 = vmax.f32 %v4314_v27, %v4403_v22  ;;  %v13017_v22 = vld [vmem:[#allocation70_spill] sm:$0xff] }
 0x32c   : > { %v10411_v50 = vmax.f32 %v4569_v48, %v4659_v6  ;;  %v4379_v15 = vrot.slane %v10362_v5, 7  ;;  %v4759_v7 = vmax.f32 %v10317_v46, %v10132_v13  ;;  %v3799_v36 = vmax.f32 %v3735_v11, %v10158_v4  ;;  %v13018_v27 = vld [vmem:[#allocation50_spill] sm:$0xff] }
 0x32d   : > { %v3800_v62 = vmax.f32 %v3736_v0, %v12953_v39  ;;  %vm13012_vm11 = vcmp.lt.s32.totalorder %v6580_v24, 2  ;;  %v4760_v45 = vmax.f32 %v10356_v49, %v10171_v32  ;;  %v4570_v55 = vmax.f32 %v4442_v30, %v4530_v3 }
 0x32e   : > { %v4274_v40 = vsel %vm13012_vm11, %v4250_v41, %v4251_v25  ;;  %v4949_v43 = vmax.f32 %v4885_v20, %v10411_v50  ;;  %vm13013_vm10 = vcmp.lt.s32.totalorder %v6580_v24, 1  ;;  %v3863_v13 = vmax.f32 %v3799_v36, %v10343_v8  ;;  %v13014_v41 = vld [vmem:[#allocation67_spill] sm:$0xff]  ;;  %vm13022_vm5 = vmmov %vm13012_vm11 }
 0x32f   : > { %v4315_v28 = vmax.f32 %v10362_v5, %v4274_v40  ;;  %v4402_v54 = vsel %vm13013_vm10, %v4378_v57, %v4379_v15  ;;  %v3864_v14 = vmax.f32 %v3800_v62, %v9881_v56  ;;  %v4823_v1 = vmax.f32 %v4759_v7, %v10228_v19  ;;  %v13020_v7 = vld [vmem:[#allocation74_spill] sm:$0xff] }
 0x330   : > { %v10430_v38 = vmax.f32 %v4760_v45, %v10278_v60  ;;  %v4602_v32 = vsel %vm12948_vm0, %v4570_v55, %v4442_v30  ;;  %vm13015_vm8 = vnez %v13014_v41  ;;  %v3973_v33 = vpack.c.bf16 %v13017_v22, %v13016_v58  ;;  %vm13019_vm0 = vmmov %vm12988_vm4 }
 0x331   : > { %v4347_v20 = vsel %vm13015_vm8, %v4315_v28, %v10362_v5  ;;  %v3737_v57 = vmax.f32 %v10343_v8, %v10158_v4  ;;  %v4698_v17 = vmax.f32 %v4602_v32, %v4658_v42  ;;  %v10442_v44 = vmax.f32 %v3863_v13, %v10370_v16 }
 0x332   : > { %v10445_v3 = vmax.f32 %v3864_v14, %v13018_v27  ;;  %v4443_v48 = vmax.f32 %v4347_v20, %v4402_v54  ;;  %v4887_v31 = vmax.f32 %v4823_v1, %v10411_v50  ;;  %6003 = vmatmul.mubr.msk.bf16.gmra.mxu1 %vm13019_vm0, %v3973_v33  ;;  %v3738_v6 = vmax.f32 %v9881_v56, %v12953_v39 }
 0x333   : > { %v3801_v11 = vmax.f32 %v3737_v57, %v10253_v29  ;;  %v4761_v4 = vmax.f32 %v10411_v50, %v10228_v19  ;;  %v10456_v42 = vsel %vm12952_vm1, %v4698_v17, %v4602_v32  ;;  %v4252_v0 = vrot.slane %v10442_v44, 6  ;;  %vm13023_vm1 = vmmov %vm13013_vm10  ;;  %v13028_v57 = vld [vmem:[#allocation72_spill] sm:$0xff] }
 0x334   : > { %v4380_v30 = vrot.slane %v10442_v44, 7  ;;  %vm13021_vm4 = vnez %v13020_v7  ;;  %v4950_v62 = vmax.f32 %v4886_v9, %v10456_v42  ;;  %v4508_v39 = vrot.slane %v10442_v44, 1  ;;  %v13031_v7 = vld [vmem:[#allocation46_spill] sm:$0xff] }
 0x335   : > { %v4475_v36 = vsel %vm13021_vm4, %v4443_v48, %v4347_v20  ;;  %v4509_v40 = vrot.slane %v10445_v3, 1  ;;  %v4636_v45 = vrot.slane %v10442_v44, 2  ;;  %v4273_v18 = vsel %vm13022_vm5, %v4251_v25, %v4252_v0  ;;  %vm13029_vm4 = vmmov %vm13022_vm5 }
 0x336   : > { %v4401_v19 = vsel %vm13023_vm1, %v4379_v15, %v4380_v30  ;;  %v4637_v55 = vrot.slane %v10445_v3, 2  ;;  %v4888_v28 = vmax.f32 %v10430_v38, %v10456_v42  ;;  %v5006_v54 = vpack.c.bf16 %v4950_v62, %v4949_v43  ;;  %vm13030_vm5 = vmmov %vm13023_vm1 }
 0x337   : > { %v4316_v9 = vmax.f32 %v10442_v44, %v4273_v18  ;;  %vm13024_vm6 = vcmp.lt.s32.totalorder %v6580_v24, 7  ;;  %vm13026_vm10 = vcmp.lt.s32.totalorder %v6580_v24, 6  ;;  %v3802_v32 = vmax.f32 %v3738_v6, %v9805_v34  ;;  %vm13033_vm1 = vmmov %vm13029_vm4 }
 0x338   : > { %v4528_v13 = vsel %vm13024_vm6, %v4508_v39, %v4509_v40  ;;  %vm13025_vm11 = vmmov %vm13024_vm6  ;;  %v4656_v25 = vsel %vm13026_vm10, %v4636_v45, %v4637_v55  ;;  %6045 = vmatmul.mubr.msk.bf16.gmra.mxu0 %vm13019_vm0, %v5006_v54  ;;  %v3865_v38 = vmax.f32 %v3801_v11, %v10370_v16  ;;  %v4253_v41 = vrot.slane %v10445_v3, 6 }
 0x339   : > { %v4529_v14 = vsel %vm13025_vm11, %v4507_v21, %v4508_v39  ;;  %vm13027_vm8 = vmmov %vm13026_vm10  ;;  %v4444_v43 = vmax.f32 %v4316_v9, %v4401_v19  ;;  %v4381_v20 = vrot.slane %v10445_v3, 7  ;;  %v3866_v21 = vmax.f32 %v3802_v32, %v13018_v27 }
 0x33a   : > { %v4571_v1 = vmax.f32 %v4475_v36, %v4529_v14  ;;  %v4657_v15 = vsel %vm13027_vm8, %v4635_v2, %v4636_v45  ;;  %v4762_v22 = vmax.f32 %v10456_v42, %v10278_v60  ;;  %v4825_v2 = vmax.f32 %v4761_v4, %v10317_v46  ;;  %vm13037_vm11 = vmmov %vm13027_vm8 }
 0x33b   : > { %v4572_v33 = vmax.f32 %v4444_v43, %v4528_v13  ;;  %v10494_v17 = vmax.f32 %v3865_v38, %v13028_v57  ;;  %v4272_v48 = vsel %vm13029_vm4, %v4252_v0, %v4253_v41  ;;  %v4400_v6 = vsel %vm13030_vm5, %v4380_v30, %v4381_v20  ;;  %vm13042_vm10 = vmmov %vm13019_vm0  ;;  %v13046_v38 = vld [vmem:[#allocation32_spill] sm:$0xff] }
 0x33c   : > { %v10487_v58 = vmax.f32 %v4571_v1, %v4657_v15  ;;  %v10502_v36 = vmax.f32 %v3866_v21, %v13031_v7  ;;  %v4317_v62 = vmax.f32 %v10445_v3, %v4272_v48  ;;  %v4826_v60 = vmax.f32 %v4762_v22, %v10356_v49  ;;  %vm13055_vm4 = vmmov %vm13024_vm6 }
 0x33d   : > { %v4604_v4 = vsel %vm12971_vm7, %v4572_v33, %v4444_v43  ;;  %v4254_v39 = vrot.slane %v10494_v17, 6  ;;  %v4382_v45 = vrot.slane %v10494_v17, 7  ;;  %v4510_v0 = vrot.slane %v10494_v17, 1  ;;  %vm13034_vm7 = vmmov %vm13030_vm5 }
 0x33e   : > { %v4951_v11 = vmax.f32 %v4887_v31, %v10487_v58  ;;  %v4700_v18 = vmax.f32 %v4604_v4, %v4656_v25  ;;  %v4349_v31 = vsel %vm12798_vm13, %v4317_v62, %v10445_v3  ;;  %v4511_v19 = vrot.slane %v10502_v36, 1  ;;  %vm13035_vm13 = vmmov %vm13024_vm6  ;;  %v13040_v62 = vld [vmem:[#allocation38_spill] sm:$0xff] }
 0x33f   : > { %v4638_v54 = vrot.slane %v10494_v17, 2  ;;  %v4271_v9 = vsel %vm13033_vm1, %v4253_v41, %v4254_v39  ;;  %v4399_v10 = vsel %vm13034_vm7, %v4381_v20, %v4382_v45  ;;  %v4445_v13 = vmax.f32 %v4349_v31, %v4400_v6  ;;  %v13039_v6 = vld [vmem:[#allocation66_spill] sm:$0xff] }
 0x340   : > { %v4527_v14 = vsel %vm13024_vm6, %v4509_v40, %v4510_v0  ;;  %v10524_v1 = vsel %vm12975_vm2, %v4700_v18, %v4604_v4  ;;  %v4318_v25 = vmax.f32 %v10494_v17, %v4271_v9  ;;  %v4526_v15 = vsel %vm13035_vm13, %v4510_v0, %v4511_v19  ;;  %vm13038_vm2 = vmmov %vm13027_vm8 }
 0x341   : > { %v4639_v32 = vrot.slane %v10502_v36, 2  ;;  %v4952_v43 = vmax.f32 %v4888_v28, %v10524_v1  ;;  %v4477_v41 = vsel %vm12808_vm3, %v4445_v13, %v4349_v31  ;;  %v4655_v40 = vsel %vm13037_vm11, %v4637_v55, %v4638_v54  ;;  %vm13041_vm3 = vmmov %vm13019_vm0  ;;  %v13043_v31 = vld [vmem:[#allocation23_spill] sm:$0xff] }
 0x342   : > { %v4889_v47 = vmax.f32 %v4825_v2, %v10487_v58  ;;  %v4446_v20 = vmax.f32 %v4318_v25, %v4399_v10  ;;  %v4573_v21 = vmax.f32 %v4477_v41, %v4527_v14  ;;  %v4890_v33 = vmax.f32 %v4826_v60, %v10524_v1  ;;  %vm13044_vm8 = vmmov %vm13033_vm1  ;;  %v13047_v41 = vld [vmem:[#allocation68_spill] sm:$0xff] }
 0x343   : > { %v4654_v22 = vsel %vm13038_vm2, %v4638_v54, %v4639_v32  ;;  %v5007_v48 = vpack.c.bf16 %v4952_v43, %v4951_v11  ;;  %v3974_v4 = vpack.c.bf16 %v13040_v62, %v13039_v6  ;;  %v3739_v28 = vmax.f32 %v10370_v16, %v10253_v29  ;;  %vm13045_vm0 = vmmov %vm13030_vm5 }
 0x344   : > { %v3740_v0 = vmax.f32 %v13018_v27, %v9805_v34  ;;  %v4574_v55 = vmax.f32 %v4446_v20, %v4526_v15  ;;  %v10547_v18 = vmax.f32 %v4573_v21, %v4655_v40  ;;  %v4255_v2 = vrot.slane %v10502_v36, 6  ;;  %v13049_v21 = vld [vmem:[#allocation39_spill] sm:$0xff]  ;;  %vm13056_vm5 = vmmov %vm13055_vm4 }
 0x345   : > { %v4383_v30 = vrot.slane %v10502_v36, 7  ;;  %6048 = vmatprep.mubr.msk.bf16.mxu0 %vm13041_vm3, %v5007_v48  ;;  %6006 = vmatprep.mubr.msk.bf16.mxu1 %vm13042_vm10, %v3974_v4  ;;  %v3803_v11 = vmax.f32 %v3739_v28, %v10343_v8  ;;  %v4763_v29 = vmax.f32 %v10487_v58, %v10317_v46  ;;  %v4764_v43 = vmax.f32 %v10524_v1, %v10356_v49  ;;  %vm13059_vm7 = vmmov %vm13038_vm2 }
 0x346   : > { %v3804_v60 = vmax.f32 %v3740_v0, %v9881_v56  ;;  %v4606_v54 = vsel %vm12993_vm9, %v4574_v55, %v4446_v20  ;;  %v4953_v9 = vmax.f32 %v4889_v47, %v10547_v18  ;;  %v4270_v10 = vsel %vm13044_vm8, %v4254_v39, %v4255_v2  ;;  %v13048_v47 = vld [vmem:[#allocation56_spill] sm:$0xff]  ;;  %vm13051_vm9 = vmmov %vm13041_vm3 }
 0x347   : > { %v4398_v13 = vsel %vm13045_vm0, %v4382_v45, %v4383_v30  ;;  %v4702_v14 = vmax.f32 %v4606_v54, %v4654_v22  ;;  %v3867_v25 = vmax.f32 %v3803_v11, %v13028_v57  ;;  %v4319_v46 = vmax.f32 %v10502_v36, %v4270_v10  ;;  %v10598_v11 = vpop.f32.mrf.mxu0  ;;  %vm13060_vm6 = vmmov %vm13044_vm8 }
 0x348   : > { %v3868_v15 = vmax.f32 %v3804_v60, %v13031_v7  ;;  %v4827_v63 = vmax.f32 %v4763_v29, %v10411_v50  ;;  %v3975_v40 = vpack.c.bf16 %v13047_v41, %v13046_v38  ;;  %v3741_v39 = vmax.f32 %v13028_v57, %v10343_v8  ;;  %vm13061_vm13 = vmmov %vm13045_vm0 }
 0x349   : > { %v10577_v45 = vsel %vm12997_vm15, %v4702_v14, %v4606_v54  ;;  %v10580_v20 = vmax.f32 %v3867_v25, %v13048_v47  ;;  %v4351_v48 = vsel %vm12830_vm14, %v4319_v46, %v10502_v36  ;;  %v10590_v4 = vmax.f32 %v4764_v43, %v10456_v42  ;;  %vm13053_vm14 = vmmov %vm13033_vm1  ;;  %v10626_v41 = vpop.f32.mrf.mxu0 }
 0x34a   : > { %v10583_v22 = vmax.f32 %v3868_v15, %v13049_v21  ;;  %v4954_v6 = vmax.f32 %v4890_v33, %v10577_v45  ;;  %v4447_v62 = vmax.f32 %v4351_v48, %v4398_v13  ;;  %v4891_v12 = vmax.f32 %v4827_v63, %v10547_v18  ;;  %6007 = vmatmul.mubr.msk.bf16.gmra.mxu1 %vm13051_vm9, %v3975_v40  ;;  %vm13054_vm15 = vmmov %vm13045_vm0 }
 0x34b   : > { %v4256_v8 = vrot.slane %v10580_v20, 6  ;;  %v4384_v28 = vrot.slane %v10580_v20, 7  ;;  %v4512_v0 = vrot.slane %v10580_v20, 1  ;;  %v4640_v54 = vrot.slane %v10580_v20, 2  ;;  %vm13057_vm1 = vmmov %vm13041_vm3 }
 0x34c   : > { %v4513_v55 = vrot.slane %v10583_v22, 1  ;;  %v5008_v60 = vpack.c.bf16 %v4954_v6, %v4953_v9  ;;  %v4479_v29 = vsel %vm12842_vm12, %v4447_v62, %v4351_v48  ;;  %v4641_v10 = vrot.slane %v10583_v22, 2  ;;  %vm13058_vm12 = vmmov %vm13038_vm2 }
 0x34d   : > { %v4269_v13 = vsel %vm13053_vm14, %v4255_v2, %v4256_v8  ;;  %v4397_v14 = vsel %vm13054_vm15, %v4383_v30, %v4384_v28  ;;  %v4525_v9 = vsel %vm13056_vm5, %v4511_v19, %v4512_v0  ;;  %v4653_v2 = vsel %vm13059_vm7, %v4639_v32, %v4640_v54  ;;  %vm13068_vm3 = vmmov %vm13057_vm1 }
 0x34e   : > { %v4524_v25 = vsel %vm13055_vm4, %v4512_v0, %v4513_v55  ;;  %6049 = vmatmul.mubr.msk.bf16.gmra.mxu0 %vm13057_vm1, %v5008_v60  ;;  %v4320_v15 = vmax.f32 %v10580_v20, %v4269_v13  ;;  %v4575_v46 = vmax.f32 %v4479_v29, %v4525_v9  ;;  %v4652_v43 = vsel %vm13058_vm12, %v4640_v54, %v4641_v10  ;;  %v13062_v54 = vld [vmem:[#allocation26_spill] sm:$0xff]  ;;  %v13065_v9 = vld [vmem:[#allocation17_spill] sm:$0xff]  ;;  %vm13070_vm8 = vmmov %vm13060_vm6 }
 0x34f   : > { %v4892_v30 = vmax.f32 %v10590_v4, %v10577_v45  ;;  %v3742_v63 = vmax.f32 %v13031_v7, %v9881_v56  ;;  %v3805_v38 = vmax.f32 %v3741_v39, %v10370_v16  ;;  %v4257_v19 = vrot.slane %v10583_v22, 6  ;;  %v10639_v4 = vpop.f32.mrf.mxu1  ;;  %vm13073_vm14 = vmmov %vm13055_vm4 }
 0x350   : > { %v4448_v40 = vmax.f32 %v4320_v15, %v4397_v14  ;;  %v10628_v49 = vmax.f32 %v4575_v46, %v4653_v2  ;;  %v4385_v48 = vrot.slane %v10583_v22, 7  ;;  %v4765_v32 = vmax.f32 %v10547_v18, %v10411_v50  ;;  %v10655_v14 = vpop.f32.mrf.mxu0  ;;  %v13067_v15 = vld [vmem:[#allocation7_spill] sm:$0xff]  ;;  %vm13074_vm15 = vmmov %vm13055_vm4 }
 0x351   : > { %v3806_v6 = vmax.f32 %v3742_v63, %v13018_v27  ;;  %v3869_v62 = vmax.f32 %v3805_v38, %v13048_v47  ;;  %v4268_v56 = vsel %vm13060_vm6, %v4256_v8, %v4257_v19  ;;  %v4766_v39 = vmax.f32 %v10577_v45, %v10456_v42  ;;  %vm13075_vm4 = vmmov %vm13059_vm7 }
 0x352   : > { %v4576_v0 = vmax.f32 %v4448_v40, %v4524_v25  ;;  %v4955_v60 = vmax.f32 %v4891_v12, %v10628_v49  ;;  %v4321_v33 = vmax.f32 %v10583_v22, %v4268_v56  ;;  %v4396_v50 = vsel %vm13061_vm13, %v4384_v28, %v4385_v48  ;;  %v13063_v25 = vld [vmem:[#allocation25_spill] sm:$0xff]  ;;  %vm13076_vm5 = vmmov %vm13075_vm4 }
 0x353   : > { %v10646_v29 = vmax.f32 %v3806_v6, %v13049_v21  ;;  %v10649_v13 = vmax.f32 %v3869_v62, %v13062_v54  ;;  %v4829_v8 = vmax.f32 %v4765_v32, %v10487_v58  ;;  %v10653_v42 = vmax.f32 %v4766_v39, %v10524_v1  ;;  %v10668_v62 = vpop.f32.mrf.mxu1  ;;  %vm13077_vm12 = vmmov %vm13060_vm6 }
 0x354   : > { %vm13064_vm11 = vnez %v13063_v25  ;;  %vm13066_vm2 = vnez %v13065_v9  ;;  %v3976_v46 = vpack.c.bf16 %v10073_v37, %v13067_v15  ;;  %v3743_v2 = vmax.f32 %v13048_v47, %v10370_v16  ;;  %vm13078_vm7 = vmmov %vm13045_vm0 }
 0x355   : > { %v4608_v12 = vsel %vm13064_vm11, %v4576_v0, %v4448_v40  ;;  %v4353_v28 = vsel %vm13066_vm2, %v4321_v33, %v10583_v22  ;;  %v4258_v38 = vrot.slane %v10649_v13, 6  ;;  %v4386_v32 = vrot.slane %v10649_v13, 7  ;;  %vm13086_vm2 = vmmov %vm13070_vm8 }
 0x356   : > { %v4704_v63 = vmax.f32 %v4608_v12, %v4652_v43  ;;  %v4449_v6 = vmax.f32 %v4353_v28, %v4396_v50  ;;  %v4514_v40 = vrot.slane %v10649_v13, 1  ;;  %v4515_v56 = vrot.slane %v10646_v29, 1  ;;  %6010 = vmatprep.mubr.msk.bf16.mxu1 %vm13068_vm3, %v3976_v46  ;;  %v13071_v43 = vld [vmem:[#allocation86_spill] sm:$0xff]  ;;  %v10685_v50 = vpop.f32.mrf.mxu0  ;;  %v10698_v46 = vpop.f32.mrf.mxu1  ;;  %vm13087_vm3 = vmmov %vm13045_vm0 }
 0x357   : > { %v4642_v39 = vrot.slane %v10649_v13, 2  ;;  %v4643_v0 = vrot.slane %v10646_v29, 2  ;;  %vm13069_vm10 = vnez %v13000_v53  ;;  %v4267_v16 = vsel %vm13070_vm8, %v4257_v19, %v4258_v38 }
 0x358   : > { %v10677_v37 = vsel %vm13069_vm10, %v4704_v63, %v4608_v12  ;;  %v4395_v47 = vsel %vm13045_vm0, %v4385_v48, %v4386_v32  ;;  %vm13072_vm9 = vnez %v13071_v43  ;;  %v4322_v9 = vmax.f32 %v10649_v13, %v4267_v16  ;;  %vm13088_vm10 = vmmov %vm13073_vm14 }
 0x359   : > { %v4481_v33 = vsel %vm13072_vm9, %v4449_v6, %v4353_v28  ;;  %v4956_v25 = vmax.f32 %v4892_v30, %v10677_v37  ;;  %v4522_v53 = vsel %vm13073_vm14, %v4514_v40, %v4515_v56  ;;  %v4523_v12 = vsel %vm13074_vm15, %v4513_v55, %v4514_v40  ;;  %vm13089_vm8 = vmmov %vm13088_vm10 }
 0x35a   : > { %v4577_v15 = vmax.f32 %v4481_v33, %v4523_v12  ;;  %v4650_v19 = vsel %vm13075_vm4, %v4642_v39, %v4643_v0  ;;  %v4651_v48 = vsel %vm13076_vm5, %v4641_v10, %v4642_v39  ;;  %v4893_v28 = vmax.f32 %v4829_v8, %v10628_v49  ;;  %v10709_v39 = vpop.f32.mrf.mxu0  ;;  %v10727_v33 = vpop.f32.mrf.mxu1  ;;  %vm13092_vm9 = vmmov %vm13075_vm4 }
 0x35b   : > { %v5009_v30 = vpack.c.bf16 %v4956_v25, %v4955_v60  ;;  %v4450_v63 = vmax.f32 %v4322_v9, %v4395_v47  ;;  %v4894_v6 = vmax.f32 %v10653_v42, %v10677_v37  ;;  %v3744_v16 = vmax.f32 %v13049_v21, %v13018_v27  ;;  %vm13093_vm14 = vmmov %vm13075_vm4 }
 0x35c   : > { %v10704_v55 = vmax.f32 %v4577_v15, %v4651_v48  ;;  %v3807_v40 = vmax.f32 %v3743_v2, %v13028_v57  ;;  %v4259_v43 = vrot.slane %v10646_v29, 6  ;;  %v4387_v10 = vrot.slane %v10646_v29, 7  ;;  %v10737_v15 = vpop.f32.mrf.mxu0  ;;  %vm13095_vm15 = vmmov %vm13089_vm8 }
 0x35d   : > { %6052 = vmatprep.mubr.msk.bf16.mxu0 %vm13057_vm1, %v5009_v30  ;;  %v4578_v60 = vmax.f32 %v4450_v63, %v4522_v53  ;;  %v10713_v8 = vmax.f32 %v3744_v16, %v13031_v7  ;;  %v4767_v42 = vmax.f32 %v10628_v49, %v10487_v58  ;;  %v4768_v27 = vmax.f32 %v10677_v37, %v10524_v1  ;;  %v13079_v7 = vld [vmem:[#allocation31_spill] sm:$0xff]  ;;  %v13084_v16 = vld [vmem:[#allocation30_spill] sm:$0xff]  ;;  %vm13096_vm4 = vmmov %vm13057_vm1 }
 0x35e   : > { %v4957_v57 = vmax.f32 %v4893_v28, %v10704_v55  ;;  %v10721_v21 = vmax.f32 %v3807_v40, %v13062_v54  ;;  %v4266_v2 = vsel %vm13077_vm12, %v4258_v38, %v4259_v43  ;;  %v4394_v47 = vsel %vm13078_vm7, %v4386_v32, %v4387_v10  ;;  %13081 = vst [vmem:[#allocation42_spill] sm:$0xff] %v10737_v15  ;;  %v13082_v32 = vld [vmem:[#allocation53_spill] sm:$0xff]  ;;  %vm13099_vm5 = vmmov %vm13089_vm8 }
 0x35f   : > { %vm13080_vm6 = vnez %v13079_v7  ;;  %v4323_v58 = vmax.f32 %v10646_v29, %v4266_v2  ;;  %v4517_v1 = vrot.slane %v10713_v8, 1  ;;  %v4645_v9 = vrot.slane %v10713_v8, 2  ;;  %v10753_v7 = vpop.f32.mrf.mxu1  ;;  %vm13101_vm12 = vmmov %vm13086_vm2 }
 0x360   : > { %v4610_v25 = vsel %vm13080_vm6, %v4578_v60, %v4450_v63  ;;  %v4260_v54 = vrot.slane %v10721_v21, 6  ;;  %v4388_v12 = vrot.slane %v10721_v21, 7  ;;  %v4516_v38 = vrot.slane %v10721_v21, 1  ;;  %vm13102_vm7 = vmmov %vm13086_vm2 }
 0x361   : > { %v4706_v53 = vmax.f32 %v4610_v25, %v4650_v19  ;;  %vm13083_vm13 = vnez %v13082_v32  ;;  %v4644_v28 = vrot.slane %v10721_v21, 2  ;;  %v4831_v30 = vmax.f32 %v4767_v42, %v10547_v18  ;;  %vm13104_vm6 = vmmov %vm13087_vm3 }
 0x362   : > { %v4355_v48 = vsel %vm13083_vm13, %v4323_v58, %v10646_v29  ;;  %v4832_v63 = vmax.f32 %v4768_v27, %v10577_v45  ;;  %vm13085_vm11 = vnez %v13084_v16  ;;  %v4265_v40 = vsel %vm13086_vm2, %v4259_v43, %v4260_v54  ;;  %vm13105_vm13 = vmmov %vm13087_vm3 }
 0x363   : > { %v10747_v19 = vsel %vm13085_vm11, %v4706_v53, %v4610_v25  ;;  %v4393_v60 = vsel %vm13087_vm3, %v4387_v10, %v4388_v12  ;;  %v4451_v2 = vmax.f32 %v4355_v48, %v4394_v47  ;;  %v4324_v32 = vmax.f32 %v10721_v21, %v4265_v40  ;;  %v13090_v25 = vld [vmem:[#allocation27_spill] sm:$0xff]  ;;  %vm13108_vm2 = vmmov %vm13092_vm9 }
 0x364   : > { %v4958_v58 = vmax.f32 %v4894_v6, %v10747_v19  ;;  %v4520_v42 = vsel %vm13088_vm10, %v4516_v38, %v4517_v1  ;;  %v4521_v27 = vsel %vm13089_vm8, %v4515_v56, %v4516_v38  ;;  %vm13091_vm0 = vnez %v13090_v25  ;;  %v10768_v6 = vpop.f32.mrf.mxu0  ;;  %vm13110_vm3 = vmmov %vm13108_vm2 }
 0x365   : > { %v4483_v53 = vsel %vm13091_vm0, %v4451_v2, %v4355_v48  ;;  %v4648_v43 = vsel %vm13092_vm9, %v4644_v28, %v4645_v9  ;;  %v4649_v10 = vsel %vm13093_vm14, %v4643_v0, %v4644_v28  ;;  %v4895_v47 = vmax.f32 %v4831_v30, %v10704_v55  ;;  %v10779_v28 = vpop.f32.mrf.mxu1  ;;  %vm13115_vm0 = vmmov %vm13057_vm1 }
 0x366   : > { %v5010_v16 = vpack.c.bf16 %v4958_v58, %v4957_v57  ;;  %v4452_v40 = vmax.f32 %v4324_v32, %v4393_v60  ;;  %v4579_v34 = vmax.f32 %v4483_v53, %v4521_v27  ;;  %v4896_v15 = vmax.f32 %v4832_v63, %v10747_v19  ;;  %v10804_v25 = vpop.f32.mrf.mxu0  ;;  %v13106_v53 = vld [vmem:[#allocation55_spill] sm:$0xff] }
 0x367   : > { %v3977_v56 = vpack.c.bf16 %v10174_v59, %v10078_v51  ;;  %v4261_v38 = vrot.slane %v10713_v8, 6  ;;  %v4389_v48 = vrot.slane %v10713_v8, 7  ;;  %v13094_v2 = vrot.slane %v13043_v31, 1 }
 0x368   : > { %6053 = vmatmul.mubr.msk.bf16.gmra.mxu0 %vm13096_vm4, %v5010_v16  ;;  %v4580_v57 = vmax.f32 %v4452_v40, %v4520_v42  ;;  %v10782_v30 = vmax.f32 %v4579_v34, %v4649_v10  ;;  %v13097_v63 = vrot.slane %v9467_v52, 1  ;;  %v4646_v60 = vrot.slane %v13043_v31, 2  ;;  %vm13121_vm4 = vmmov %vm13115_vm0 }
 0x369   : > { %v4519_v0 = vsel %vm13095_vm15, %v4517_v1, %v13094_v2  ;;  %v13098_v51 = vmov %v13094_v2  ;;  %6011 = vmatmul.mubr.msk.bf16.gmra.mxu1 %vm13057_vm1, %v3977_v56  ;;  %v13100_v1 = vrot.slane %v13043_v31, 6  ;;  %v4264_v34 = vsel %vm13102_vm7, %v4260_v54, %v4261_v38  ;;  %vm13120_vm15 = vmmov %vm13115_vm0 }
 0x36a   : > { %v4550_v59 = vsel %vm13099_vm5, %v13098_v51, %v13097_v63  ;;  %v13103_v32 = vrot.slane %v13043_v31, 7  ;;  %v4392_v27 = vsel %vm13105_vm13, %v4388_v12, %v4389_v48  ;;  %vm13107_vm11 = vnez %v13106_v53  ;;  %v10819_v51 = vpop.f32.mrf.mxu1  ;;  %vm13124_vm1 = vmmov %vm13115_vm0 }
 0x36b   : > { %v4263_v58 = vsel %vm13101_vm12, %v4261_v38, %v13100_v1  ;;  %v4612_v10 = vsel %vm13107_vm11, %v4580_v57, %v4452_v40  ;;  %v4959_v16 = vmax.f32 %v4895_v47, %v10782_v30  ;;  %v4325_v56 = vmax.f32 %v10713_v8, %v4264_v34  ;;  %v13111_v47 = vld [vmem:[#allocation54_spill] sm:$0xff]  ;;  %vm13125_vm12 = vmmov %vm13115_vm0 }
 0x36c   : > { %v4391_v42 = vsel %vm13104_vm6, %v4389_v48, %v13103_v32  ;;  %v4326_v2 = vmax.f32 %v13043_v31, %v4263_v58  ;;  %v4708_v54 = vmax.f32 %v4612_v10, %v4648_v43  ;;  %v4647_v38 = vsel %vm13108_vm2, %v4645_v9, %v4646_v60  ;;  %v10833_v58 = vpop.f32.mrf.mxu0  ;;  %vm13126_vm7 = vmmov %vm13115_vm0 }
 0x36d   : > { %v13109_v63 = vrot.slane %v9467_v52, 2  ;;  %v4769_v48 = vmax.f32 %v10704_v55, %v10547_v18  ;;  %vm13112_vm10 = vnez %v13111_v47  ;;  %v4770_v43 = vmax.f32 %v10747_v19, %v10577_v45  ;;  %v13113_v52 = vld [vmem:[#allocation5_spill] sm:$0xff]  ;;  %vm13127_vm6 = vmmov %vm13115_vm0 }
 0x36e   : > { %v4357_v40 = vsel %vm13112_vm10, %v4325_v56, %v10713_v8  ;;  %v4454_v57 = vmax.f32 %v4326_v2, %v4391_v42  ;;  %v3978_v9 = vpack.c.bf16 %v10258_v23, %v10177_v61  ;;  %vm13114_vm8 = vnez %v13113_v52  ;;  %v13116_v61 = vld [vmem:[#allocation76_spill] sm:$0xff]  ;;  %v13118_v56 = vld [vmem:[#allocation93_spill] sm:$0xff]  ;;  %vm13128_vm13 = vmmov %vm13115_vm0 }
 0x36f   : > { %v4678_v12 = vsel %vm13110_vm3, %v4646_v60, %v13109_v63  ;;  %v4740_v24 = vsel %vm13114_vm8, %v4708_v54, %v4612_v10  ;;  %v4453_v60 = vmax.f32 %v4357_v40, %v4392_v27  ;;  %v4833_v1 = vmax.f32 %v4769_v48, %v10628_v49  ;;  %v10844_v10 = vpop.f32.mrf.mxu1  ;;  %vm13129_vm11 = vmmov %vm13115_vm0 }
 0x370   : > { %v4771_v18 = vmax.f32 %v10782_v30, %v10628_v49  ;;  %v4960_v34 = vmax.f32 %v4896_v15, %v4740_v24  ;;  %v4582_v32 = vmax.f32 %v4454_v57, %v4550_v59  ;;  %v4834_v42 = vmax.f32 %v4770_v43, %v10677_v37  ;;  %6014 = vmatprep.mubr.msk.bf16.mxu1 %vm13115_vm0, %v3978_v9  ;;  %vm13130_vm2 = vmmov %vm13115_vm0 }
 0x371   : > { %v4772_v45 = vmax.f32 %v4740_v24, %v10677_v37  ;;  %vm13117_vm9 = vnez %v13116_v61  ;;  %v4897_v27 = vmax.f32 %v4833_v1, %v10782_v30  ;;  %v3979_v49 = vpack.c.bf16 %v10359_v26, %v10263_v35  ;;  %v10854_v35 = vpop.f32.mrf.mxu0  ;;  %vm13131_vm3 = vmmov %vm13115_vm0 }
 0x372   : > { %v4485_v23 = vsel %vm13117_vm9, %v4453_v60, %v4357_v40  ;;  %v4835_v53 = vmax.f32 %v4771_v18, %v10704_v55  ;;  %v5011_v15 = vpack.c.bf16 %v4960_v34, %v4959_v16  ;;  %vm13119_vm14 = vnez %v13118_v56  ;;  %v13122_v40 = vld [vmem:[#allocation96_spill] sm:$0xff]  ;;  %vm13132_vm10 = vmmov %vm13115_vm0 }
 0x373   : > { %v4581_v59 = vmax.f32 %v4485_v23, %v4519_v0  ;;  %v4614_v2 = vsel %vm13119_vm14, %v4582_v32, %v4454_v57  ;;  %v4898_v54 = vmax.f32 %v4834_v42, %v4740_v24  ;;  %v4836_v37 = vmax.f32 %v4772_v45, %v10747_v19  ;;  %6015 = vmatmul.mubr.msk.bf16.gmra.mxu1 %vm13120_vm15, %v3979_v49 }
 0x374   : > { %v4710_v63 = vmax.f32 %v4614_v2, %v4678_v12  ;;  %v3980_v48 = vpack.c.bf16 %v10442_v44, %v10362_v5  ;;  %v3981_v47 = vpack.c.bf16 %v10494_v17, %v10445_v3  ;;  %6056 = vmatprep.mubr.msk.bf16.mxu0 %vm13121_vm4, %v5011_v15  ;;  %v3982_v0 = vpack.c.bf16 %v10580_v20, %v10502_v36  ;;  %v10866_v44 = vpop.f32.mrf.mxu1  ;;  %v10870_v20 = vpop.f32.mrf.mxu0 }
 0x375   : > { %v4709_v26 = vmax.f32 %v4581_v59, %v4647_v38  ;;  %v3983_v16 = vpack.c.bf16 %v10649_v13, %v10583_v22  ;;  %v3984_v12 = vpack.c.bf16 %v10721_v21, %v10646_v29  ;;  %vm13123_vm5 = vnez %v13122_v40 }
 0x376   : > { %v4742_v5 = vsel %vm13123_vm5, %v4710_v63, %v4614_v2  ;;  %6018 = vmatprep.mubr.msk.bf16.mxu1 %vm13124_vm1, %v3980_v48  ;;  %v10873_v9 = vpop.f32.mrf.mxu1  ;;  %v10878_v60 = vpop.f32.mrf.mxu0  ;;  %v3985_v34 = vpack.c.bf16 %v13043_v31, %v10713_v8  ;;  %vm5523_vm8 = vcmask 261120  }
 0x377   : > { %v4961_v3 = vmax.f32 %v4897_v27, %v4709_v26  ;;  %v4962_v17 = vmax.f32 %v4898_v54, %v4742_v5  ;;  %v4899_v57 = vmax.f32 %v4835_v53, %v4709_v26  ;;  %v4900_v38 = vmax.f32 %v4836_v37, %v4742_v5 }
 0x378   : > { %v4773_v43 = vmax.f32 %v4709_v26, %v10704_v55  ;;  %v4774_v36 = vmax.f32 %v4742_v5, %v10747_v19  ;;  %v10881_v55 = vpop.f32.mrf.mxu1  ;;  %v10883_v19 = vpop.f32.mrf.mxu0 }
 0x379   : > { %v5012_v22 = vpack.c.bf16 %v4962_v17, %v4961_v3  ;;  %v5013_v13 = vpack.c.bf16 %v4900_v38, %v4899_v57 }
 0x37a   : > { %v4837_v29 = vmax.f32 %v4773_v43, %v10782_v30  ;;  %v4838_v21 = vmax.f32 %v4774_v36, %v4740_v24  ;;  %v10885_v1 = vpop.f32.mrf.mxu1  ;;  %v10889_v30 = vpop.f32.mrf.mxu0 }
 0x37b   : > { %6057 = vmatmul.mubr.msk.bf16.gmra.mxu0 %vm13125_vm12, %v5012_v22  ;;  %6019 = vmatmul.mubr.msk.bf16.gmra.mxu1 %vm13127_vm6, %v3981_v47 }
 0x37c   : > { %6060 = vmatprep.mubr.msk.bf16.mxu0 %vm13126_vm7, %v5013_v13  ;;  %v5014_v52 = vpack.c.bf16 %v4838_v21, %v4837_v29  ;;  %6022 = vmatprep.mubr.msk.bf16.mxu1 %vm13128_vm13, %v3982_v0  ;;  %v10892_v24 = vpop.f32.mrf.mxu1  ;;  %v10894_v18 = vpop.f32.mrf.mxu0 }
 0x37e   : > { %v10898_v32 = vpop.f32.mrf.mxu1  ;;  %v10901_v42 = vpop.f32.mrf.mxu0 }
 0x380   : > { %v10903_v45 = vpop.f32.mrf.mxu1  ;;  %v10905_v61 = vpop.f32.mrf.mxu0 }
 0x382   : > { %v10907_v23 = vpop.f32.mrf.mxu1  ;;  %v10909_v27 = vpop.f32.mrf.mxu0 }
 0x383   : > { %6061 = vmatmul.mubr.msk.bf16.gmra.mxu0 %vm13129_vm11, %v5014_v52  ;;  %6023 = vmatmul.mubr.msk.bf16.gmra.mxu1 %vm13130_vm2, %v3983_v16 }
 0x384   : > { %6026 = vmatprep.mubr.msk.bf16.mxu1 %vm13131_vm3, %v3984_v12  ;;  %v10911_v53 = vpop.f32.mrf.mxu1  ;;  %v10913_v49 = vpop.f32.mrf.mxu0 }
 0x386   : > { %v10915_v15 = vpop.f32.mrf.mxu1  ;;  %v10917_v31 = vpop.f32.mrf.mxu0 }
 0x388   : > { %v10919_v8 = vpop.f32.mrf.mxu1  ;;  %v10921_v59 = vpop.f32.mrf.mxu0 }
 0x38a   : > { %v10923_v56 = vpop.f32.mrf.mxu1  ;;  %v10925_v2 = vpop.f32.mrf.mxu0 }
 0x38b   : > { %6027 = vmatmul.mubr.msk.bf16.gmra.mxu1 %vm13132_vm10, %v3985_v34 }
 0x38c   : > { %v10927_v54 = vpop.f32.mrf.mxu1  ;;  %v10929_v63 = vpop.f32.mrf.mxu0 }
 0x38e   : > { %v10931_v37 = vpop.f32.mrf.mxu1  ;;  %v10933_v48 = vpop.f32.mrf.mxu0 }
 0x390   : > { %v10935_v47 = vpop.f32.mrf.mxu1  ;;  %v10937_v26 = vpop.f32.mrf.mxu0 }
 0x391   : > { %13133 = vst [vmem:[#allocation79_spill] sm:$0xff] %v10937_v26 }
 0x392   : > { %v10939_v0 = vpop.f32.mrf.mxu1  ;;  %v10941_v16 = vpop.f32.mrf.mxu0 }
 0x393   : > { %13134 = vst [vmem:[#allocation36_spill] sm:$0xff] %v10941_v16 }
 0x394   : > { %v10945_v40 = vpop.f32.mrf.mxu0 }
 0x395   : > { %13136 = vst [vmem:[#allocation59_spill] sm:$0xff] %v10945_v40 }
 0x396   : > { %v10949_v3 = vpop.f32.mrf.mxu0 }
 0x397   : > { %v10943_v12 = vpop.f32.mrf.mxu1  ;;  %13138 = vst [vmem:[#allocation92_spill] sm:$0xff] %v10949_v3 }
 0x398   : > { %13135 = vst [vmem:[#allocation90_spill] sm:$0xff] %v10943_v12  ;;  %v10953_v57 = vpop.f32.mrf.mxu0 }
 0x399   : > { %v10947_v5 = vpop.f32.mrf.mxu1  ;;  %13140 = vst [vmem:[#allocation62_spill] sm:$0xff] %v10953_v57  ;;  %v3084_v57 = vadd.f32 %v10598_v11, %v10639_v4  ;;  %v3079_v11 = vadd.f32 %v10685_v50, %v10727_v33 }
 0x39a   : > { %13137 = vst [vmem:[#allocation61_spill] sm:$0xff] %v10947_v5  ;;  %v10957_v43 = vpop.f32.mrf.mxu0 }
 0x39b   : > { %v10951_v17 = vpop.f32.mrf.mxu1  ;;  %13142 = vst [vmem:[#allocation28_spill] sm:$0xff] %v10957_v43  ;;  %v3076_v43 = vadd.f32 %v10626_v41, %v10668_v62 }
 0x39c   : > { %13139 = vst [vmem:[#allocation45_spill] sm:$0xff] %v10951_v17  ;;  %v10961_v22 = vpop.f32.mrf.mxu0 }
 0x39d   : > { %v10955_v38 = vpop.f32.mrf.mxu1  ;;  %13144 = vst [vmem:[#allocation95_spill] sm:$0xff] %v10961_v22  ;;  %v10976_v22 = vld [vmem:[%s11360_s4] ss:$0 sm:$0xff] }
 0x39e   : > { %13141 = vst [vmem:[#allocation64_spill] sm:$0xff] %v10955_v38  ;;  %v3190_v21 = vpop.f32.mrf.mxu0 }
 0x3a0   : > { %v6034_v3 = vpop.f32.mrf.mxu0 }
 0x3a2   : > { %v5101_v40 = vpop.f32.mrf.mxu0 }
 0x3b6   : > { %v10959_v36 = vpop.f32.mrf.mxu1 }
 0x3b7   : > { %13143 = vst [vmem:[#allocation88_spill] sm:$0xff] %v10959_v36 }
 0x3b8   : > { %v10963_v13 = vpop.f32.mrf.mxu1 }
 0x3b9   : > { %13145 = vst [vmem:[#allocation43_spill] sm:$0xff] %v10963_v13 }
 0x3ba   : > { %v10965_v29 = vpop.f32.mrf.mxu1 }
 0x3bb   : > { %13146 = vst [vmem:[#allocation40_spill] sm:$0xff] %v10965_v29 }
 0x3bc   : > { %v2978_v52 = vpop.f32.mrf.mxu1 }
 0x3bd   : > { %v10967_v34 = vadd.f32 %v3190_v21, %v2978_v52  ;;  %v3087_v21 = vadd.f32 %v10655_v14, %v10698_v46  ;;  %v6035_v52 = vpop.f32.mrf.mxu0 }
 0x3bf   : > { %13147 = vst [vmem:[#allocation57_spill] sm:$0xff] %v10967_v34 }
 0x3d7   : > { %v6000_v38 = vpop.f32.mrf.mxu1 }
 0x3d8   : > { %v4201_v36 = vadd.f32 %v6000_v38, %v3084_v57  ;;  %v5104_v38 = vpop.f32.mrf.mxu0 }
 0x3d9   : > { %v4072_v29 = vpop.f32.mrf.mxu1 }
 0x3da   : > { %v5230_v34 = vadd.f32 %v6034_v3, %v4201_v36  ;;  %v4199_v13 = vadd.f32 %v4072_v29, %v3076_v43  ;;  %v6038_v33 = vpop.f32.mrf.mxu0 }
 0x3db   : > { %v6001_v17 = vpop.f32.mrf.mxu1 }
 0x3dc   : > { %v10983_v4 = vadd.f32 %v10976_v22, %v5230_v34  ;;  %v5228_v41 = vadd.f32 %v5101_v40, %v4199_v13  ;;  %v4202_v62 = vadd.f32 %v6001_v17, %v3087_v21  ;;  %v5117_v13 = vpop.f32.mrf.mxu0  ;;  %v3100_v34 = vadd.f32 %v10709_v39, %v10753_v7 }
 0x3dd   : > { %v4075_v57 = vpop.f32.mrf.mxu1  ;;  %v3103_v39 = vadd.f32 %v10768_v6, %v10819_v51  ;;  %v3095_v7 = vadd.f32 %v10804_v25, %v10844_v10 }
 0x3de   : > { %v5772_v16 = vmul.f32 -1.442695, %v10983_v4  ;;  %v10987_v5 = vadd.f32 %v10976_v22, %v5228_v41  ;;  %v5231_v14 = vadd.f32 %v6035_v52, %v4202_v62  ;;  %v4200_v46 = vadd.f32 %v4075_v57, %v3079_v11  ;;  %v6039_v29 = vpop.f32.mrf.mxu0  ;;  %v13148_v62 = vld [vmem:[#allocation42_spill] sm:$0xff] }
 0x3df   : > { %v3092_v57 = vadd.f32 %v13148_v62, %v10779_v28 }
 0x3e0   : > { %6256 = vpow2.f32 %v5772_v16  ;;  %v5770_v3 = vmul.f32 -1.442695, %v10987_v5  ;;  %v10991_v43 = vadd.f32 %v10976_v22, %v5231_v14  ;;  %v5229_v50 = vadd.f32 %v5104_v38, %v4200_v46  ;;  %v5120_v21 = vpop.f32.mrf.mxu0 }
 0x3e2   : > { %6258 = vpow2.f32 %v5770_v3  ;;  %v5773_v40 = vmul.f32 -1.442695, %v10991_v43  ;;  %v10995_v17 = vadd.f32 %v10976_v22, %v5229_v50  ;;  %v6042_v50 = vpop.f32.mrf.mxu0 }
 0x3e4   : > { %6260 = vpow2.f32 %v5773_v40  ;;  %v5771_v36 = vmul.f32 -1.442695, %v10995_v17 }
 0x3e6   : > { %6262 = vpow2.f32 %v5771_v36 }
 0x3ed   : > { %v6257_v16 = vpop.eup %6256 }
 0x3ee   : > { %v5397_v52 = vadd.f32 1.0, %v6257_v16 }
 0x3ef   : > { %v6259_v11 = vpop.eup %6258 }
 0x3f0   : > { %6264 = vrcp.f32 %v5397_v52  ;;  %v5395_v38 = vadd.f32 1.0, %v6259_v11 }
 0x3f1   : > { %v6261_v46 = vpop.eup %6260 }
 0x3f2   : > { %v6004_v41 = vpop.f32.mrf.mxu1  ;;  %6266 = vrcp.f32 %v5395_v38  ;;  %v5398_v40 = vadd.f32 1.0, %v6261_v46 }
 0x3f3   : > { %v4205_v14 = vadd.f32 %v6004_v41, %v3100_v34  ;;  %v6263_v12 = vpop.eup %6262 }
 0x3f4   : > { %v4088_v3 = vpop.f32.mrf.mxu1  ;;  %6268 = vrcp.f32 %v5398_v40  ;;  %v5396_v28 = vadd.f32 1.0, %v6263_v12 }
 0x3f5   : > { %v5234_v36 = vadd.f32 %v6038_v33, %v4205_v14  ;;  %v4203_v26 = vadd.f32 %v4088_v3, %v3092_v57  ;;  %v5133_v33 = vpop.f32.mrf.mxu0 }
 0x3f6   : > { %v6005_v16 = vpop.f32.mrf.mxu1  ;;  %6270 = vrcp.f32 %v5396_v28 }
 0x3f7   : > { %v11007_v34 = vadd.f32 %v10976_v22, %v5234_v36  ;;  %v5232_v52 = vadd.f32 %v5117_v13, %v4203_v26  ;;  %v4206_v11 = vadd.f32 %v6005_v16, %v3103_v39  ;;  %v6043_v26 = vpop.f32.mrf.mxu0 }
 0x3f8   : > { %v4091_v41 = vpop.f32.mrf.mxu1 }
 0x3f9   : > { %v5776_v62 = vmul.f32 -1.442695, %v11007_v34  ;;  %v11011_v57 = vadd.f32 %v10976_v22, %v5232_v52  ;;  %v4204_v6 = vadd.f32 %v4091_v41, %v3095_v7  ;;  %v5235_v25 = vadd.f32 %v6039_v29, %v4206_v11  ;;  %v5136_v29 = vpop.f32.mrf.mxu0 }
 0x3fa   : > { %v3116_v52 = vadd.f32 %v10833_v58, %v10866_v44 }
 0x3fb   : > { %6272 = vpow2.f32 %v5776_v62  ;;  %v5774_v51 = vmul.f32 -1.442695, %v11011_v57  ;;  %v5233_v10 = vadd.f32 %v5120_v21, %v4204_v6  ;;  %v11016_v12 = vadd.f32 %v10976_v22, %v5235_v25  ;;  %v11031_v39 = vpop.f32.mrf.mxu0 }
 0x3fc   : > { %v3108_v6 = vadd.f32 %v10854_v35, %v10873_v9 }
 0x3fd   : > { %6274 = vpow2.f32 %v5774_v51  ;;  %v11021_v13 = vadd.f32 %v10976_v22, %v5233_v10  ;;  %v5777_v38 = vmul.f32 -1.442695, %v11016_v12  ;;  %v6265_v46 = vpop.eup %6264  ;;  %v11041_v11 = vpop.f32.mrf.mxu0 }
 0x3fe   : > { %v5493_v21 = vmul.f32 %v6265_v46, %v10983_v4 }
 0x3ff   : > { %v5775_v14 = vmul.f32 -1.442695, %v11021_v13  ;;  %6276 = vpow2.f32 %v5777_v38  ;;  %v6267_v3 = vpop.eup %6266  ;;  %v11049_v44 = vpop.f32.mrf.mxu0 }
 0x400   : > { %5526 = vst.msk [vmem:[%s11026_s10 + $0x10] sm:$0xff] %vm5523_vm8, %v5493_v21  ;;  %v5491_v40 = vmul.f32 %v6267_v3, %v10987_v5 }
 0x401   : > { %6278 = vpow2.f32 %v5775_v14  ;;  %v6269_v36 = vpop.eup %6268 }
 0x402   : > { %5524 = vst.msk [vmem:[%s11026_s10] sm:$0xff] %vm5523_vm8, %v5491_v40  ;;  %v5494_v7 = vmul.f32 %v6269_v36, %v10991_v43  ;;  %v3111_v40 = vadd.f32 %v10878_v60, %v10885_v1 }
 0x403   : > { %v6271_v4 = vpop.eup %6270 }
 0x404   : > { %5527 = vst.msk [vmem:[%s11026_s10 + $0x18] sm:$0xff] %vm5523_vm8, %v5494_v7  ;;  %v5492_v16 = vmul.f32 %v6271_v4, %v10995_v17  ;;  %v3119_v17 = vadd.f32 %v10870_v20, %v10881_v55  ;;  %v11060_v4 = vpop.f32.mrf.mxu0 }
 0x406   : > { %5525 = vst.msk [vmem:[%s11026_s10 + $0x8] sm:$0xff] %vm5523_vm8, %v5492_v16 }
 0x408   : > { %v6273_v28 = vpop.eup %6272 }
 0x409   : > { %v5401_v5 = vadd.f32 1.0, %v6273_v28 }
 0x40a   : > { %v6008_v41 = vpop.f32.mrf.mxu1  ;;  %v6275_v62 = vpop.eup %6274 }
 0x40b   : > { %v4209_v43 = vadd.f32 %v6008_v41, %v3116_v52  ;;  %6280 = vrcp.f32 %v5401_v5  ;;  %v5399_v25 = vadd.f32 1.0, %v6275_v62 }
 0x40c   : > { %v4104_v51 = vpop.f32.mrf.mxu1  ;;  %v6277_v58 = vpop.eup %6276 }
 0x40d   : > { %v5238_v10 = vadd.f32 %v6042_v50, %v4209_v43  ;;  %v4207_v38 = vadd.f32 %v4104_v51, %v3108_v6  ;;  %6282 = vrcp.f32 %v5399_v25  ;;  %v5402_v21 = vadd.f32 1.0, %v6277_v58 }
 0x40e   : > { %v6009_v14 = vpop.f32.mrf.mxu1  ;;  %v6279_v46 = vpop.eup %6278 }
 0x40f   : > { %v11052_v3 = vadd.f32 %v10976_v22, %v5238_v10  ;;  %v5236_v35 = vadd.f32 %v5133_v33, %v4207_v38  ;;  %v4210_v9 = vadd.f32 %v6009_v14, %v3119_v17  ;;  %v5400_v36 = vadd.f32 1.0, %v6279_v46  ;;  %v11067_v52 = vpop.f32.mrf.mxu0 }
 0x410   : > { %v4107_v7 = vpop.f32.mrf.mxu1  ;;  %6284 = vrcp.f32 %v5402_v21 }
 0x411   : > { %v5780_v20 = vmul.f32 -1.442695, %v11052_v3  ;;  %v11058_v55 = vadd.f32 %v10976_v22, %v5236_v35  ;;  %v5239_v50 = vadd.f32 %v6043_v26, %v4210_v9  ;;  %6286 = vrcp.f32 %v5400_v36  ;;  %v11074_v6 = vpop.f32.mrf.mxu0 }
 0x412   : > { %v4208_v16 = vadd.f32 %v4107_v7, %v3111_v40  ;;  %v3132_v9 = vadd.f32 %v10883_v19, %v10892_v24  ;;  %v3124_v36 = vadd.f32 %v10889_v30, %v10898_v32 }
 0x413   : > { %6288 = vpow2.f32 %v5780_v20  ;;  %v5778_v33 = vmul.f32 -1.442695, %v11058_v55  ;;  %v11064_v28 = vadd.f32 %v10976_v22, %v5239_v50  ;;  %v11081_v51 = vpop.f32.mrf.mxu0 }
 0x414   : > { %v5237_v60 = vadd.f32 %v5136_v29, %v4208_v16  ;;  %v3135_v16 = vadd.f32 %v10894_v18, %v10903_v45 }
 0x415   : > { %6290 = vpow2.f32 %v5778_v33  ;;  %v5781_v1 = vmul.f32 -1.442695, %v11064_v28  ;;  %v11089_v46 = vpop.f32.mrf.mxu0 }
 0x416   : > { %v11070_v26 = vadd.f32 %v10976_v22, %v5237_v60 }
 0x417   : > { %6292 = vpow2.f32 %v5781_v1  ;;  %v3127_v1 = vadd.f32 %v10901_v42, %v10907_v23  ;;  %v3148_v42 = vadd.f32 %v10905_v61, %v10911_v53  ;;  %v3140_v23 = vadd.f32 %v10909_v27, %v10915_v15 }
 0x418   : > { %v5779_v5 = vmul.f32 -1.442695, %v11070_v26  ;;  %v6281_v41 = vpop.eup %6280 }
 0x419   : > { %v5497_v62 = vmul.f32 %v6281_v41, %v11007_v34 }
 0x41a   : > { %6294 = vpow2.f32 %v5779_v5  ;;  %v6283_v29 = vpop.eup %6282 }
 0x41b   : > { %5530 = vst.msk [vmem:[%s11026_s10 + $0x30] sm:$0xff] %vm5523_vm8, %v5497_v62  ;;  %v5495_v43 = vmul.f32 %v6283_v29, %v11011_v57 }
 0x41d   : > { %v6285_v25 = vpop.eup %6284  ;;  %5528 = vst.msk [vmem:[%s11026_s10 + $0x20] sm:$0xff] %vm5523_vm8, %v5495_v43 }
 0x41e   : > { %v6287_v17 = vpop.eup %6286  ;;  %v5498_v10 = vmul.f32 %v6285_v25, %v11016_v12 }
 0x41f   : > { %v5496_v34 = vmul.f32 %v6287_v17, %v11021_v13 }
 0x420   : > { %v6289_v38 = vpop.eup %6288  ;;  %5531 = vst.msk [vmem:[%s11026_s10 + $0x38] sm:$0xff] %vm5523_vm8, %v5498_v10 }
 0x421   : > { %v5405_v58 = vadd.f32 1.0, %v6289_v38  ;;  %5529 = vst.msk [vmem:[%s11026_s10 + $0x28] sm:$0xff] %vm5523_vm8, %v5496_v34 }
 0x422   : > { %v6291_v14 = vpop.eup %6290 }
 0x423   : > { %6296 = vrcp.f32 %v5405_v58  ;;  %v5403_v57 = vadd.f32 1.0, %v6291_v14 }
 0x424   : > { %v6293_v21 = vpop.eup %6292 }
 0x425   : > { %6298 = vrcp.f32 %v5403_v57  ;;  %v5406_v35 = vadd.f32 1.0, %v6293_v21 }
 0x427   : > { %v6295_v40 = vpop.eup %6294  ;;  %6300 = vrcp.f32 %v5406_v35 }
 0x428   : > { %v11093_v12 = vpop.f32.mrf.mxu0  ;;  %v5404_v7 = vadd.f32 1.0, %v6295_v40 }
 0x429   : > { %v6012_v13 = vpop.f32.mrf.mxu1 }
 0x42a   : > { %v4213_v20 = vadd.f32 %v6012_v13, %v3132_v9  ;;  %v11099_v33 = vpop.f32.mrf.mxu0  ;;  %6302 = vrcp.f32 %v5404_v7  ;;  %v3164_v7 = vadd.f32 %v10921_v59, %v10927_v54  ;;  %v3167_v59 = vadd.f32 %v10929_v63, %v10935_v47 }
 0x42b   : > { %v4120_v50 = vpop.f32.mrf.mxu1 }
 0x42c   : > { %v5242_v60 = vadd.f32 %v11031_v39, %v4213_v20  ;;  %v4211_v19 = vadd.f32 %v4120_v50, %v3124_v36  ;;  %v11108_v62 = vpop.f32.mrf.mxu0 }
 0x42d   : > { %v6013_v24 = vpop.f32.mrf.mxu1 }
 0x42e   : > { %v11105_v5 = vadd.f32 %v10976_v22, %v5242_v60  ;;  %v5240_v30 = vadd.f32 %v11041_v11, %v4211_v19  ;;  %v4214_v32 = vadd.f32 %v6013_v24, %v3135_v16  ;;  %v11127_v27 = vpop.f32.mrf.mxu0 }
 0x42f   : > { %v4123_v41 = vpop.f32.mrf.mxu1 }
 0x430   : > { %v5784_v18 = vmul.f32 -1.442695, %v11105_v5  ;;  %v11112_v45 = vadd.f32 %v10976_v22, %v5240_v30  ;;  %v5243_v39 = vadd.f32 %v11049_v44, %v4214_v32  ;;  %v4212_v29 = vadd.f32 %v4123_v41, %v3127_v1  ;;  %v6297_v11 = vpop.eup %6296 }
 0x431   : > { %v3151_v44 = vadd.f32 %v10913_v49, %v10919_v8  ;;  %v5501_v38 = vmul.f32 %v6297_v11, %v11052_v3 }
 0x432   : > { %6304 = vpow2.f32 %v5784_v18  ;;  %v5782_v25 = vmul.f32 -1.442695, %v11112_v45  ;;  %v11121_v17 = vadd.f32 %v10976_v22, %v5243_v39  ;;  %v5241_v10 = vadd.f32 %v11060_v4, %v4212_v29  ;;  %v6299_v34 = vpop.eup %6298 }
 0x433   : > { %v6016_v43 = vpop.f32.mrf.mxu1  ;;  %v3143_v4 = vadd.f32 %v10917_v31, %v10923_v56  ;;  %5534 = vst.msk [vmem:[%s11026_s10 + $0x50] sm:$0xff] %vm5523_vm8, %v5501_v38  ;;  %v5499_v49 = vmul.f32 %v6299_v34, %v11058_v55  ;;  %v3159_v39 = vadd.f32 %v10933_v48, %v10939_v0  ;;  %v13152_v38 = vld [vmem:[#allocation36_spill] sm:$0xff] }
 0x434   : > { %v4217_v61 = vadd.f32 %v6016_v43, %v3148_v42  ;;  %6306 = vpow2.f32 %v5782_v25  ;;  %v5785_v15 = vmul.f32 -1.442695, %v11121_v17  ;;  %v11131_v58 = vadd.f32 %v10976_v22, %v5241_v10  ;;  %v6301_v57 = vpop.eup %6300  ;;  %v13149_v25 = vld [vmem:[#allocation90_spill] sm:$0xff]  ;;  %v13150_v10 = vld [vmem:[#allocation79_spill] sm:$0xff] }
 0x435   : > { %v4136_v53 = vpop.f32.mrf.mxu1  ;;  %5532 = vst.msk [vmem:[%s11026_s10 + $0x40] sm:$0xff] %vm5523_vm8, %v5499_v49  ;;  %v5502_v40 = vmul.f32 %v6301_v57, %v11064_v28  ;;  %v3156_v28 = vadd.f32 %v10925_v2, %v10931_v37  ;;  %v13153_v49 = vld [vmem:[#allocation45_spill] sm:$0xff] }
 0x436   : > { %v4215_v14 = vadd.f32 %v4136_v53, %v3140_v23  ;;  %v5246_v8 = vadd.f32 %v11067_v52, %v4217_v61  ;;  %6308 = vpow2.f32 %v5785_v15  ;;  %v5783_v21 = vmul.f32 -1.442695, %v11131_v58 }
 0x437   : > { %v6017_v3 = vpop.f32.mrf.mxu1  ;;  %5535 = vst.msk [vmem:[%s11026_s10 + $0x58] sm:$0xff] %vm5523_vm8, %v5502_v40 }
 0x438   : > { %v5244_v35 = vadd.f32 %v11074_v6, %v4215_v14  ;;  %v4218_v9 = vadd.f32 %v6017_v3, %v3151_v44  ;;  %v11145_v31 = vadd.f32 %v10976_v22, %v5246_v8  ;;  %6310 = vpow2.f32 %v5783_v21  ;;  %v6303_v6 = vpop.eup %6302  ;;  %v13151_v44 = vld [vmem:[#allocation61_spill] sm:$0xff]  ;;  %v13154_v8 = vld [vmem:[#allocation59_spill] sm:$0xff] }
 0x439   : > { %v4139_v56 = vpop.f32.mrf.mxu1  ;;  %v5500_v16 = vmul.f32 %v6303_v6, %v11070_v26  ;;  %v3172_v61 = vadd.f32 %v13152_v38, %v13151_v44  ;;  %v3183_v3 = vadd.f32 %v13154_v8, %v13153_v49  ;;  %v13156_v6 = vld [vmem:[#allocation92_spill] sm:$0xff] }
 0x43a   : > { %v11150_v52 = vadd.f32 %v10976_v22, %v5244_v35  ;;  %v5247_v13 = vadd.f32 %v11081_v51, %v4218_v9  ;;  %v4216_v36 = vadd.f32 %v4139_v56, %v3143_v4  ;;  %v5788_v20 = vmul.f32 -1.442695, %v11145_v31 }
 0x43b   : > { %v11147_v55 = vpop.f32.mrf.mxu0  ;;  %v6020_v50 = vpop.f32.mrf.mxu1  ;;  %5533 = vst.msk [vmem:[%s11026_s10 + $0x48] sm:$0xff] %vm5523_vm8, %v5500_v16 }
 0x43c   : > { %v5786_v19 = vmul.f32 -1.442695, %v11150_v52  ;;  %v11163_v51 = vadd.f32 %v10976_v22, %v5247_v13  ;;  %v5245_v24 = vadd.f32 %v11089_v46, %v4216_v36  ;;  %6312 = vpow2.f32 %v5788_v20  ;;  %v13155_v36 = vld [vmem:[#allocation64_spill] sm:$0xff] }
 0x43d   : > { %v5197_v60 = vpop.f32.mrf.mxu0  ;;  %v4221_v2 = vadd.f32 %v6020_v50, %v3164_v7  ;;  %v4152_v54 = vpop.f32.mrf.mxu1  ;;  %v3175_v7 = vadd.f32 %v13156_v6, %v13155_v36 }
 0x43e   : > { %6314 = vpow2.f32 %v5786_v19  ;;  %v5789_v37 = vmul.f32 -1.442695, %v11163_v51  ;;  %v11172_v26 = vadd.f32 %v10976_v22, %v5245_v24  ;;  %v4219_v1 = vadd.f32 %v4152_v54, %v3156_v28 }
 0x43f   : > { %v6059_v30 = vpop.f32.mrf.mxu0  ;;  %v5250_v32 = vadd.f32 %v11093_v12, %v4221_v2  ;;  %v6021_v41 = vpop.f32.mrf.mxu1 }
 0x440   : > { %6316 = vpow2.f32 %v5789_v37  ;;  %v5787_v46 = vmul.f32 -1.442695, %v11172_v26  ;;  %v5248_v63 = vadd.f32 %v11099_v33, %v4219_v1  ;;  %v4222_v47 = vadd.f32 %v6021_v41, %v3167_v59  ;;  %v6305_v18 = vpop.eup %6304 }
 0x441   : > { %v11180_v29 = vadd.f32 %v10976_v22, %v5250_v32  ;;  %v4155_v42 = vpop.f32.mrf.mxu1  ;;  %v5409_v23 = vadd.f32 1.0, %v6305_v18  ;;  %v6307_v11 = vpop.eup %6306  ;;  %v3180_v33 = vadd.f32 %v13150_v10, %v13149_v25  ;;  %v13159_v10 = vld [vmem:[#allocation43_spill] sm:$0xff] }
 0x442   : > { %6318 = vpow2.f32 %v5787_v46  ;;  %v11183_v43 = vadd.f32 %v10976_v22, %v5248_v63  ;;  %v5251_v12 = vadd.f32 %v11108_v62, %v4222_v47  ;;  %v5200_v53 = vpop.f32.mrf.mxu0  ;;  %v4220_v0 = vadd.f32 %v4155_v42, %v3159_v39  ;;  %v13157_v46 = vld [vmem:[#allocation88_spill] sm:$0xff]  ;;  %v13158_v63 = vld [vmem:[#allocation62_spill] sm:$0xff] }
 0x443   : > { %v5792_v48 = vmul.f32 -1.442695, %v11180_v29  ;;  %v6024_v34 = vpop.f32.mrf.mxu1  ;;  %6320 = vrcp.f32 %v5409_v23  ;;  %v5407_v15 = vadd.f32 1.0, %v6307_v11  ;;  %v6309_v62 = vpop.eup %6308  ;;  %v3196_v47 = vadd.f32 %v13158_v63, %v13157_v46 }
 0x444   : > { %v5790_v14 = vmul.f32 -1.442695, %v11183_v43  ;;  %v11193_v4 = vadd.f32 %v10976_v22, %v5251_v12  ;;  %v5249_v57 = vadd.f32 %v11127_v27, %v4220_v0  ;;  %v4225_v21 = vadd.f32 %v6024_v34, %v3180_v33  ;;  %v6062_v28 = vpop.f32.mrf.mxu0  ;;  %v13160_v33 = vld [vmem:[#allocation28_spill] sm:$0xff]  ;;  %v13162_v0 = vld [vmem:[#allocation95_spill] sm:$0xff] }
 0x445   : > { %6322 = vpow2.f32 %v5792_v48  ;;  %v4168_v35 = vpop.f32.mrf.mxu1  ;;  %v5410_v9 = vadd.f32 1.0, %v6309_v62  ;;  %v6311_v13 = vpop.eup %6310  ;;  %v13161_v48 = vld [vmem:[#allocation40_spill] sm:$0xff] }
 0x446   : > { %6324 = vrcp.f32 %v5407_v15  ;;  %v5793_v40 = vmul.f32 -1.442695, %v11193_v4  ;;  %v4223_v56 = vadd.f32 %v4168_v35, %v3172_v61  ;;  %v11202_v20 = vadd.f32 %v10976_v22, %v5249_v57  ;;  %v5213_v18 = vpop.f32.mrf.mxu0 }
 0x447   : > { %6326 = vpow2.f32 %v5790_v14  ;;  %v5254_v50 = vadd.f32 %v11147_v55, %v4225_v21  ;;  %v6025_v16 = vpop.f32.mrf.mxu1  ;;  %v5408_v27 = vadd.f32 1.0, %v6311_v13  ;;  %v3199_v34 = vadd.f32 %v13162_v0, %v13161_v48 }
 0x448   : > { %6328 = vrcp.f32 %v5410_v9  ;;  %v5252_v19 = vadd.f32 %v5197_v60, %v4223_v56  ;;  %v4226_v24 = vadd.f32 %v6025_v16, %v3183_v3  ;;  %v5791_v59 = vmul.f32 -1.442695, %v11202_v20  ;;  %v6063_v49 = vpop.f32.mrf.mxu0 }
 0x449   : > { %6330 = vpow2.f32 %v5793_v40  ;;  %v11207_v2 = vadd.f32 %v10976_v22, %v5254_v50  ;;  %v4171_v54 = vpop.f32.mrf.mxu1  ;;  %v6313_v37 = vpop.eup %6312  ;;  %v13163_v50 = vld [vmem:[#allocation57_spill] sm:$0xff] }
 0x44a   : > { %6332 = vrcp.f32 %v5408_v27  ;;  %v11210_v1 = vadd.f32 %v10976_v22, %v5252_v19  ;;  %v5255_v32 = vadd.f32 %v6059_v30, %v4226_v24  ;;  %v4224_v41 = vadd.f32 %v4171_v54, %v3175_v7  ;;  %v5216_v19 = vpop.f32.mrf.mxu0 }
 0x44b   : > { %v6315_v55 = vpop.eup %6314  ;;  %v5413_v60 = vadd.f32 1.0, %v6313_v37  ;;  %6334 = vpow2.f32 %v5791_v59  ;;  %v5796_v39 = vmul.f32 -1.442695, %v11207_v2  ;;  %v6028_v42 = vpop.f32.mrf.mxu1  ;;  %v3188_v30 = vadd.f32 %v13160_v33, %v13159_v10 }
 0x44c   : > { %v5411_v23 = vadd.f32 1.0, %v6315_v55  ;;  %v11216_v12 = vadd.f32 %v10976_v22, %v5255_v32  ;;  %v5253_v11 = vadd.f32 %v5200_v53, %v4224_v41  ;;  %v5794_v44 = vmul.f32 -1.442695, %v11210_v1 }
 0x44d   : > { %v6317_v25 = vpop.eup %6316  ;;  %6336 = vrcp.f32 %v5413_v60  ;;  %v4229_v38 = vadd.f32 %v6028_v42, %v3196_v47  ;;  %v4184_v61 = vpop.f32.mrf.mxu1 }
 0x44e   : > { %6338 = vrcp.f32 %v5411_v23  ;;  %v5414_v15 = vadd.f32 1.0, %v6317_v25  ;;  %v11224_v14 = vadd.f32 %v10976_v22, %v5253_v11  ;;  %v5797_v53 = vmul.f32 -1.442695, %v11216_v12 }
 0x44f   : > { %v6319_v62 = vpop.eup %6318  ;;  %6340 = vpow2.f32 %v5796_v39  ;;  %v5258_v8 = vadd.f32 %v6062_v28, %v4229_v38  ;;  %v4227_v3 = vadd.f32 %v4184_v61, %v3188_v30  ;;  %v6029_v57 = vpop.f32.mrf.mxu1 }
 0x450   : > { %6342 = vrcp.f32 %v5414_v15  ;;  %v5412_v21 = vadd.f32 1.0, %v6319_v62  ;;  %v5795_v35 = vmul.f32 -1.442695, %v11224_v14  ;;  %v4230_v9 = vadd.f32 %v6029_v57, %v3199_v34  ;;  %v6321_v40 = vpop.eup %6320 }
 0x451   : > { %6344 = vpow2.f32 %v5794_v44  ;;  %v11229_v56 = vadd.f32 %v10976_v22, %v5258_v8  ;;  %v5256_v13 = vadd.f32 %v5213_v18, %v4227_v3  ;;  %v4187_v36 = vpop.f32.mrf.mxu1  ;;  %v5505_v7 = vmul.f32 %v6321_v40, %v11105_v5 }
 0x452   : > { %v6323_v6 = vpop.eup %6322  ;;  %6346 = vrcp.f32 %v5412_v21  ;;  %v5259_v28 = vadd.f32 %v6063_v49, %v4230_v9  ;;  %v4228_v16 = vadd.f32 %v4187_v36, %v13163_v50 }
 0x453   : > { %v6325_v27 = vpop.eup %6324  ;;  %v5417_v24 = vadd.f32 1.0, %v6323_v6  ;;  %6348 = vpow2.f32 %v5797_v53  ;;  %v5800_v59 = vmul.f32 -1.442695, %v11229_v56  ;;  %v11235_v54 = vadd.f32 %v10976_v22, %v5256_v13  ;;  %5538 = vst.msk [vmem:[%s11026_s10 + $0x70] sm:$0xff] %vm5523_vm8, %v5505_v7 }
 0x454   : > { %v6327_v37 = vpop.eup %6326  ;;  %v5503_v32 = vmul.f32 %v6325_v27, %v11112_v45  ;;  %6350 = vpow2.f32 %v5795_v35  ;;  %v11241_v5 = vadd.f32 %v10976_v22, %v5259_v28  ;;  %v5257_v41 = vadd.f32 %v5216_v19, %v4228_v16 }
 0x455   : > { %v6329_v55 = vpop.eup %6328  ;;  %6352 = vrcp.f32 %v5417_v24  ;;  %v5415_v46 = vadd.f32 1.0, %v6327_v37  ;;  %v5798_v63 = vmul.f32 -1.442695, %v11235_v54 }
 0x456   : > { %v6331_v47 = vpop.eup %6330  ;;  %5536 = vst.msk [vmem:[%s11026_s10 + $0x60] sm:$0xff] %vm5523_vm8, %v5503_v32  ;;  %v5506_v60 = vmul.f32 %v6329_v55, %v11121_v17  ;;  %6354 = vpow2.f32 %v5800_v59  ;;  %v5801_v45 = vmul.f32 -1.442695, %v11241_v5  ;;  %v11249_v18 = vadd.f32 %v10976_v22, %v5257_v41 }
 0x457   : > { %v6333_v39 = vpop.eup %6332  ;;  %6356 = vrcp.f32 %v5415_v46  ;;  %v5418_v42 = vadd.f32 1.0, %v6331_v47 }
 0x458   : > { %v6335_v23 = vpop.eup %6334  ;;  %5539 = vst.msk [vmem:[%s11026_s10 + $0x78] sm:$0xff] %vm5523_vm8, %v5506_v60  ;;  %v5504_v11 = vmul.f32 %v6333_v39, %v11131_v58  ;;  %6358 = vpow2.f32 %v5798_v63  ;;  %v5799_v25 = vmul.f32 -1.442695, %v11249_v18 }
 0x459   : > { %6360 = vrcp.f32 %v5418_v42  ;;  %v5416_v17 = vadd.f32 1.0, %v6335_v23 }
 0x45a   : > { %v6337_v10 = vpop.eup %6336  ;;  %5537 = vst.msk [vmem:[%s11026_s10 + $0x68] sm:$0xff] %vm5523_vm8, %v5504_v11  ;;  %6362 = vpow2.f32 %v5801_v45 }
 0x45b   : > { %v6339_v22 = vpop.eup %6338  ;;  %v5509_v33 = vmul.f32 %v6337_v10, %v11145_v31  ;;  %6364 = vrcp.f32 %v5416_v17 }
 0x45c   : > { %v6341_v30 = vpop.eup %6340  ;;  %v5507_v44 = vmul.f32 %v6339_v22, %v11150_v52  ;;  %6366 = vpow2.f32 %v5799_v25 }
 0x45d   : > { %v6343_v58 = vpop.eup %6342  ;;  %5542 = vst.msk [vmem:[%s11026_s10 + $0x90] sm:$0xff] %vm5523_vm8, %v5509_v33  ;;  %v5421_v38 = vadd.f32 1.0, %v6341_v30 }
 0x45e   : > { %v6345_v61 = vpop.eup %6344  ;;  %5540 = vst.msk [vmem:[%s11026_s10 + $0x80] sm:$0xff] %vm5523_vm8, %v5507_v44  ;;  %v5510_v48 = vmul.f32 %v6343_v58, %v11163_v51 }
 0x45f   : > { %v6347_v0 = vpop.eup %6346  ;;  %6368 = vrcp.f32 %v5421_v38  ;;  %v5419_v34 = vadd.f32 1.0, %v6345_v61 }
 0x460   : > { %v6349_v15 = vpop.eup %6348  ;;  %5543 = vst.msk [vmem:[%s11026_s10 + $0x98] sm:$0xff] %vm5523_vm8, %v5510_v48  ;;  %v5508_v31 = vmul.f32 %v6347_v0, %v11172_v26 }
 0x461   : > { %v6351_v52 = vpop.eup %6350  ;;  %6370 = vrcp.f32 %v5419_v34  ;;  %v5422_v62 = vadd.f32 1.0, %v6349_v15 }
 0x462   : > { %v6353_v49 = vpop.eup %6352  ;;  %5541 = vst.msk [vmem:[%s11026_s10 + $0x88] sm:$0xff] %vm5523_vm8, %v5508_v31  ;;  %v5420_v53 = vadd.f32 1.0, %v6351_v52 }
 0x463   : > { %v6355_v8 = vpop.eup %6354  ;;  %v5513_v51 = vmul.f32 %v6353_v49, %v11180_v29  ;;  %6372 = vrcp.f32 %v5422_v62 }
 0x464   : > { %v6357_v3 = vpop.eup %6356  ;;  %6374 = vrcp.f32 %v5420_v53  ;;  %v5425_v57 = vadd.f32 1.0, %v6355_v8 }
 0x465   : > { %v6359_v21 = vpop.eup %6358  ;;  %5546 = vst.msk [vmem:[%s11026_s10 + $0xb0] sm:$0xff] %vm5523_vm8, %v5513_v51  ;;  %v5511_v26 = vmul.f32 %v6357_v3, %v11183_v43 }
 0x466   : > { %v6361_v35 = vpop.eup %6360  ;;  %6376 = vrcp.f32 %v5425_v57  ;;  %v5423_v9 = vadd.f32 1.0, %v6359_v21 }
 0x467   : > { %v6363_v40 = vpop.eup %6362  ;;  %5544 = vst.msk [vmem:[%s11026_s10 + $0xa0] sm:$0xff] %vm5523_vm8, %v5511_v26  ;;  %v5514_v29 = vmul.f32 %v6361_v35, %v11193_v4 }
 0x468   : > { %v6365_v13 = vpop.eup %6364  ;;  %6378 = vrcp.f32 %v5423_v9  ;;  %v5426_v36 = vadd.f32 1.0, %v6363_v40 }
 0x469   : > { %v6367_v6 = vpop.eup %6366  ;;  %5547 = vst.msk [vmem:[%s11026_s10 + $0xb8] sm:$0xff] %vm5523_vm8, %v5514_v29  ;;  %v5512_v7 = vmul.f32 %v6365_v13, %v11202_v20 }
 0x46a   : > { %6380 = vrcp.f32 %v5426_v36  ;;  %v5424_v43 = vadd.f32 1.0, %v6367_v6 }
 0x46b   : > { %5545 = vst.msk [vmem:[%s11026_s10 + $0xa8] sm:$0xff] %vm5523_vm8, %v5512_v7 }
 0x46c   : > { %v6369_v28 = vpop.eup %6368  ;;  %6382 = vrcp.f32 %v5424_v43 }
 0x46d   : > { %v5517_v4 = vmul.f32 %v6369_v28, %v11207_v2 }
 0x46e   : > { %v6371_v50 = vpop.eup %6370 }
 0x46f   : > { %5550 = vst.msk [vmem:[%s11026_s10 + $0xd0] sm:$0xff] %vm5523_vm8, %v5517_v4  ;;  %v5515_v16 = vmul.f32 %v6371_v50, %v11210_v1 }
 0x470   : > { %v6373_v20 = vpop.eup %6372 }
 0x471   : > { %v6375_v27 = vpop.eup %6374  ;;  %5548 = vst.msk [vmem:[%s11026_s10 + $0xc0] sm:$0xff] %vm5523_vm8, %v5515_v16  ;;  %v5518_v19 = vmul.f32 %v6373_v20, %v11216_v12 }
 0x472   : > { %v5516_v24 = vmul.f32 %v6375_v27, %v11224_v14 }
 0x473   : > { %v6377_v59 = vpop.eup %6376  ;;  %5551 = vst.msk [vmem:[%s11026_s10 + $0xd8] sm:$0xff] %vm5523_vm8, %v5518_v19 }
 0x474   : > { %5549 = vst.msk [vmem:[%s11026_s10 + $0xc8] sm:$0xff] %vm5523_vm8, %v5516_v24  ;;  %v5521_v2 = vmul.f32 %v6377_v59, %v11229_v56 }
 0x475   : > { %v6379_v1 = vpop.eup %6378 }
 0x476   : > { %5554 = vst.msk [vmem:[%s11026_s10 + $0xf0] sm:$0xff] %vm5523_vm8, %v5521_v2  ;;  %v5519_v37 = vmul.f32 %v6379_v1, %v11235_v54 }
 0x477   : > { %v6381_v12 = vpop.eup %6380 }
 0x478   : > { %5552 = vst.msk [vmem:[%s11026_s10 + $0xe0] sm:$0xff] %vm5523_vm8, %v5519_v37  ;;  %v5522_v14 = vmul.f32 %v6381_v12, %v11241_v5 }
 0x479   : > { %v6383_v32 = vpop.eup %6382 }
 0x47a   : > { %5555 = vst.msk [vmem:[%s11026_s10 + $0xf8] sm:$0xff] %vm5523_vm8, %v5522_v14  ;;  %v5520_v56 = vmul.f32 %v6383_v32, %v11249_v18 }
 0x47c   : > { %5553 = vst.msk [vmem:[%s11026_s10 + $0xe8] sm:$0xff] %vm5523_vm8, %v5520_v56 }
 0x47d   : > { %6397 = shalt.err (!%p6394_p3)
}
 0x47e   : > { %s6398_s26 = scalar_lea.hbm %s11305_s15, 4096  ;;  %s6402_s7 = scalar_lea.hbm %s11361_s5, 8192 }
 0x47f   : > { %p6399_p4 = scmp.ne.s32.totalorder %s11305_s15, %s6398_s26  ;;  %p6403_p9 = scmp.lt.s32.totalorder %s11305_s15, %s11361_s5 }
 0x480   : > { %p6404_p10 = scmp.lt.s32.totalorder %s6402_s7, %s6398_s26 }
 0x481   : > { %p6400_p7 = pnand %p6399_p4, %p6517_p5 }
 0x482   : > { %p6405_p11 = por %p6404_p10, %p6403_p9 }
 0x483   : > { %p6401_p8 = pneg %p6400_p7 }
 0x485   : > { %p6406_p12 = pnand %p6405_p11, %p6401_p8 }
 0x487   : > { %6409 = shalt.err (!%p6406_p12)
}
 0x488   : > { %s6447_s10 = smov 128   ;;  %s6448_s11 = smov 8  }
 0x489   : > { %6070 = dma.vmem_to_hbm [thread:$0]  (%p6517_p5), %s11307_s12, 4096, %s11305_s15, %s11316_s22, %s6447_s10, %s6447_s10, %s6448_s11  }
 0x48a PF: > { %p6076_p13 = scmp.ge.s32.totalorder %s6444_s21, 2  ;;  %s5585_s13 = sand.u32 1, %s6432_s18  }
 0x48b   : > { %s5586_s14 = scalar_lea.sflag [#allocation3], %s5585_s13 }
 0x48c   : > { %p6073_p0 = pnand %p6076_p13, %p6521_p6 }
 0x48e   : > { %p6074_p1 = pneg %p6073_p0 }
 0x490   : > { %6427 = dma.done.wait (%p6074_p1), %s5586_s14, 4096  }
 0x491   : > { %6429 = vsyncadd (%p6074_p1), %s5586_s14, 4294963200  ;;  %p15_p2 = scmp.ge.s32.totalorder %s6504_s24, 4   ;;  %s13164_s18 = smov %s6436_s19 }
 0x492   : > { %s13165_s19 = smov %s6440_s20  ;;  %s13166_s20 = smov %s6515_s27 }
 0x493   : > { %s13167_s21 = smov %s6504_s24  ;;  %17 = sbr.rel (!%p15_p2) target bundleno = 3 (0x3), region = 75 }
 0x498   :  { %5591 = vsyncpa [#allocation3], 1 }
 0x499   :  { %5593 = vsyncpa [#allocation3 + $0x1], 1 }

</bundles_post_ra>
